<compile_context>
chip_gen: v6e
topology: v6e:2x2x1
jax: 0.10.0
libtpu: 0.0.40
codegen_flags: <defaults>
</compile_context>

<pallas_src>
import functools

import jax
import jax.numpy as jnp
from jax.experimental import pallas as pl
from jax.experimental.pallas import tpu as pltpu

DIM = 512                      # matches the PyTorch module
_LANE = 128


def _round_up(x, m):
    return (x + m - 1) // m * m


def _vmem_capacity_bytes():
    """Physical VMEM per TensorCore (64 MiB on v7x, 128 MiB on v5e/v6e)."""
    try:
        info = pltpu.get_tpu_info()
        for name in ("vmem_capacity_bytes", "vmem_bytes", "vmem_size_bytes"):
            v = getattr(info, name, None)
            if v:
                return int(v)
    except Exception:
        pass
    return 64 << 20            # conservative fallback (v7x per-TC size)


def _pick_tiles(B, C, HW, itemsize, batch_tile, x_budget):
    """Jointly choose (tb, thw) so the double-buffered x tile fits x_budget.

    thw must be a multiple of 128 or the full spatial extent (Pallas (8,128)
    block constraint); tb is shrunk first when nothing fits.  Raises instead
    of silently returning an over-budget full-HW tile.
    """
    max_elems = x_budget // (2 * C * itemsize)        # max tb*thw elements
    if max_elems < 1:
        raise ValueError("VMEM budget too small for a single row of x")

    if B < 8:
        tbs = [B]                                      # full batch in one block
    else:
        tb0 = min(batch_tile, B)
        tb0 = max(8, (tb0 // 8) * 8)                   # batch blocks: multiple of 8
        if B >= 16:
            # keep >= 2 batch tiles so the parallel axis can shard across the
            # two v7x TensorCores (no-op on single-TC v5e/v6e).
            tb0 = min(tb0, max(8, _round_up(-(-B // 2), 8)))
        tbs = sorted({t for t in (tb0, 32, 16, 8) if 8 <= t <= tb0}, reverse=True)

    for tb in tbs:
        cap = max_elems // tb
        if cap < 1:
            continue
        if HW <= cap:
            return tb, HW                              # whole spatial extent
        best = 0
        d = _LANE
        while d <= cap:                                # largest lane-aligned divisor
            if HW % d == 0:
                best = d
            d += _LANE
        if best:
            return tb, best

    # TODO(synk): support masked partial spatial tiles for awkward HW sizes.
    raise ValueError(
        f"No (batch, spatial) tiling of x (B={B}, C={C}, HW={HW}, "
        f"itemsize={itemsize}) fits the VMEM budget of {x_budget} bytes; "
        f"HW needs a lane-aligned divisor.")


# ---------------------------------------------------------------------------
# Kernels
# ---------------------------------------------------------------------------
def _accumulate_spatial(x_ref, acc_ref, s, *, chunks, lacc):
    """Per-step pooling accumulation.

    Lane-aligned 128-wide chunks of the spatial tile are summed with pure VPU
    adds into a lane-width f32 accumulator; the cross-lane (XLU) reduce is
    deferred to the finalize so the hot loop stays HBM-bound.
    """
    part = x_ref[:, :, 0:lacc].astype(jnp.float32)
    for g in range(1, chunks):                         # static, small trip count
        part = part + x_ref[:, :, g * lacc:(g + 1) * lacc].astype(jnp.float32)

    @pl.when(s == 0)
    def _init():
        acc_ref[...] = part

    @pl.when(s > 0)
    def _accum():
        acc_ref[...] += part


def _neck_ctx_kernel(x_ref, ctx_ref, w1h_ref, w1c_ref, b1_ref, w2_ref, b2_ref,
                     o_ref, acc_ref, *, inv_hw, chunks, lacc):
    s = pl.program_id(1)
    _accumulate_spatial(x_ref, acc_ref, s, chunks=chunks, lacc=lacc)

    @pl.when(s == pl.num_programs(1) - 1)
    def _finalize():
        # Single lacc->1 lane reduce per batch tile, then tiny MXU matmuls.
        h = (jnp.sum(acc_ref[...], axis=-1) * inv_hw).astype(jnp.bfloat16)
        # concat(h, context) @ W1  ==  h @ W1[:DIM] + context @ W1[DIM:]
        z = jnp.dot(h, w1h_ref[...], preferred_element_type=jnp.float32)
        z = z + jnp.dot(ctx_ref[...], w1c_ref[...],
                        preferred_element_type=jnp.float32)
        z = jnp.maximum(z + b1_ref[...], 0.0).astype(jnp.bfloat16)   # ReLU
        o_ref[...] = (jnp.dot(z, w2_ref[...], preferred_element_type=jnp.float32)
                      + b2_ref[...])


def _neck_plain_kernel(x_ref, w2_ref, b2_ref, o_ref, acc_ref,
                       *, inv_hw, chunks, lacc):
    s = pl.program_id(1)
    _accumulate_spatial(x_ref, acc_ref, s, chunks=chunks, lacc=lacc)

    @pl.when(s == pl.num_programs(1) - 1)
    def _finalize():
        h = (jnp.sum(acc_ref[...], axis=-1) * inv_hw).astype(jnp.bfloat16)
        o_ref[...] = (jnp.dot(h, w2_ref[...], preferred_element_type=jnp.float32)
                      + b2_ref[...])


# ---------------------------------------------------------------------------
# Parameters
# ---------------------------------------------------------------------------
def init_neck_params(key, hidden_dim, semantic_dim):
    """f32 master parameters matching the PyTorch layer shapes (stored transposed)."""
    k1, k2, k3, k4 = jax.random.split(key, 4)
    w1 = 0.02 * jax.random.normal(k1, (semantic_dim + DIM, DIM), jnp.float32)  # W.T
    b1 = 0.02 * jax.random.normal(k2, (1, DIM), jnp.float32)
    w2 = 0.02 * jax.random.normal(k3, (DIM, hidden_dim), jnp.float32)          # W.T
    b2 = 0.02 * jax.random.normal(k4, (1, hidden_dim), jnp.float32)
    return {"w1": w1, "b1": b1, "w2": w2, "b2": b2}


def pack_neck_params(params, hidden_dim, semantic_dim):
    """One-time conversion to kernel layout: split w1 into w1h/w1c, cast matmul
    weights to bf16, pad the output projection to a lane multiple."""
    hidden_pad = _round_up(hidden_dim, _LANE)
    w2 = params["w2"]
    b2 = params["b2"]
    if hidden_pad != hidden_dim:
        w2 = jnp.pad(w2, ((0, 0), (0, hidden_pad - hidden_dim)))
        b2 = jnp.pad(b2, ((0, 0), (0, hidden_pad - hidden_dim)))
    packed = {
        "w2": w2.astype(jnp.bfloat16),
        "b2": b2.astype(jnp.float32),
        "hidden_dim": hidden_dim,
        "hidden_pad": hidden_pad,
    }
    if semantic_dim > 0:
        packed["w1h"] = params["w1"][:DIM, :].astype(jnp.bfloat16)   # rows hit h
        packed["w1c"] = params["w1"][DIM:, :].astype(jnp.bfloat16)   # rows hit context
        packed["b1"] = params["b1"].astype(jnp.float32)
    return packed


# ---------------------------------------------------------------------------
# Forward
# ---------------------------------------------------------------------------
def neck_forward(kparams, x_last, context=None, *, semantic_dim, batch_tile=8):
    """x_last: last encoder feature, NCHW (B, DIM, H, W), f32 or bf16.
    context: (B, semantic_dim) or None."""
    B, C, H, W = x_last.shape
    assert C == DIM, "Neck expects the last encoder feature to have DIM channels"
    HW = H * W
    hidden_dim = kparams["hidden_dim"]
    hidden_pad = kparams["hidden_pad"]

    # Free, contiguous NCHW -> (B, C, H*W) view; no HBM transpose pass.
    x = x_last.reshape(B, C, HW)

    # Generation-aware VMEM budgeting (64 MiB/TC on v7x vs 128 MiB on v5e/v6e).
    vmem_cap = _vmem_capacity_bytes()
    vmem_limit = min((vmem_cap * 3) // 4, 100 << 20)
    x_budget = max(4 << 20, min(24 << 20, vmem_limit - (8 << 20)))

    tb, thw = _pick_tiles(B, C, HW, x.dtype.itemsize, batch_tile, x_budget)
    lacc = _LANE if thw % _LANE == 0 else thw
    chunks = thw // lacc
    # Last batch tile may be ragged (B % tb != 0): OOB rows are read into the
    # accumulator (rows are independent) but masked on output writeback.
    nb = pl.cdiv(B, tb)
    ns = HW // thw
    inv_hw = 1.0 / float(HW)

    out_shape = jax.ShapeDtypeStruct((B, hidden_pad), jnp.float32)
    x_spec = pl.BlockSpec((tb, C, thw), lambda b, s: (b, 0, s))
    out_spec = pl.BlockSpec((tb, hidden_pad), lambda b, s: (b, 0))

    def w_spec(shape):
        # TODO(synk): pipeline_mode=pl.Buffered(1) would drop the redundant
        # second buffer for these revisited (block (0,0)) weights.
        return pl.BlockSpec(shape, lambda b, s: (0, 0))

    scratch = [pltpu.VMEM((tb, C, lacc), jnp.float32)]
    cparams = pltpu.CompilerParams(
        dimension_semantics=("parallel", "arbitrary"),
        vmem_limit_bytes=int(vmem_limit))

    x_bytes = x.size * x.dtype.itemsize
    out_bytes = B * hidden_pad * 4
    pool_flops = B * HW * C

    use_ctx = semantic_dim > 0 and context is not None
    if use_ctx:
        context = jnp.asarray(context, jnp.bfloat16)   # pre-cast once (half DMA)
        flops = pool_flops + 2 * B * (DIM * DIM + semantic_dim * DIM + DIM * hidden_pad)
        bytes_accessed = (x_bytes + B * semantic_dim * 2 + out_bytes
                          + 2 * (DIM * DIM + semantic_dim * DIM + DIM * hidden_pad)
                          + 4 * (DIM + hidden_pad))
        out = pl.pallas_call(
            functools.partial(_neck_ctx_kernel, inv_hw=inv_hw,
                              chunks=chunks, lacc=lacc),
            out_shape=out_shape,
            grid_spec=pltpu.PrefetchScalarGridSpec(
                num_scalar_prefetch=0,
                grid=(nb, ns),
                in_specs=[x_spec,
                          pl.BlockSpec((tb, semantic_dim), lambda b, s: (b, 0)),
                          w_spec((DIM, DIM)),
                          w_spec((semantic_dim, DIM)),
                          w_spec((1, DIM)),
                          w_spec((DIM, hidden_pad)),
                          w_spec((1, hidden_pad))],
                out_specs=out_spec,
                scratch_shapes=scratch),
            compiler_params=cparams,
            cost_estimate=pl.CostEstimate(flops=int(flops), transcendentals=0,
                                          bytes_accessed=int(bytes_accessed)),
        )(x, context, kparams["w1h"], kparams["w1c"], kparams["b1"],
          kparams["w2"], kparams["b2"])
    else:
        flops = pool_flops + 2 * B * DIM * hidden_pad
        bytes_accessed = (x_bytes + out_bytes
                          + 2 * DIM * hidden_pad + 4 * hidden_pad)
        out = pl.pallas_call(
            functools.partial(_neck_plain_kernel, inv_hw=inv_hw,
                              chunks=chunks, lacc=lacc),
            out_shape=out_shape,
            grid_spec=pltpu.PrefetchScalarGridSpec(
                num_scalar_prefetch=0,
                grid=(nb, ns),
                in_specs=[x_spec,
                          w_spec((DIM, hidden_pad)),
                          w_spec((1, hidden_pad))],
                out_specs=out_spec,
                scratch_shapes=scratch),
            compiler_params=cparams,
            cost_estimate=pl.CostEstimate(flops=int(flops), transcendentals=0,
                                          bytes_accessed=int(bytes_accessed)),
        )(x, kparams["w2"], kparams["b2"])

    if hidden_pad != hidden_dim:
        out = out[:, :hidden_dim]
    return out


# ---------------------------------------------------------------------------
# Reference + self-test
# ---------------------------------------------------------------------------
def _reference(params, x_last, context, semantic_dim):
    h = jnp.mean(x_last.astype(jnp.float32), axis=(2, 3))             # (B, DIM)
    if semantic_dim > 0 and context is not None:
        hc = jnp.concatenate([h, jnp.asarray(context, jnp.float32)], axis=1)
        h = jnp.maximum(hc @ params["w1"] + params["b1"], 0.0)
    return h @ params["w2"] + params["b2"]


if __name__ == "__main__":
    key = jax.random.PRNGKey(0)
    k_param, k_x, k_ctx = jax.random.split(key, 3)

    hidden_dim = 128
    semantic_dim = 64
    B, H, W = 2, 8, 8

    params = init_neck_params(k_param, hidden_dim, semantic_dim)
    kparams = pack_neck_params(params, hidden_dim, semantic_dim)

    # x is the last element of the encoder feature list: NCHW with DIM channels.
    x_last = jax.random.normal(k_x, (B, DIM, H, W), jnp.float32)
    context = jax.random.normal(k_ctx, (B, semantic_dim), jnp.float32)

    # Path with semantic context (context_projection active).
    out_ctx = neck_forward(kparams, x_last, context, semantic_dim=semantic_dim)
    jax.block_until_ready(out_ctx)

    # Path without context (latent projection only).
    out_plain = neck_forward(kparams, x_last, None, semantic_dim=semantic_dim)
    jax.block_until_ready(out_plain)

    ref_ctx = _reference(params, x_last, context, semantic_dim)
    ref_plain = _reference(params, x_last, None, 0)

    assert out_ctx.shape == (B, hidden_dim) and out_plain.shape == (B, hidden_dim)
    assert jnp.allclose(out_ctx, ref_ctx, rtol=2e-2, atol=2e-2)
    assert jnp.allclose(out_plain, ref_plain, rtol=2e-2, atol=2e-2)

    print("KERNEL_OK")
</pallas_src>

<mosaic_0001>
module attributes {stable_mosaic.version = 11 : i64} {
  func.func @_neck_ctx_kernel(%arg0: i32, %arg1: i32, %arg2: memref<2x512x64xf32, #tpu.memory_space<vmem>>, %arg3: memref<2x64xbf16, #tpu.memory_space<vmem>>, %arg4: memref<512x512xbf16, #tpu.memory_space<vmem>>, %arg5: memref<64x512xbf16, #tpu.memory_space<vmem>>, %arg6: memref<1x512xf32, #tpu.memory_space<vmem>>, %arg7: memref<512x128xbf16, #tpu.memory_space<vmem>>, %arg8: memref<1x128xf32, #tpu.memory_space<vmem>>, %arg9: memref<2x128xf32, #tpu.memory_space<vmem>>, %arg10: memref<2x512x64xf32, #tpu.memory_space<vmem>>) attributes {dimension_semantics = [#tpu.dimension_semantics<parallel>, #tpu.dimension_semantics<arbitrary>], iteration_bounds = array<i64: 1, 1>, scalar_prefetch = 0 : i64, scratch_operands = 1 : i64, tpu.core_type = #tpu.core_type<tc>, window_params = [{transform_indices = @transform_0, window_bounds = array<i64: 2, 512, 64>}, {transform_indices = @transform_1, window_bounds = array<i64: 2, 64>}, {pipeline_mode = #tpu.pipeline_mode<synchronous>, transform_indices = @transform_2, window_bounds = array<i64: 512, 512>}, {pipeline_mode = #tpu.pipeline_mode<synchronous>, transform_indices = @transform_3, window_bounds = array<i64: 64, 512>}, {pipeline_mode = #tpu.pipeline_mode<synchronous>, transform_indices = @transform_4, window_bounds = array<i64: 1, 512>}, {pipeline_mode = #tpu.pipeline_mode<synchronous>, transform_indices = @transform_5, window_bounds = array<i64: 512, 128>}, {pipeline_mode = #tpu.pipeline_mode<synchronous>, transform_indices = @transform_6, window_bounds = array<i64: 1, 128>}, {transform_indices = @transform_7, window_bounds = array<i64: 2, 128>}]} {
    %c0 = arith.constant 0 : index
    %c0_0 = arith.constant 0 : index
    %c0_1 = arith.constant 0 : index
    %0 = vector.load %arg2[%c0, %c0_0, %c0_1] : memref<2x512x64xf32, #tpu.memory_space<vmem>>, vector<2x512x64xf32>
    %c0_i32 = arith.constant 0 : i32
    %1 = arith.cmpi eq, %arg1, %c0_i32 : i32
    %2 = arith.extui %1 : i1 to i32
    %c0_i32_2 = arith.constant 0 : i32
    %3 = arith.cmpi ne, %2, %c0_i32_2 : i32
    scf.if %3 {
      %c0_7 = arith.constant 0 : index
      %c0_8 = arith.constant 0 : index
      %c0_9 = arith.constant 0 : index
      %10 = vector.load %arg10[%c0_7, %c0_8, %c0_9] : memref<2x512x64xf32, #tpu.memory_space<vmem>>, vector<2x512x64xf32>
      tpu.vector_store %arg10[%c0_7, %c0_8, %c0_9], %0 {strides = array<i32>} : memref<2x512x64xf32, #tpu.memory_space<vmem>>, vector<2x512x64xf32>,
    } else {
    }
    %c0_i32_3 = arith.constant 0 : i32
    %4 = arith.cmpi sgt, %arg1, %c0_i32_3 : i32
    %5 = arith.extui %4 : i1 to i32
    %c0_i32_4 = arith.constant 0 : i32
    %6 = arith.cmpi ne, %5, %c0_i32_4 : i32
    scf.if %6 {
      %c0_7 = arith.constant 0 : index
      %c0_8 = arith.constant 0 : index
      %c0_9 = arith.constant 0 : index
      %10 = vector.load %arg10[%c0_7, %c0_8, %c0_9] : memref<2x512x64xf32, #tpu.memory_space<vmem>>, vector<2x512x64xf32>
      %11 = arith.addf %10, %0 : vector<2x512x64xf32>
      %c0_10 = arith.constant 0 : index
      %c0_11 = arith.constant 0 : index
      %c0_12 = arith.constant 0 : index
      %12 = vector.load %arg10[%c0_10, %c0_11, %c0_12] : memref<2x512x64xf32, #tpu.memory_space<vmem>>, vector<2x512x64xf32>
      tpu.vector_store %arg10[%c0_10, %c0_11, %c0_12], %11 {strides = array<i32>} : memref<2x512x64xf32, #tpu.memory_space<vmem>>, vector<2x512x64xf32>,
    } else {
    }
    %c0_i32_5 = arith.constant 0 : i32
    %7 = arith.cmpi eq, %arg1, %c0_i32_5 : i32
    %8 = arith.extui %7 : i1 to i32
    %c0_i32_6 = arith.constant 0 : i32
    %9 = arith.cmpi ne, %8, %c0_i32_6 : i32
    scf.if %9 {
      %c0_7 = arith.constant 0 : index
      %c0_8 = arith.constant 0 : index
      %c0_9 = arith.constant 0 : index
      %10 = vector.load %arg10[%c0_7, %c0_8, %c0_9] : memref<2x512x64xf32, #tpu.memory_space<vmem>>, vector<2x512x64xf32>
      %cst = arith.constant dense<0.000000e+00> : vector<2x512xf32>
      %11 = vector.multi_reduction <add>, %10, %cst [2] : vector<2x512x64xf32> to vector<2x512xf32>
      %cst_10 = arith.constant 1.562500e-02 : f32
      %12 = vector.broadcast %cst_10 : f32 to vector<2x512xf32>
      %13 = arith.mulf %11, %12 : vector<2x512xf32>
      %14 = arith.truncf %13 : vector<2x512xf32> to vector<2x512xbf16>
      %c0_11 = arith.constant 0 : index
      %c0_12 = arith.constant 0 : index
      %15 = vector.load %arg4[%c0_11, %c0_12] : memref<512x512xbf16, #tpu.memory_space<vmem>>, vector<512x512xbf16>
      %cst_13 = arith.constant dense<0.000000e+00> : vector<2x512xf32>
      %16 = tpu.matmul %14, %15, %cst_13 {dimension_numbers = #tpu.dot_dimension_numbers<[1], [0], [0], [1], [0, 0, 1, 1], [], []>} : vector<2x512xbf16>, vector<512x512xbf16>, vector<2x512xf32> -> vector<2x512xf32>
      %c0_14 = arith.constant 0 : index
      %c0_15 = arith.constant 0 : index
      %17 = vector.load %arg3[%c0_14, %c0_15] : memref<2x64xbf16, #tpu.memory_space<vmem>>, vector<2x64xbf16>
      %c0_16 = arith.constant 0 : index
      %c0_17 = arith.constant 0 : index
      %18 = vector.load %arg5[%c0_16, %c0_17] : memref<64x512xbf16, #tpu.memory_space<vmem>>, vector<64x512xbf16>
      %cst_18 = arith.constant dense<0.000000e+00> : vector<2x512xf32>
      %19 = tpu.matmul %17, %18, %cst_18 {dimension_numbers = #tpu.dot_dimension_numbers<[1], [0], [0], [1], [0, 0, 1, 1], [], []>} : vector<2x64xbf16>, vector<64x512xbf16>, vector<2x512xf32> -> vector<2x512xf32>
      %20 = arith.addf %16, %19 : vector<2x512xf32>
      %c0_19 = arith.constant 0 : index
      %c0_20 = arith.constant 0 : index
      %21 = vector.load %arg6[%c0_19, %c0_20] : memref<1x512xf32, #tpu.memory_space<vmem>>, vector<1x512xf32>
      %22 = vector.broadcast %21 : vector<1x512xf32> to vector<2x512xf32>
      %23 = arith.addf %20, %22 : vector<2x512xf32>
      %cst_21 = arith.constant 0.000000e+00 : f32
      %24 = vector.broadcast %cst_21 : f32 to vector<2x512xf32>
      %25 = arith.maximumf %23, %24 : vector<2x512xf32>
      %26 = arith.truncf %25 : vector<2x512xf32> to vector<2x512xbf16>
      %c0_22 = arith.constant 0 : index
      %c0_23 = arith.constant 0 : index
      %27 = vector.load %arg7[%c0_22, %c0_23] : memref<512x128xbf16, #tpu.memory_space<vmem>>, vector<512x128xbf16>
      %cst_24 = arith.constant dense<0.000000e+00> : vector<2x128xf32>
      %28 = tpu.matmul %26, %27, %cst_24 {dimension_numbers = #tpu.dot_dimension_numbers<[1], [0], [0], [1], [0, 0, 1, 1], [], []>} : vector<2x512xbf16>, vector<512x128xbf16>, vector<2x128xf32> -> vector<2x128xf32>
      %c0_25 = arith.constant 0 : index
      %c0_26 = arith.constant 0 : index
      %29 = vector.load %arg8[%c0_25, %c0_26] : memref<1x128xf32, #tpu.memory_space<vmem>>, vector<1x128xf32>
      %30 = vector.broadcast %29 : vector<1x128xf32> to vector<2x128xf32>
      %31 = arith.addf %28, %30 : vector<2x128xf32>
      %c0_27 = arith.constant 0 : index
      %c0_28 = arith.constant 0 : index
      %32 = vector.load %arg9[%c0_27, %c0_28] : memref<2x128xf32, #tpu.memory_space<vmem>>, vector<2x128xf32>
      tpu.vector_store %arg9[%c0_27, %c0_28], %31 {strides = array<i32>} : memref<2x128xf32, #tpu.memory_space<vmem>>, vector<2x128xf32>,
    } else {
    }
    return
  }
  func.func @transform_0(%arg0: i32, %arg1: i32) -> (i32, i32, i32) {
    %c0_i32 = arith.constant 0 : i32
    %c0_i32_0 = arith.constant 0 : i32
    return %arg0, %c0_i32, %arg1 : i32, i32, i32
  }
  func.func @transform_1(%arg0: i32, %arg1: i32) -> (i32, i32) {
    %c0_i32 = arith.constant 0 : i32
    %c0_i32_0 = arith.constant 0 : i32
    return %arg0, %c0_i32 : i32, i32
  }
  func.func @transform_2(%arg0: i32, %arg1: i32) -> (i32, i32) {
    %c0_i32 = arith.constant 0 : i32
    %c0_i32_0 = arith.constant 0 : i32
    %c0_i32_1 = arith.constant 0 : i32
    return %c0_i32, %c0_i32_0 : i32, i32
  }
  func.func @transform_3(%arg0: i32, %arg1: i32) -> (i32, i32) {
    %c0_i32 = arith.constant 0 : i32
    %c0_i32_0 = arith.constant 0 : i32
    %c0_i32_1 = arith.constant 0 : i32
    return %c0_i32, %c0_i32_0 : i32, i32
  }
  func.func @transform_4(%arg0: i32, %arg1: i32) -> (i32, i32) {
    %c0_i32 = arith.constant 0 : i32
    %c0_i32_0 = arith.constant 0 : i32
    %c0_i32_1 = arith.constant 0 : i32
    return %c0_i32, %c0_i32_0 : i32, i32
  }
  func.func @transform_5(%arg0: i32, %arg1: i32) -> (i32, i32) {
    %c0_i32 = arith.constant 0 : i32
    %c0_i32_0 = arith.constant 0 : i32
    %c0_i32_1 = arith.constant 0 : i32
    return %c0_i32, %c0_i32_0 : i32, i32
  }
  func.func @transform_6(%arg0: i32, %arg1: i32) -> (i32, i32) {
    %c0_i32 = arith.constant 0 : i32
    %c0_i32_0 = arith.constant 0 : i32
    %c0_i32_1 = arith.constant 0 : i32
    return %c0_i32, %c0_i32_0 : i32, i32
  }
  func.func @transform_7(%arg0: i32, %arg1: i32) -> (i32, i32) {
    %c0_i32 = arith.constant 0 : i32
    %c0_i32_0 = arith.constant 0 : i32
    return %arg0, %c0_i32 : i32, i32
  }
}

</mosaic_0001>

<bundles_post_ra>
// kernel: tpu_custom_call.1
= control target key start
LH: loop header
LB: loop body
LE: loop exit
PB: predicated region body
PF: predicated region fallthrough
CT: control target
= control target key end

     0   :  { %vm160_vm0 = vcmask 523264   ;;  %s6007_s0 = inlined_call_operand.vmem [shape: f32[2,512,64], index: 0, kind: input, shape index: {}]   ;;  %s6008_s1 = inlined_call_operand.vmem [shape: bf16[2,64], index: 1, kind: input, shape index: {}]   ;;  %s6009_s2 = inlined_call_operand.vmem [shape: bf16[512,512], index: 2, kind: input, shape index: {}]   ;;  %s6010_s3 = inlined_call_operand.vmem [shape: bf16[64,512], index: 3, kind: input, shape index: {}]   ;;  %s6011_s4 = inlined_call_operand.vmem [shape: f32[1,512], index: 4, kind: input, shape index: {}]   ;;  %s6012_s5 = inlined_call_operand.vmem [shape: bf16[512,128], index: 5, kind: input, shape index: {}]   ;;  %s6013_s6 = inlined_call_operand.vmem [shape: f32[1,128], index: 6, kind: input, shape index: {}]   ;;  %s6014_s7 = inlined_call_operand.hbm [shape: f32[2,128], index: 7, kind: output, shape index: {}]  }
   0x1   :  { %v108_v0 = vld [vmem:[%s6007_s0 + $0x280] sm:$0xff]  ;;  %v109_v2 = vld [vmem:[%s6007_s0 + $0x288] sm:$0xff]  ;;  %v47_v6 = vld [vmem:[%s6007_s0 + $0x98] sm:$0xff] }
   0x2   :  { %v44_v1 = vld [vmem:[%s6007_s0 + $0x80] sm:$0xff]  ;;  %241 = vst.msk [vmem:[#allocation2 + $0x280] sm:$0xff] %vm160_vm0, %v108_v0  ;;  %242 = vst.msk [vmem:[#allocation2 + $0x288] sm:$0xff] %vm160_vm0, %v109_v2  ;;  %v45_v3 = vld [vmem:[%s6007_s0 + $0x88] sm:$0xff] }
   0x3   :  { %177 = vst.msk [vmem:[#allocation2 + $0x80] sm:$0xff] %vm160_vm0, %v44_v1  ;;  %v29_v4 = vld [vmem:[%s6007_s0 + $0x8] sm:$0xff]  ;;  %v28_v5 = vld [vmem:[%s6007_s0] sm:$0xff]  ;;  %178 = vst.msk [vmem:[#allocation2 + $0x88] sm:$0xff] %vm160_vm0, %v45_v3 }
   0x4   :  { %162 = vst.msk [vmem:[#allocation2 + $0x8] sm:$0xff] %vm160_vm0, %v29_v4  ;;  %161 = vst.msk [vmem:[#allocation2] sm:$0xff] %vm160_vm0, %v28_v5  ;;  %v46_v7 = vld [vmem:[%s6007_s0 + $0x90] sm:$0xff]  ;;  %v93_v8 = vld [vmem:[%s6007_s0 + $0x208] sm:$0xff] }
   0x5   :  { %180 = vst.msk [vmem:[#allocation2 + $0x98] sm:$0xff] %vm160_vm0, %v47_v6  ;;  %179 = vst.msk [vmem:[#allocation2 + $0x90] sm:$0xff] %vm160_vm0, %v46_v7  ;;  %v92_v9 = vld [vmem:[%s6007_s0 + $0x200] sm:$0xff]  ;;  %v111_v10 = vld [vmem:[%s6007_s0 + $0x298] sm:$0xff] }
   0x6   :  { %226 = vst.msk [vmem:[#allocation2 + $0x208] sm:$0xff] %vm160_vm0, %v93_v8  ;;  %v110_v11 = vld [vmem:[%s6007_s0 + $0x290] sm:$0xff]  ;;  %225 = vst.msk [vmem:[#allocation2 + $0x200] sm:$0xff] %vm160_vm0, %v92_v9  ;;  %v31_v12 = vld [vmem:[%s6007_s0 + $0x18] sm:$0xff] }
   0x7   :  { %244 = vst.msk [vmem:[#allocation2 + $0x298] sm:$0xff] %vm160_vm0, %v111_v10  ;;  %243 = vst.msk [vmem:[#allocation2 + $0x290] sm:$0xff] %vm160_vm0, %v110_v11  ;;  %v30_v13 = vld [vmem:[%s6007_s0 + $0x10] sm:$0xff]  ;;  %v77_v14 = vld [vmem:[%s6007_s0 + $0x188] sm:$0xff] }
   0x8   :  { %164 = vst.msk [vmem:[#allocation2 + $0x18] sm:$0xff] %vm160_vm0, %v31_v12  ;;  %163 = vst.msk [vmem:[#allocation2 + $0x10] sm:$0xff] %vm160_vm0, %v30_v13  ;;  %v76_v15 = vld [vmem:[%s6007_s0 + $0x180] sm:$0xff]  ;;  %v95_v16 = vld [vmem:[%s6007_s0 + $0x218] sm:$0xff] }
   0x9   :  { %210 = vst.msk [vmem:[#allocation2 + $0x188] sm:$0xff] %vm160_vm0, %v77_v14  ;;  %v94_v17 = vld [vmem:[%s6007_s0 + $0x210] sm:$0xff]  ;;  %209 = vst.msk [vmem:[#allocation2 + $0x180] sm:$0xff] %vm160_vm0, %v76_v15  ;;  %v141_v18 = vld [vmem:[%s6007_s0 + $0x388] sm:$0xff] }
   0xa   :  { %228 = vst.msk [vmem:[#allocation2 + $0x218] sm:$0xff] %vm160_vm0, %v95_v16  ;;  %227 = vst.msk [vmem:[#allocation2 + $0x210] sm:$0xff] %vm160_vm0, %v94_v17  ;;  %v140_v19 = vld [vmem:[%s6007_s0 + $0x380] sm:$0xff]  ;;  %v49_v20 = vld [vmem:[%s6007_s0 + $0xa8] sm:$0xff] }
   0xb   :  { %274 = vst.msk [vmem:[#allocation2 + $0x388] sm:$0xff] %vm160_vm0, %v141_v18  ;;  %273 = vst.msk [vmem:[#allocation2 + $0x380] sm:$0xff] %vm160_vm0, %v140_v19  ;;  %v48_v21 = vld [vmem:[%s6007_s0 + $0xa0] sm:$0xff]  ;;  %v61_v22 = vld [vmem:[%s6007_s0 + $0x108] sm:$0xff] }
   0xc   :  { %182 = vst.msk [vmem:[#allocation2 + $0xa8] sm:$0xff] %vm160_vm0, %v49_v20  ;;  %v60_v23 = vld [vmem:[%s6007_s0 + $0x100] sm:$0xff]  ;;  %v762_v26 = vld [vmem:[#allocation2 + $0x288] sm:$0xff]  ;;  %181 = vst.msk [vmem:[#allocation2 + $0xa0] sm:$0xff] %vm160_vm0, %v48_v21 }
   0xd   :  { %v761_v24 = vld [vmem:[#allocation2 + $0x280] sm:$0xff]  ;;  %194 = vst.msk [vmem:[#allocation2 + $0x108] sm:$0xff] %vm160_vm0, %v61_v22  ;;  %193 = vst.msk [vmem:[#allocation2 + $0x100] sm:$0xff] %vm160_vm0, %v60_v23  ;;  %v698_v29 = vld [vmem:[#allocation2 + $0x88] sm:$0xff]  ;;  %v1053_v30 = vsel %vm160_vm0, %v762_v26, 0.0 }
   0xe   :  { %v697_v25 = vld [vmem:[#allocation2 + $0x80] sm:$0xff]  ;;  %v1050_v27 = vsel %vm160_vm0, %v761_v24, 0.0  ;;  %v861_v31 = vsel %vm160_vm0, %v698_v29, 0.0  ;;  %v682_v32 = vld [vmem:[#allocation2 + $0x8] sm:$0xff]  ;;  %v700_v36 = vld [vmem:[#allocation2 + $0x98] sm:$0xff] }
   0xf   :  { %v858_v28 = vsel %vm160_vm0, %v697_v25, 0.0  ;;  %1051 = vadd.xlane.f32.xlu1 %v1050_v27  ;;  %v681_v33 = vld [vmem:[#allocation2] sm:$0xff]  ;;  %v813_v34 = vsel %vm160_vm0, %v682_v32, 0.0  ;;  %v699_v37 = vld [vmem:[#allocation2 + $0x90] sm:$0xff]  ;;  %v79_v38 = vld [vmem:[%s6007_s0 + $0x198] sm:$0xff]  ;;  %v867_v49 = vsel %vm160_vm0, %v700_v36, 0.0 }
  0x10   :  { %859 = vadd.xlane.f32.xlu0 %v858_v28  ;;  %v810_v35 = vsel %vm160_vm0, %v681_v33, 0.0  ;;  %v78_v39 = vld [vmem:[%s6007_s0 + $0x190] sm:$0xff]  ;;  %v113_v40 = vld [vmem:[%s6007_s0 + $0x2a8] sm:$0xff]  ;;  %212 = vst.msk [vmem:[#allocation2 + $0x198] sm:$0xff] %vm160_vm0, %v79_v38  ;;  %v112_v41 = vld [vmem:[%s6007_s0 + $0x2a0] sm:$0xff]  ;;  %v864_v50 = vsel %vm160_vm0, %v699_v37, 0.0 }
  0x11   :  { %211 = vst.msk [vmem:[#allocation2 + $0x190] sm:$0xff] %vm160_vm0, %v78_v39  ;;  %246 = vst.msk [vmem:[#allocation2 + $0x2a8] sm:$0xff] %vm160_vm0, %v113_v40  ;;  %v125_v42 = vld [vmem:[%s6007_s0 + $0x308] sm:$0xff]  ;;  %v124_v43 = vld [vmem:[%s6007_s0 + $0x300] sm:$0xff] }
  0x12   :  { %v746_v44 = vld [vmem:[#allocation2 + $0x208] sm:$0xff]  ;;  %v745_v45 = vld [vmem:[#allocation2 + $0x200] sm:$0xff]  ;;  %245 = vst.msk [vmem:[#allocation2 + $0x2a0] sm:$0xff] %vm160_vm0, %v112_v41  ;;  %258 = vst.msk [vmem:[#allocation2 + $0x308] sm:$0xff] %vm160_vm0, %v125_v42 }
  0x13   :  { %1054 = vadd.xlane.f32.xlu1 %v1053_v30  ;;  %257 = vst.msk [vmem:[#allocation2 + $0x300] sm:$0xff] %vm160_vm0, %v124_v43  ;;  %v143_v46 = vld [vmem:[%s6007_s0 + $0x398] sm:$0xff]  ;;  %v142_v47 = vld [vmem:[%s6007_s0 + $0x390] sm:$0xff]  ;;  %v33_v48 = vld [vmem:[%s6007_s0 + $0x28] sm:$0xff]  ;;  %v1005_v63 = vsel %vm160_vm0, %v746_v44, 0.0  ;;  %v1002_v0 = vsel %vm160_vm0, %v745_v45, 0.0 }
  0x14   :  { %862 = vadd.xlane.f32.xlu0 %v861_v31  ;;  %276 = vst.msk [vmem:[#allocation2 + $0x398] sm:$0xff] %vm160_vm0, %v143_v46  ;;  %275 = vst.msk [vmem:[#allocation2 + $0x390] sm:$0xff] %vm160_vm0, %v142_v47  ;;  %v32_v51 = vld [vmem:[%s6007_s0 + $0x20] sm:$0xff]  ;;  %v63_v52 = vld [vmem:[%s6007_s0 + $0x118] sm:$0xff] }
  0x15   :  { %166 = vst.msk [vmem:[#allocation2 + $0x28] sm:$0xff] %vm160_vm0, %v33_v48  ;;  %v62_v53 = vld [vmem:[%s6007_s0 + $0x110] sm:$0xff]  ;;  %165 = vst.msk [vmem:[#allocation2 + $0x20] sm:$0xff] %vm160_vm0, %v32_v51  ;;  %v97_v54 = vld [vmem:[%s6007_s0 + $0x228] sm:$0xff] }
  0x16   :  { %196 = vst.msk [vmem:[#allocation2 + $0x118] sm:$0xff] %vm160_vm0, %v63_v52  ;;  %195 = vst.msk [vmem:[#allocation2 + $0x110] sm:$0xff] %vm160_vm0, %v62_v53  ;;  %v96_v55 = vld [vmem:[%s6007_s0 + $0x220] sm:$0xff]  ;;  %v127_v56 = vld [vmem:[%s6007_s0 + $0x318] sm:$0xff] }
  0x17   :  { %814 = vadd.xlane.f32.xlu1 %v813_v34  ;;  %230 = vst.msk [vmem:[#allocation2 + $0x228] sm:$0xff] %vm160_vm0, %v97_v54  ;;  %229 = vst.msk [vmem:[#allocation2 + $0x220] sm:$0xff] %vm160_vm0, %v96_v55  ;;  %v126_v57 = vld [vmem:[%s6007_s0 + $0x310] sm:$0xff]  ;;  %v51_v58 = vld [vmem:[%s6007_s0 + $0xb8] sm:$0xff] }
  0x18   :  { %811 = vadd.xlane.f32.xlu0 %v810_v35  ;;  %260 = vst.msk [vmem:[#allocation2 + $0x318] sm:$0xff] %vm160_vm0, %v127_v56  ;;  %v50_v59 = vld [vmem:[%s6007_s0 + $0xb0] sm:$0xff]  ;;  %259 = vst.msk [vmem:[#allocation2 + $0x310] sm:$0xff] %vm160_vm0, %v126_v57  ;;  %v81_v60 = vld [vmem:[%s6007_s0 + $0x1a8] sm:$0xff] }
  0x19   :  { %184 = vst.msk [vmem:[#allocation2 + $0xb8] sm:$0xff] %vm160_vm0, %v51_v58  ;;  %183 = vst.msk [vmem:[#allocation2 + $0xb0] sm:$0xff] %vm160_vm0, %v50_v59  ;;  %v80_v61 = vld [vmem:[%s6007_s0 + $0x1a0] sm:$0xff]  ;;  %v115_v62 = vld [vmem:[%s6007_s0 + $0x2b8] sm:$0xff] }
  0x1a   :  { %214 = vst.msk [vmem:[#allocation2 + $0x1a8] sm:$0xff] %vm160_vm0, %v81_v60  ;;  %213 = vst.msk [vmem:[#allocation2 + $0x1a0] sm:$0xff] %vm160_vm0, %v80_v61  ;;  %v114_v1 = vld [vmem:[%s6007_s0 + $0x2b0] sm:$0xff]  ;;  %v145_v2 = vld [vmem:[%s6007_s0 + $0x3a8] sm:$0xff] }
  0x1b   :  { %868 = vadd.xlane.f32.xlu1 %v867_v49  ;;  %248 = vst.msk [vmem:[#allocation2 + $0x2b8] sm:$0xff] %vm160_vm0, %v115_v62  ;;  %v144_v3 = vld [vmem:[%s6007_s0 + $0x3a0] sm:$0xff]  ;;  %v764_v4 = vld [vmem:[#allocation2 + $0x298] sm:$0xff]  ;;  %v763_v5 = vld [vmem:[#allocation2 + $0x290] sm:$0xff] }
  0x1c   :  { %865 = vadd.xlane.f32.xlu0 %v864_v50  ;;  %247 = vst.msk [vmem:[#allocation2 + $0x2b0] sm:$0xff] %vm160_vm0, %v114_v1  ;;  %278 = vst.msk [vmem:[#allocation2 + $0x3a8] sm:$0xff] %vm160_vm0, %v145_v2  ;;  %v1059_v6 = vsel %vm160_vm0, %v764_v4, 0.0  ;;  %v1056_v7 = vsel %vm160_vm0, %v763_v5, 0.0  ;;  %v684_v8 = vld [vmem:[#allocation2 + $0x18] sm:$0xff]  ;;  %v683_v9 = vld [vmem:[#allocation2 + $0x10] sm:$0xff] }
  0x1d   :  { %277 = vst.msk [vmem:[#allocation2 + $0x3a0] sm:$0xff] %vm160_vm0, %v144_v3  ;;  %v819_v10 = vsel %vm160_vm0, %v684_v8, 0.0  ;;  %v816_v11 = vsel %vm160_vm0, %v683_v9, 0.0  ;;  %v730_v12 = vld [vmem:[#allocation2 + $0x188] sm:$0xff]  ;;  %v729_v13 = vld [vmem:[#allocation2 + $0x180] sm:$0xff]  ;;  %v35_v14 = vld [vmem:[%s6007_s0 + $0x38] sm:$0xff] }
  0x1e   :  { %v34_v15 = vld [vmem:[%s6007_s0 + $0x30] sm:$0xff]  ;;  %v65_v16 = vld [vmem:[%s6007_s0 + $0x128] sm:$0xff]  ;;  %168 = vst.msk [vmem:[#allocation2 + $0x38] sm:$0xff] %vm160_vm0, %v35_v14  ;;  %v64_v17 = vld [vmem:[%s6007_s0 + $0x120] sm:$0xff]  ;;  %v957_v25 = vsel %vm160_vm0, %v730_v12, 0.0  ;;  %v954_v26 = vsel %vm160_vm0, %v729_v13, 0.0 }
  0x1f   :  { %1006 = vadd.xlane.f32.xlu1 %v1005_v63  ;;  %167 = vst.msk [vmem:[#allocation2 + $0x30] sm:$0xff] %vm160_vm0, %v34_v15  ;;  %198 = vst.msk [vmem:[#allocation2 + $0x128] sm:$0xff] %vm160_vm0, %v65_v16  ;;  %v99_v18 = vld [vmem:[%s6007_s0 + $0x238] sm:$0xff]  ;;  %v98_v19 = vld [vmem:[%s6007_s0 + $0x230] sm:$0xff] }
  0x20   :  { %1003 = vadd.xlane.f32.xlu0 %v1002_v0  ;;  %v748_v20 = vld [vmem:[#allocation2 + $0x218] sm:$0xff]  ;;  %v747_v21 = vld [vmem:[#allocation2 + $0x210] sm:$0xff]  ;;  %197 = vst.msk [vmem:[#allocation2 + $0x120] sm:$0xff] %vm160_vm0, %v64_v17  ;;  %232 = vst.msk [vmem:[#allocation2 + $0x238] sm:$0xff] %vm160_vm0, %v99_v18 }
  0x21   :  { %231 = vst.msk [vmem:[#allocation2 + $0x230] sm:$0xff] %vm160_vm0, %v98_v19  ;;  %v129_v22 = vld [vmem:[%s6007_s0 + $0x328] sm:$0xff]  ;;  %v128_v23 = vld [vmem:[%s6007_s0 + $0x320] sm:$0xff]  ;;  %v83_v28 = vld [vmem:[%s6007_s0 + $0x1b8] sm:$0xff]  ;;  %v1011_v39 = vsel %vm160_vm0, %v748_v20, 0.0  ;;  %v1008_v40 = vsel %vm160_vm0, %v747_v21, 0.0 }
  0x22   :  { %v53_v24 = vld [vmem:[%s6007_s0 + $0xc8] sm:$0xff]  ;;  %262 = vst.msk [vmem:[#allocation2 + $0x328] sm:$0xff] %vm160_vm0, %v129_v22  ;;  %261 = vst.msk [vmem:[#allocation2 + $0x320] sm:$0xff] %vm160_vm0, %v128_v23  ;;  %v52_v27 = vld [vmem:[%s6007_s0 + $0xc0] sm:$0xff] }
  0x23   :  { %1060 = vadd.xlane.f32.xlu1 %v1059_v6  ;;  %186 = vst.msk [vmem:[#allocation2 + $0xc8] sm:$0xff] %vm160_vm0, %v53_v24  ;;  %v82_v29 = vld [vmem:[%s6007_s0 + $0x1b0] sm:$0xff]  ;;  %185 = vst.msk [vmem:[#allocation2 + $0xc0] sm:$0xff] %vm160_vm0, %v52_v27  ;;  %v117_v30 = vld [vmem:[%s6007_s0 + $0x2c8] sm:$0xff] }
  0x24   :  { %1057 = vadd.xlane.f32.xlu0 %v1056_v7  ;;  %216 = vst.msk [vmem:[#allocation2 + $0x1b8] sm:$0xff] %vm160_vm0, %v83_v28  ;;  %215 = vst.msk [vmem:[#allocation2 + $0x1b0] sm:$0xff] %vm160_vm0, %v82_v29  ;;  %v116_v31 = vld [vmem:[%s6007_s0 + $0x2c0] sm:$0xff]  ;;  %v147_v32 = vld [vmem:[%s6007_s0 + $0x3b8] sm:$0xff] }
  0x25   :  { %250 = vst.msk [vmem:[#allocation2 + $0x2c8] sm:$0xff] %vm160_vm0, %v117_v30  ;;  %249 = vst.msk [vmem:[#allocation2 + $0x2c0] sm:$0xff] %vm160_vm0, %v116_v31  ;;  %v146_v33 = vld [vmem:[%s6007_s0 + $0x3b0] sm:$0xff]  ;;  %v37_v34 = vld [vmem:[%s6007_s0 + $0x48] sm:$0xff] }
  0x26   :  { %280 = vst.msk [vmem:[#allocation2 + $0x3b8] sm:$0xff] %vm160_vm0, %v147_v32  ;;  %v36_v35 = vld [vmem:[%s6007_s0 + $0x40] sm:$0xff]  ;;  %279 = vst.msk [vmem:[#allocation2 + $0x3b0] sm:$0xff] %vm160_vm0, %v146_v33  ;;  %v67_v36 = vld [vmem:[%s6007_s0 + $0x138] sm:$0xff] }
  0x27   :  { %820 = vadd.xlane.f32.xlu1 %v819_v10  ;;  %170 = vst.msk [vmem:[#allocation2 + $0x48] sm:$0xff] %vm160_vm0, %v37_v34  ;;  %169 = vst.msk [vmem:[#allocation2 + $0x40] sm:$0xff] %vm160_vm0, %v36_v35  ;;  %v66_v37 = vld [vmem:[%s6007_s0 + $0x130] sm:$0xff]  ;;  %v101_v38 = vld [vmem:[%s6007_s0 + $0x248] sm:$0xff] }
  0x28   :  { %817 = vadd.xlane.f32.xlu0 %v816_v11  ;;  %200 = vst.msk [vmem:[#allocation2 + $0x138] sm:$0xff] %vm160_vm0, %v67_v36  ;;  %199 = vst.msk [vmem:[#allocation2 + $0x130] sm:$0xff] %vm160_vm0, %v66_v37  ;;  %v100_v41 = vld [vmem:[%s6007_s0 + $0x240] sm:$0xff]  ;;  %v131_v42 = vld [vmem:[%s6007_s0 + $0x338] sm:$0xff] }
  0x29   :  { %234 = vst.msk [vmem:[#allocation2 + $0x248] sm:$0xff] %vm160_vm0, %v101_v38  ;;  %v130_v43 = vld [vmem:[%s6007_s0 + $0x330] sm:$0xff]  ;;  %v794_v44 = vld [vmem:[#allocation2 + $0x388] sm:$0xff]  ;;  %v793_v45 = vld [vmem:[#allocation2 + $0x380] sm:$0xff] }
  0x2a   :  { %233 = vst.msk [vmem:[#allocation2 + $0x240] sm:$0xff] %vm160_vm0, %v100_v41  ;;  %264 = vst.msk [vmem:[#allocation2 + $0x338] sm:$0xff] %vm160_vm0, %v131_v42  ;;  %v1149_v46 = vsel %vm160_vm0, %v794_v44, 0.0  ;;  %v1146_v47 = vsel %vm160_vm0, %v793_v45, 0.0  ;;  %v702_v48 = vld [vmem:[#allocation2 + $0xa8] sm:$0xff]  ;;  %v701_v49 = vld [vmem:[#allocation2 + $0xa0] sm:$0xff] }
  0x2b   :  { %958 = vadd.xlane.f32.xlu1 %v957_v25  ;;  %263 = vst.msk [vmem:[#allocation2 + $0x330] sm:$0xff] %vm160_vm0, %v130_v43  ;;  %v873_v50 = vsel %vm160_vm0, %v702_v48, 0.0  ;;  %v870_v51 = vsel %vm160_vm0, %v701_v49, 0.0  ;;  %v714_v52 = vld [vmem:[#allocation2 + $0x108] sm:$0xff]  ;;  %v713_v53 = vld [vmem:[#allocation2 + $0x100] sm:$0xff]  ;;  %v55_v54 = vld [vmem:[%s6007_s0 + $0xd8] sm:$0xff] }
  0x2c   :  { %955 = vadd.xlane.f32.xlu0 %v954_v26  ;;  %v54_v55 = vld [vmem:[%s6007_s0 + $0xd0] sm:$0xff]  ;;  %v85_v56 = vld [vmem:[%s6007_s0 + $0x1c8] sm:$0xff]  ;;  %188 = vst.msk [vmem:[#allocation2 + $0xd8] sm:$0xff] %vm160_vm0, %v55_v54  ;;  %v84_v57 = vld [vmem:[%s6007_s0 + $0x1c0] sm:$0xff]  ;;  %v909_v1 = vsel %vm160_vm0, %v714_v52, 0.0  ;;  %v906_v2 = vsel %vm160_vm0, %v713_v53, 0.0 }
  0x2d   :  { %187 = vst.msk [vmem:[#allocation2 + $0xd0] sm:$0xff] %vm160_vm0, %v54_v55  ;;  %218 = vst.msk [vmem:[#allocation2 + $0x1c8] sm:$0xff] %vm160_vm0, %v85_v56  ;;  %v119_v58 = vld [vmem:[%s6007_s0 + $0x2d8] sm:$0xff]  ;;  %v118_v59 = vld [vmem:[%s6007_s0 + $0x2d0] sm:$0xff] }
  0x2e   :  { %v732_v60 = vld [vmem:[#allocation2 + $0x198] sm:$0xff]  ;;  %v731_v61 = vld [vmem:[#allocation2 + $0x190] sm:$0xff]  ;;  %217 = vst.msk [vmem:[#allocation2 + $0x1c0] sm:$0xff] %vm160_vm0, %v84_v57  ;;  %252 = vst.msk [vmem:[#allocation2 + $0x2d8] sm:$0xff] %vm160_vm0, %v119_v58 }
  0x2f   :  { %1012 = vadd.xlane.f32.xlu1 %v1011_v39  ;;  %251 = vst.msk [vmem:[#allocation2 + $0x2d0] sm:$0xff] %vm160_vm0, %v118_v59  ;;  %v149_v62 = vld [vmem:[%s6007_s0 + $0x3c8] sm:$0xff]  ;;  %v148_v63 = vld [vmem:[%s6007_s0 + $0x3c0] sm:$0xff]  ;;  %v39_v0 = vld [vmem:[%s6007_s0 + $0x58] sm:$0xff]  ;;  %v963_v14 = vsel %vm160_vm0, %v732_v60, 0.0  ;;  %v960_v15 = vsel %vm160_vm0, %v731_v61, 0.0 }
  0x30   :  { %1009 = vadd.xlane.f32.xlu0 %v1008_v40  ;;  %282 = vst.msk [vmem:[#allocation2 + $0x3c8] sm:$0xff] %vm160_vm0, %v149_v62  ;;  %281 = vst.msk [vmem:[#allocation2 + $0x3c0] sm:$0xff] %vm160_vm0, %v148_v63  ;;  %v38_v3 = vld [vmem:[%s6007_s0 + $0x50] sm:$0xff]  ;;  %v69_v4 = vld [vmem:[%s6007_s0 + $0x148] sm:$0xff] }
  0x31   :  { %172 = vst.msk [vmem:[#allocation2 + $0x58] sm:$0xff] %vm160_vm0, %v39_v0  ;;  %v68_v5 = vld [vmem:[%s6007_s0 + $0x140] sm:$0xff]  ;;  %171 = vst.msk [vmem:[#allocation2 + $0x50] sm:$0xff] %vm160_vm0, %v38_v3  ;;  %v103_v6 = vld [vmem:[%s6007_s0 + $0x258] sm:$0xff] }
  0x32   :  { %202 = vst.msk [vmem:[#allocation2 + $0x148] sm:$0xff] %vm160_vm0, %v69_v4  ;;  %201 = vst.msk [vmem:[#allocation2 + $0x140] sm:$0xff] %vm160_vm0, %v68_v5  ;;  %v102_v7 = vld [vmem:[%s6007_s0 + $0x250] sm:$0xff]  ;;  %v133_v8 = vld [vmem:[%s6007_s0 + $0x348] sm:$0xff] }
  0x33   :  { %1150 = vadd.xlane.f32.xlu1 %v1149_v46  ;;  %236 = vst.msk [vmem:[#allocation2 + $0x258] sm:$0xff] %vm160_vm0, %v103_v6  ;;  %235 = vst.msk [vmem:[#allocation2 + $0x250] sm:$0xff] %vm160_vm0, %v102_v7  ;;  %v132_v9 = vld [vmem:[%s6007_s0 + $0x340] sm:$0xff]  ;;  %v57_v10 = vld [vmem:[%s6007_s0 + $0xe8] sm:$0xff] }
  0x34   :  { %1147 = vadd.xlane.f32.xlu0 %v1146_v47  ;;  %266 = vst.msk [vmem:[#allocation2 + $0x348] sm:$0xff] %vm160_vm0, %v133_v8  ;;  %v56_v11 = vld [vmem:[%s6007_s0 + $0xe0] sm:$0xff]  ;;  %265 = vst.msk [vmem:[#allocation2 + $0x340] sm:$0xff] %vm160_vm0, %v132_v9  ;;  %v87_v12 = vld [vmem:[%s6007_s0 + $0x1d8] sm:$0xff] }
  0x35   :  { %190 = vst.msk [vmem:[#allocation2 + $0xe8] sm:$0xff] %vm160_vm0, %v57_v10  ;;  %189 = vst.msk [vmem:[#allocation2 + $0xe0] sm:$0xff] %vm160_vm0, %v56_v11  ;;  %v86_v13 = vld [vmem:[%s6007_s0 + $0x1d0] sm:$0xff]  ;;  %v766_v16 = vld [vmem:[#allocation2 + $0x2a8] sm:$0xff] }
  0x36   :  { %220 = vst.msk [vmem:[#allocation2 + $0x1d8] sm:$0xff] %vm160_vm0, %v87_v12  ;;  %219 = vst.msk [vmem:[#allocation2 + $0x1d0] sm:$0xff] %vm160_vm0, %v86_v13  ;;  %v765_v17 = vld [vmem:[#allocation2 + $0x2a0] sm:$0xff]  ;;  %v1065_v18 = vsel %vm160_vm0, %v766_v16, 0.0  ;;  %v778_v20 = vld [vmem:[#allocation2 + $0x308] sm:$0xff] }
  0x37   :  { %874 = vadd.xlane.f32.xlu1 %v873_v50  ;;  %v1062_v19 = vsel %vm160_vm0, %v765_v17, 0.0  ;;  %v777_v21 = vld [vmem:[#allocation2 + $0x300] sm:$0xff]  ;;  %v796_v22 = vld [vmem:[#allocation2 + $0x398] sm:$0xff]  ;;  %v121_v23 = vld [vmem:[%s6007_s0 + $0x2e8] sm:$0xff]  ;;  %v1101_v24 = vsel %vm160_vm0, %v778_v20, 0.0 }
  0x38   :  { %871 = vadd.xlane.f32.xlu0 %v870_v51  ;;  %v1098_v25 = vsel %vm160_vm0, %v777_v21, 0.0  ;;  %v795_v26 = vld [vmem:[#allocation2 + $0x390] sm:$0xff]  ;;  %254 = vst.msk [vmem:[#allocation2 + $0x2e8] sm:$0xff] %vm160_vm0, %v121_v23  ;;  %v120_v27 = vld [vmem:[%s6007_s0 + $0x2e0] sm:$0xff]  ;;  %v151_v28 = vld [vmem:[%s6007_s0 + $0x3d8] sm:$0xff]  ;;  %v1155_v34 = vsel %vm160_vm0, %v796_v22, 0.0 }
  0x39   :  { %253 = vst.msk [vmem:[#allocation2 + $0x2e0] sm:$0xff] %vm160_vm0, %v120_v27  ;;  %284 = vst.msk [vmem:[#allocation2 + $0x3d8] sm:$0xff] %vm160_vm0, %v151_v28  ;;  %v150_v29 = vld [vmem:[%s6007_s0 + $0x3d0] sm:$0xff]  ;;  %v41_v30 = vld [vmem:[%s6007_s0 + $0x68] sm:$0xff]  ;;  %v1152_v35 = vsel %vm160_vm0, %v795_v26, 0.0 }
  0x3a   :  { %283 = vst.msk [vmem:[#allocation2 + $0x3d0] sm:$0xff] %vm160_vm0, %v150_v29  ;;  %v40_v31 = vld [vmem:[%s6007_s0 + $0x60] sm:$0xff]  ;;  %v686_v32 = vld [vmem:[#allocation2 + $0x28] sm:$0xff]  ;;  %174 = vst.msk [vmem:[#allocation2 + $0x68] sm:$0xff] %vm160_vm0, %v41_v30 }
  0x3b   :  { %910 = vadd.xlane.f32.xlu1 %v909_v1  ;;  %v685_v33 = vld [vmem:[#allocation2 + $0x20] sm:$0xff]  ;;  %173 = vst.msk [vmem:[#allocation2 + $0x60] sm:$0xff] %vm160_vm0, %v40_v31  ;;  %v71_v36 = vld [vmem:[%s6007_s0 + $0x158] sm:$0xff]  ;;  %v70_v37 = vld [vmem:[%s6007_s0 + $0x150] sm:$0xff]  ;;  %v825_v38 = vsel %vm160_vm0, %v686_v32, 0.0 }
  0x3c   :  { %907 = vadd.xlane.f32.xlu0 %v906_v2  ;;  %204 = vst.msk [vmem:[#allocation2 + $0x158] sm:$0xff] %vm160_vm0, %v71_v36  ;;  %203 = vst.msk [vmem:[#allocation2 + $0x150] sm:$0xff] %vm160_vm0, %v70_v37  ;;  %v822_v39 = vsel %vm160_vm0, %v685_v33, 0.0  ;;  %v716_v40 = vld [vmem:[#allocation2 + $0x118] sm:$0xff]  ;;  %v715_v41 = vld [vmem:[#allocation2 + $0x110] sm:$0xff] }
  0x3d   :  { %v105_v42 = vld [vmem:[%s6007_s0 + $0x268] sm:$0xff]  ;;  %v749_v44 = vld [vmem:[#allocation2 + $0x220] sm:$0xff]  ;;  %v915_v46 = vsel %vm160_vm0, %v716_v40, 0.0  ;;  %v912_v47 = vsel %vm160_vm0, %v715_v41, 0.0  ;;  %v135_v48 = vld [vmem:[%s6007_s0 + $0x358] sm:$0xff] }
  0x3e   :  { %v750_v43 = vld [vmem:[#allocation2 + $0x228] sm:$0xff]  ;;  %238 = vst.msk [vmem:[#allocation2 + $0x268] sm:$0xff] %vm160_vm0, %v105_v42  ;;  %v104_v45 = vld [vmem:[%s6007_s0 + $0x260] sm:$0xff]  ;;  %v780_v49 = vld [vmem:[#allocation2 + $0x318] sm:$0xff]  ;;  %v1014_v53 = vsel %vm160_vm0, %v749_v44, 0.0 }
  0x3f   :  { %964 = vadd.xlane.f32.xlu1 %v963_v14  ;;  %237 = vst.msk [vmem:[#allocation2 + $0x260] sm:$0xff] %vm160_vm0, %v104_v45  ;;  %v779_v50 = vld [vmem:[#allocation2 + $0x310] sm:$0xff]  ;;  %268 = vst.msk [vmem:[#allocation2 + $0x358] sm:$0xff] %vm160_vm0, %v135_v48  ;;  %v1017_v52 = vsel %vm160_vm0, %v750_v43, 0.0  ;;  %v59_v54 = vld [vmem:[%s6007_s0 + $0xf8] sm:$0xff]  ;;  %v1107_v58 = vsel %vm160_vm0, %v780_v49, 0.0 }
  0x40   :  { %961 = vadd.xlane.f32.xlu0 %v960_v15  ;;  %v134_v51 = vld [vmem:[%s6007_s0 + $0x350] sm:$0xff]  ;;  %v704_v56 = vld [vmem:[#allocation2 + $0xb8] sm:$0xff]  ;;  %192 = vst.msk [vmem:[#allocation2 + $0xf8] sm:$0xff] %vm160_vm0, %v59_v54  ;;  %v1104_v59 = vsel %vm160_vm0, %v779_v50, 0.0  ;;  %v89_v60 = vld [vmem:[%s6007_s0 + $0x1e8] sm:$0xff] }
  0x41   :  { %267 = vst.msk [vmem:[#allocation2 + $0x350] sm:$0xff] %vm160_vm0, %v134_v51  ;;  %v58_v55 = vld [vmem:[%s6007_s0 + $0xf0] sm:$0xff]  ;;  %v88_v61 = vld [vmem:[%s6007_s0 + $0x1e0] sm:$0xff]  ;;  %v734_v62 = vld [vmem:[#allocation2 + $0x1a8] sm:$0xff]  ;;  %v879_v0 = vsel %vm160_vm0, %v704_v56, 0.0 }
  0x42   :  { %v703_v57 = vld [vmem:[#allocation2 + $0xb0] sm:$0xff]  ;;  %191 = vst.msk [vmem:[#allocation2 + $0xf0] sm:$0xff] %vm160_vm0, %v58_v55  ;;  %v733_v63 = vld [vmem:[#allocation2 + $0x1a0] sm:$0xff]  ;;  %222 = vst.msk [vmem:[#allocation2 + $0x1e8] sm:$0xff] %vm160_vm0, %v89_v60  ;;  %v969_v6 = vsel %vm160_vm0, %v734_v62, 0.0 }
  0x43   :  { %1066 = vadd.xlane.f32.xlu1 %v1065_v18  ;;  %221 = vst.msk [vmem:[#allocation2 + $0x1e0] sm:$0xff] %vm160_vm0, %v88_v61  ;;  %v876_v1 = vsel %vm160_vm0, %v703_v57, 0.0  ;;  %v123_v2 = vld [vmem:[%s6007_s0 + $0x2f8] sm:$0xff]  ;;  %v767_v4 = vld [vmem:[#allocation2 + $0x2b0] sm:$0xff]  ;;  %v966_v7 = vsel %vm160_vm0, %v733_v63, 0.0  ;;  %v153_v8 = vld [vmem:[%s6007_s0 + $0x3e8] sm:$0xff] }
  0x44   :  { %1063 = vadd.xlane.f32.xlu0 %v1062_v19  ;;  %v768_v3 = vld [vmem:[#allocation2 + $0x2b8] sm:$0xff]  ;;  %256 = vst.msk [vmem:[#allocation2 + $0x2f8] sm:$0xff] %vm160_vm0, %v123_v2  ;;  %v122_v5 = vld [vmem:[%s6007_s0 + $0x2f0] sm:$0xff]  ;;  %v798_v9 = vld [vmem:[#allocation2 + $0x3a8] sm:$0xff]  ;;  %v1068_v13 = vsel %vm160_vm0, %v767_v4, 0.0 }
  0x45   :  { %255 = vst.msk [vmem:[#allocation2 + $0x2f0] sm:$0xff] %vm160_vm0, %v122_v5  ;;  %v797_v10 = vld [vmem:[#allocation2 + $0x3a0] sm:$0xff]  ;;  %286 = vst.msk [vmem:[#allocation2 + $0x3e8] sm:$0xff] %vm160_vm0, %v153_v8  ;;  %v1071_v12 = vsel %vm160_vm0, %v768_v3, 0.0  ;;  %v43_v14 = vld [vmem:[%s6007_s0 + $0x78] sm:$0xff]  ;;  %v1161_v18 = vsel %vm160_vm0, %v798_v9, 0.0 }
  0x46   :  { %v152_v11 = vld [vmem:[%s6007_s0 + $0x3e0] sm:$0xff]  ;;  %v42_v15 = vld [vmem:[%s6007_s0 + $0x70] sm:$0xff]  ;;  %v688_v16 = vld [vmem:[#allocation2 + $0x38] sm:$0xff]  ;;  %176 = vst.msk [vmem:[#allocation2 + $0x78] sm:$0xff] %vm160_vm0, %v43_v14  ;;  %v1158_v19 = vsel %vm160_vm0, %v797_v10, 0.0 }
  0x47   :  { %1102 = vadd.xlane.f32.xlu1 %v1101_v24  ;;  %285 = vst.msk [vmem:[#allocation2 + $0x3e0] sm:$0xff] %vm160_vm0, %v152_v11  ;;  %v687_v17 = vld [vmem:[#allocation2 + $0x30] sm:$0xff]  ;;  %175 = vst.msk [vmem:[#allocation2 + $0x70] sm:$0xff] %vm160_vm0, %v42_v15  ;;  %v73_v20 = vld [vmem:[%s6007_s0 + $0x168] sm:$0xff]  ;;  %v831_v24 = vsel %vm160_vm0, %v688_v16, 0.0 }
  0x48   :  { %1099 = vadd.xlane.f32.xlu0 %v1098_v25  ;;  %v72_v21 = vld [vmem:[%s6007_s0 + $0x160] sm:$0xff]  ;;  %v718_v22 = vld [vmem:[#allocation2 + $0x128] sm:$0xff]  ;;  %206 = vst.msk [vmem:[#allocation2 + $0x168] sm:$0xff] %vm160_vm0, %v73_v20  ;;  %v828_v25 = vsel %vm160_vm0, %v687_v17, 0.0  ;;  %v107_v26 = vld [vmem:[%s6007_s0 + $0x278] sm:$0xff] }
  0x49   :  { %v717_v23 = vld [vmem:[#allocation2 + $0x120] sm:$0xff]  ;;  %205 = vst.msk [vmem:[#allocation2 + $0x160] sm:$0xff] %vm160_vm0, %v72_v21  ;;  %v752_v27 = vld [vmem:[#allocation2 + $0x238] sm:$0xff]  ;;  %v751_v28 = vld [vmem:[#allocation2 + $0x230] sm:$0xff]  ;;  %v921_v30 = vsel %vm160_vm0, %v718_v22, 0.0 }
  0x4a   :  { %240 = vst.msk [vmem:[#allocation2 + $0x278] sm:$0xff] %vm160_vm0, %v107_v26  ;;  %v106_v29 = vld [vmem:[%s6007_s0 + $0x270] sm:$0xff]  ;;  %v918_v31 = vsel %vm160_vm0, %v717_v23, 0.0  ;;  %v137_v32 = vld [vmem:[%s6007_s0 + $0x368] sm:$0xff]  ;;  %v1023_v36 = vsel %vm160_vm0, %v752_v27, 0.0  ;;  %v1020_v37 = vsel %vm160_vm0, %v751_v28, 0.0 }
  0x4b   :  { %1156 = vadd.xlane.f32.xlu1 %v1155_v34  ;;  %239 = vst.msk [vmem:[#allocation2 + $0x270] sm:$0xff] %vm160_vm0, %v106_v29  ;;  %v782_v33 = vld [vmem:[#allocation2 + $0x328] sm:$0xff]  ;;  %v781_v34 = vld [vmem:[#allocation2 + $0x320] sm:$0xff]  ;;  %270 = vst.msk [vmem:[#allocation2 + $0x368] sm:$0xff] %vm160_vm0, %v137_v32 }
  0x4c   :  { %1153 = vadd.xlane.f32.xlu0 %v1152_v35  ;;  %v136_v35 = vld [vmem:[%s6007_s0 + $0x360] sm:$0xff]  ;;  %v706_v40 = vld [vmem:[#allocation2 + $0xc8] sm:$0xff]  ;;  %v1113_v42 = vsel %vm160_vm0, %v782_v33, 0.0  ;;  %v1110_v43 = vsel %vm160_vm0, %v781_v34, 0.0  ;;  %v155_v44 = vld [vmem:[%s6007_s0 + $0x3f8] sm:$0xff] }
  0x4d   :  { %269 = vst.msk [vmem:[#allocation2 + $0x360] sm:$0xff] %vm160_vm0, %v136_v35  ;;  %v705_v41 = vld [vmem:[#allocation2 + $0xc0] sm:$0xff]  ;;  %v154_v45 = vld [vmem:[%s6007_s0 + $0x3f0] sm:$0xff]  ;;  %288 = vst.msk [vmem:[#allocation2 + $0x3f8] sm:$0xff] %vm160_vm0, %v155_v44  ;;  %v885_v48 = vsel %vm160_vm0, %v706_v40, 0.0 }
  0x4e   :  { %287 = vst.msk [vmem:[#allocation2 + $0x3f0] sm:$0xff] %vm160_vm0, %v154_v45  ;;  %v882_v49 = vsel %vm160_vm0, %v705_v41, 0.0  ;;  %v75_v50 = vld [vmem:[%s6007_s0 + $0x178] sm:$0xff]  ;;  %v770_v51 = vld [vmem:[#allocation2 + $0x2c8] sm:$0xff]  ;;  %v74_v54 = vld [vmem:[%s6007_s0 + $0x170] sm:$0xff] }
  0x4f   :  { %826 = vadd.xlane.f32.xlu1 %v825_v38  ;;  %v91_v38 = vld [vmem:[%s6007_s0 + $0x1f8] sm:$0xff]  ;;  %208 = vst.msk [vmem:[#allocation2 + $0x178] sm:$0xff] %vm160_vm0, %v75_v50  ;;  %207 = vst.msk [vmem:[#allocation2 + $0x170] sm:$0xff] %vm160_vm0, %v74_v54  ;;  %v690_v60 = vld [vmem:[#allocation2 + $0x48] sm:$0xff]  ;;  %v1077_v63 = vsel %vm160_vm0, %v770_v51, 0.0 }
  0x50   :  { %823 = vadd.xlane.f32.xlu0 %v822_v39  ;;  %v90_v39 = vld [vmem:[%s6007_s0 + $0x1f0] sm:$0xff]  ;;  %224 = vst.msk [vmem:[#allocation2 + $0x1f8] sm:$0xff] %vm160_vm0, %v91_v38  ;;  %v139_v57 = vld [vmem:[%s6007_s0 + $0x378] sm:$0xff]  ;;  %v754_v4 = vld [vmem:[#allocation2 + $0x248] sm:$0xff]  ;;  %v837_v14 = vsel %vm160_vm0, %v690_v60, 0.0 }
  0x51   :  { %223 = vst.msk [vmem:[#allocation2 + $0x1f0] sm:$0xff] %vm160_vm0, %v90_v39  ;;  %272 = vst.msk [vmem:[#allocation2 + $0x378] sm:$0xff] %vm160_vm0, %v139_v57  ;;  %v138_v62 = vld [vmem:[%s6007_s0 + $0x370] sm:$0xff]  ;;  %v720_v2 = vld [vmem:[#allocation2 + $0x138] sm:$0xff] }
  0x52   :  { %v719_v3 = vld [vmem:[#allocation2 + $0x130] sm:$0xff]  ;;  %271 = vst.msk [vmem:[#allocation2 + $0x370] sm:$0xff] %vm160_vm0, %v138_v62  ;;  %v753_v5 = vld [vmem:[#allocation2 + $0x240] sm:$0xff]  ;;  %v708_v10 = vld [vmem:[#allocation2 + $0xd8] sm:$0xff]  ;;  %v927_v16 = vsel %vm160_vm0, %v720_v2, 0.0 }
  0x53   :  { %916 = vadd.xlane.f32.xlu1 %v915_v46  ;;  %v736_v46 = vld [vmem:[#allocation2 + $0x1b8] sm:$0xff]  ;;  %v707_v11 = vld [vmem:[#allocation2 + $0xd0] sm:$0xff]  ;;  %v924_v17 = vsel %vm160_vm0, %v719_v3, 0.0  ;;  %v1026_v20 = vsel %vm160_vm0, %v753_v5, 0.0  ;;  %v737_v21 = vld [vmem:[#allocation2 + $0x1c0] sm:$0xff] }
  0x54   :  { %913 = vadd.xlane.f32.xlu0 %v912_v47  ;;  %v735_v47 = vld [vmem:[#allocation2 + $0x1b0] sm:$0xff]  ;;  %v975_v55 = vsel %vm160_vm0, %v736_v46, 0.0  ;;  %v978_v27 = vsel %vm160_vm0, %v737_v21, 0.0  ;;  %v772_v38 = vld [vmem:[#allocation2 + $0x2d8] sm:$0xff] }
  0x55   :  { %v972_v56 = vsel %vm160_vm0, %v735_v47, 0.0 }
  0x57   :  { %1018 = vadd.xlane.f32.xlu1 %v1017_v52  ;;  %v769_v52 = vld [vmem:[#allocation2 + $0x2c0] sm:$0xff] }
  0x58   :  { %1015 = vadd.xlane.f32.xlu0 %v1014_v53  ;;  %v1888_v53 = vlaneseq }
  0x5a   :  { %v4865_v61 = vand.u32 127, %v1888_v53  ;;  %v4874_v8 = vshrl.u32 %v1888_v53, 7 }
  0x5b   :  { %1108 = vadd.xlane.f32.xlu1 %v1107_v58  ;;  %v800_v58 = vld [vmem:[#allocation2 + $0x3b8] sm:$0xff] }
  0x5c   :  { %1105 = vadd.xlane.f32.xlu0 %v1104_v59  ;;  %v799_v59 = vld [vmem:[#allocation2 + $0x3b0] sm:$0xff]  ;;  %v1894_v9 = vadd.s32 4294967288, %v4865_v61 }
  0x5f   :  { %880 = vadd.xlane.f32.xlu1 %v879_v0  ;;  %v1074_v0 = vsel %vm160_vm0, %v769_v52, 0.0 }
  0x60   :  { %877 = vadd.xlane.f32.xlu0 %v876_v1  ;;  %v689_v1 = vld [vmem:[#allocation2 + $0x40] sm:$0xff] }
  0x61   :  { %v834_v15 = vsel %vm160_vm0, %v689_v1, 0.0 }
  0x63   :  { %970 = vadd.xlane.f32.xlu1 %v969_v6  ;;  %v784_v6 = vld [vmem:[#allocation2 + $0x338] sm:$0xff] }
  0x64   :  { %967 = vadd.xlane.f32.xlu0 %v966_v7  ;;  %v783_v7 = vld [vmem:[#allocation2 + $0x330] sm:$0xff]  ;;  %v1119_v22 = vsel %vm160_vm0, %v784_v6, 0.0 }
  0x65   :  { %v1116_v23 = vsel %vm160_vm0, %v783_v7, 0.0 }
  0x67   :  { %1072 = vadd.xlane.f32.xlu1 %v1071_v12  ;;  %v1167_v12 = vsel %vm160_vm0, %v800_v58, 0.0 }
  0x68   :  { %1069 = vadd.xlane.f32.xlu0 %v1068_v13  ;;  %v1164_v13 = vsel %vm160_vm0, %v799_v59, 0.0 }
  0x6b   :  { %1162 = vadd.xlane.f32.xlu1 %v1161_v18  ;;  %v1029_v18 = vsel %vm160_vm0, %v754_v4, 0.0 }
  0x6c   :  { %1159 = vadd.xlane.f32.xlu0 %v1158_v19  ;;  %v738_v19 = vld [vmem:[#allocation2 + $0x1c8] sm:$0xff] }
  0x6d   :  { %v981_v26 = vsel %vm160_vm0, %v738_v19, 0.0 }
  0x6f   :  { %832 = vadd.xlane.f32.xlu1 %v831_v24  ;;  %v891_v24 = vsel %vm160_vm0, %v708_v10, 0.0 }
  0x70   :  { %829 = vadd.xlane.f32.xlu0 %v828_v25  ;;  %v888_v25 = vsel %vm160_vm0, %v707_v11, 0.0 }
  0x73   :  { %922 = vadd.xlane.f32.xlu1 %v921_v30 }
  0x74   :  { %919 = vadd.xlane.f32.xlu0 %v918_v31 }
  0x77   :  { %1024 = vadd.xlane.f32.xlu1 %v1023_v36 }
  0x78   :  { %1021 = vadd.xlane.f32.xlu0 %v1020_v37 }
  0x7b   :  { %1114 = vadd.xlane.f32.xlu1 %v1113_v42 }
  0x7c   :  { %1111 = vadd.xlane.f32.xlu0 %v1110_v43 }
  0x7f   :  { %886 = vadd.xlane.f32.xlu1 %v885_v48 }
  0x80   :  { %883 = vadd.xlane.f32.xlu0 %v882_v49 }
  0x83   :  { %976 = vadd.xlane.f32.xlu1 %v975_v55 }
  0x84   :  { %973 = vadd.xlane.f32.xlu0 %v972_v56 }
  0x87   :  { %1078 = vadd.xlane.f32.xlu1 %v1077_v63 }
  0x88   :  { %1075 = vadd.xlane.f32.xlu0 %v1074_v0 }
  0x8b   :  { %1168 = vadd.xlane.f32.xlu1 %v1167_v12 }
  0x8c   :  { %1165 = vadd.xlane.f32.xlu0 %v1164_v13 }
  0x8f   :  { %838 = vadd.xlane.f32.xlu1 %v837_v14 }
  0x90   :  { %835 = vadd.xlane.f32.xlu0 %v834_v15 }
  0x93   :  { %928 = vadd.xlane.f32.xlu1 %v927_v16 }
  0x94   :  { %925 = vadd.xlane.f32.xlu0 %v924_v17 }
  0x97   :  { %1030 = vadd.xlane.f32.xlu1 %v1029_v18 }
  0x98   :  { %1027 = vadd.xlane.f32.xlu0 %v1026_v20  ;;  %v1052_v28 = vpop.xlane.xlu1 %1051 }
  0x99   :  { %v860_v29 = vpop.xlane.xlu0 %859  ;;  %v1274_v30 = vmul.f32 0.015625, %v1052_v28 }
  0x9a   :  { %v1210_v31 = vmul.f32 0.015625, %v860_v29 }
  0x9b   :  { %1120 = vadd.xlane.f32.xlu1 %v1119_v22 }
  0x9c   :  { %1117 = vadd.xlane.f32.xlu0 %v1116_v23  ;;  %v1055_v32 = vpop.xlane.xlu1 %1054 }
  0x9d   :  { %v863_v33 = vpop.xlane.xlu0 %862  ;;  %v1275_v34 = vmul.f32 0.015625, %v1055_v32 }
  0x9e   :  { %v1211_v35 = vmul.f32 0.015625, %v863_v33 }
  0x9f   :  { %v4891_v36 = vpack.c.bf16 %v1275_v34, %v1274_v30  ;;  %892 = vadd.xlane.f32.xlu1 %v891_v24 }
  0xa0   :  { %v1330_v37 = vpack.c.bf16 %v1211_v35, %v1210_v31  ;;  %889 = vadd.xlane.f32.xlu0 %v888_v25  ;;  %v815_v39 = vpop.xlane.xlu1 %814 }
  0xa1   :  { %v812_v40 = vpop.xlane.xlu0 %811 }
  0xa2   :  { %12 = vsyncpa [#allocation4], 0  ;;  %v1195_v41 = vmul.f32 0.015625, %v815_v39  ;;  %v1194_v42 = vmul.f32 0.015625, %v812_v40  ;;  %v771_v43 = vld [vmem:[#allocation2 + $0x2d0] sm:$0xff]  ;;  %v4895_v44 = vsub.s32 %v4865_v61, %v4874_v8  ;;  %v4898_v45 = vsub.s32 %v1894_v9, %v4874_v8  ;;  %v802_v57 = vld [vmem:[#allocation2 + $0x3c8] sm:$0xff] }
  0xa3   :  { %982 = vadd.xlane.f32.xlu1 %v981_v26  ;;  %v1901_v46 = vadd.s32 4294967280, %v4865_v61  ;;  %v1908_v47 = vadd.s32 4294967272, %v4865_v61  ;;  %v1776_v48 = vunpack.c.l.b16 %v1330_v37  ;;  %v1777_v49 = vunpack.c.h.b16 %v1330_v37  ;;  %v801_v58 = vld [vmem:[#allocation2 + $0x3c0] sm:$0xff]  ;;  %v692_v10 = vld [vmem:[#allocation2 + $0x58] sm:$0xff]  ;;  %v691_v12 = vld [vmem:[#allocation2 + $0x50] sm:$0xff]  ;;  %s4257_s20 = smov [#allocation3]  }
  0xa4   :  { %v4902_v50 = vpack.c.bf16 %v1195_v41, %v1194_v42  ;;  %979 = vadd.xlane.f32.xlu0 %v978_v27  ;;  %v869_v51 = vpop.xlane.xlu1 %868  ;;  %v1083_v53 = vsel %vm160_vm0, %v772_v38, 0.0  ;;  %v1080_v56 = vsel %vm160_vm0, %v771_v43, 0.0  ;;  %vm1899_vm1 = vcmask 130112   ;;  %v722_v24 = vld [vmem:[#allocation2 + $0x148] sm:$0xff]  ;;  %v721_v27 = vld [vmem:[#allocation2 + $0x140] sm:$0xff]  ;;  %v755_v37 = vld [vmem:[#allocation2 + $0x250] sm:$0xff] }
  0xa5   :  { %v866_v52 = vpop.xlane.xlu0 %865  ;;  %v1213_v54 = vmul.f32 0.015625, %v869_v51  ;;  %v4907_v59 = vsub.s32 %v1901_v46, %v4874_v8  ;;  %v4910_v60 = vsub.s32 %v1908_v47, %v4874_v8  ;;  %v2002_v63 = vrot.slane %v1776_v48, %v4895_v44  ;;  %s3753_s21 = sshll.u32 %s4257_s20, 4  ;;  %s3754_s21 = int_to_ptr.vmem [resolvable:$true] %s3753_s21 }
  0xa6   :  { %v1212_v55 = vmul.f32 0.015625, %v866_v52  ;;  %v2006_v0 = vrot.slane %v1777_v49, %v4898_v45  ;;  %v1173_v3 = vsel %vm160_vm0, %v802_v57, 0.0  ;;  %v1170_v4 = vsel %vm160_vm0, %v801_v58, 0.0  ;;  %s4234_s22 = scalar_lea.vmem %s3754_s21, 32  ;;  %p4239_p1 = scmp.lt.s32.totalorder %s3754_s21, %s3754_s21 }
  0xa7   :  { %1084 = vadd.xlane.f32.xlu1 %v1083_v53  ;;  %v1840_v11 = vunpack.c.l.b16 %v4891_v36  ;;  %vm1906_vm2 = vcmask 195712   ;;  %vm1913_vm3 = vcmask 261312   ;;  %v1841_v13 = vunpack.c.h.b16 %v4891_v36  ;;  %v756_v36 = vld [vmem:[#allocation2 + $0x258] sm:$0xff]  ;;  %p4235_p0 = scmp.ne.s32.totalorder %s3754_s21, %s4234_s22  ;;  %p4240_p2 = scmp.lt.s32.totalorder %s4234_s22, %s4234_s22 }
  0xa8   :  { %v1331_v62 = vpack.c.bf16 %v1213_v54, %v1212_v55  ;;  %1081 = vadd.xlane.f32.xlu0 %v1080_v56  ;;  %v1007_v1 = vpop.xlane.xlu1 %1006  ;;  %v2007_v17 = vsel %vm1899_vm1, %v2006_v0, %v2002_v63  ;;  %v843_v20 = vsel %vm160_vm0, %v692_v10, 0.0  ;;  %v840_v23 = vsel %vm160_vm0, %v691_v12, 0.0  ;;  %v785_v63 = vld [vmem:[#allocation2 + $0x340] sm:$0xff] }
  0xa9   :  { %v1004_v2 = vpop.xlane.xlu0 %1003  ;;  %v1259_v7 = vmul.f32 0.015625, %v1007_v1  ;;  %v2318_v28 = vrot.slane %v1840_v11, %v4895_v44  ;;  %v2322_v29 = vrot.slane %v1841_v13, %v4898_v45  ;;  %v1760_v30 = vunpack.c.l.b16 %v4902_v50  ;;  %p4241_p3 = por %p4240_p2, %p4239_p1 }
  0xaa   :  { %v1778_v5 = vunpack.c.l.b16 %v1331_v62  ;;  %v1779_v6 = vunpack.c.h.b16 %v1331_v62  ;;  %v1258_v9 = vmul.f32 0.015625, %v1004_v2  ;;  %v1761_v31 = vunpack.c.h.b16 %v4902_v50  ;;  %v786_v62 = vld [vmem:[#allocation2 + $0x348] sm:$0xff] }
  0xab   :  { %1174 = vadd.xlane.f32.xlu1 %v1173_v3  ;;  %v933_v35 = vsel %vm160_vm0, %v722_v24, 0.0  ;;  %v930_v40 = vsel %vm160_vm0, %v721_v27, 0.0  ;;  %v2323_v43 = vsel %vm1899_vm1, %v2322_v29, %v2318_v28  ;;  %v1035_v47 = vsel %vm160_vm0, %v756_v36, 0.0  ;;  %p4242_p4 = pnand %p4241_p3, %p4235_p0 }
  0xac   :  { %v2011_v14 = vrot.slane %v1778_v5, %v4907_v59  ;;  %v2016_v15 = vrot.slane %v1779_v6, %v4910_v60  ;;  %v4920_v16 = vpack.c.bf16 %v1259_v7, %v1258_v9  ;;  %1171 = vadd.xlane.f32.xlu0 %v1170_v4  ;;  %v1061_v18 = vpop.xlane.xlu1 %1060  ;;  %v1032_v48 = vsel %vm160_vm0, %v755_v37, 0.0 }
  0xad   :  { %v1058_v19 = vpop.xlane.xlu0 %1057  ;;  %v1277_v22 = vmul.f32 0.015625, %v1061_v18  ;;  %v1893_v49 = vrot.slane %v1760_v30, %v4895_v44  ;;  %v1898_v50 = vrot.slane %v1761_v31, %v4898_v45  ;;  %v1125_v9 = vsel %vm160_vm0, %v786_v62, 0.0  ;;  %v740_v30 = vld [vmem:[#allocation2 + $0x1d8] sm:$0xff]  ;;  %v3988_v31 = vld [vmem:[%s6010_s3 + $0x60] ss:$16 sps:$4 sm:$0xff]  }
  0xae   :  { %v2012_v21 = vsel %vm1906_vm2, %v2011_v14, %v2007_v17  ;;  %v1276_v26 = vmul.f32 0.015625, %v1058_v19  ;;  %v1122_v10 = vsel %vm160_vm0, %v785_v63, 0.0  ;;  %v1824_v11 = vunpack.c.l.b16 %v4920_v16  ;;  %v709_v17 = vld [vmem:[#allocation2 + $0xe0] sm:$0xff] }
  0xaf   :  { %v4927_v25 = vsel %vm1913_vm3, %v2016_v15, %v2012_v21  ;;  %844 = vadd.xlane.f32.xlu1 %v843_v20  ;;  %v1900_v5 = vsel %vm1899_vm1, %v1898_v50, %v1893_v49  ;;  %v1825_v12 = vunpack.c.h.b16 %v4920_v16  ;;  %v710_v15 = vld [vmem:[#allocation2 + $0xe8] sm:$0xff]  ;;  %v894_v24 = vsel %vm160_vm0, %v709_v17, 0.0  ;;  %v3986_v16 = vld [vmem:[%s6010_s3 + $0x64] ss:$16 sps:$4 sm:$0xff]  }
  0xb0   :  { %v1363_v32 = vpack.c.bf16 %v1277_v22, %v1276_v26  ;;  %841 = vadd.xlane.f32.xlu0 %v840_v23  ;;  %v821_v33 = vpop.xlane.xlu1 %820  ;;  %v897_v23 = vsel %vm160_vm0, %v710_v15, 0.0  ;;  %v2239_v26 = vrot.slane %v1824_v11, %v4895_v44  ;;  %1622 = vmatprep.subr.bf16.mxu0 %v3986_v16  ;;  %v1915_v36 = vadd.s32 4294967264, %v4865_v61  ;;  %v774_v50 = vld [vmem:[#allocation2 + $0x2e8] sm:$0xff]  ;;  %v803_v11 = vld [vmem:[#allocation2 + $0x3d0] sm:$0xff] }
  0xb1   :  { %v818_v34 = vpop.xlane.xlu0 %817  ;;  %v1197_v38 = vmul.f32 0.015625, %v821_v33  ;;  %v2243_v27 = vrot.slane %v1825_v12, %v4898_v45  ;;  %v1922_v37 = vadd.s32 4294967256, %v4865_v61  ;;  %1623 = vmatpush1.bf16.msra.mxu0 %v3988_v31  ;;  %v1089_v63 = vsel %vm160_vm0, %v774_v50, 0.0 }
  0xb2   :  { %v1196_v39 = vmul.f32 0.015625, %v818_v34  ;;  %v1842_v41 = vunpack.c.l.b16 %v1363_v32  ;;  %v1843_v42 = vunpack.c.h.b16 %v1363_v32  ;;  %v739_v34 = vld [vmem:[#allocation2 + $0x1d0] sm:$0xff]  ;;  %vm1920_vm4 = vcmask 326912  }
  0xb3   :  { %934 = vadd.xlane.f32.xlu1 %v933_v35  ;;  %v984_v49 = vsel %vm160_vm0, %v739_v34, 0.0  ;;  %vm1927_vm5 = vcmask 392512   ;;  %vm1934_vm6 = vcmask 458112   ;;  %vm1941_vm7 = vcmask 523712  }
  0xb4   :  { %v1323_v46 = vpack.c.bf16 %v1197_v38, %v1196_v39  ;;  %v2327_v51 = vrot.slane %v1842_v41, %v4907_v59  ;;  %v2332_v52 = vrot.slane %v1843_v42, %v4910_v60  ;;  %931 = vadd.xlane.f32.xlu0 %v930_v40  ;;  %v959_v53 = vpop.xlane.xlu1 %958  ;;  %v987_v42 = vsel %vm160_vm0, %v740_v30, 0.0 }
  0xb5   :  { %v956_v54 = vpop.xlane.xlu0 %955  ;;  %v1243_v57 = vmul.f32 0.015625, %v959_v53  ;;  %v773_v53 = vld [vmem:[#allocation2 + $0x2e0] sm:$0xff]  ;;  %vm1948_vm8 = vcmask 589312   ;;  %vm1955_vm9 = vcmask 654912   ;;  %vm1962_vm10 = vcmask 720512  }
  0xb6   :  { %v1762_v55 = vunpack.c.l.b16 %v1323_v46  ;;  %v1763_v56 = vunpack.c.h.b16 %v1323_v46  ;;  %v1242_v58 = vmul.f32 0.015625, %v956_v54  ;;  %v2328_v0 = vsel %vm1906_vm2, %v2327_v51, %v2323_v43  ;;  %v3989_v43 = vld [vmem:[%s6010_s3 + $0x44] ss:$16 sps:$4 sm:$0xff]   ;;  %v3991_v51 = vld [vmem:[%s6010_s3 + $0x40] ss:$16 sps:$4 sm:$0xff]  }
  0xb7   :  { %v4944_v1 = vsel %vm1913_vm3, %v2332_v52, %v2328_v0  ;;  %1036 = vadd.xlane.f32.xlu1 %v1035_v47  ;;  %v2244_v46 = vsel %vm1899_vm1, %v2243_v27, %v2239_v26  ;;  %1624 = vmatprep.subr.bf16.mxu0 %v3989_v43  ;;  %v3992_v0 = vld [vmem:[%s6010_s3 + $0x24] ss:$16 sps:$4 sm:$0xff]   ;;  %vm1969_vm11 = vcmask 786112   ;;  %vm1976_vm12 = vcmask 851712  }
  0xb8   :  { %v1905_v2 = vrot.slane %v1762_v55, %v4907_v59  ;;  %v1912_v3 = vrot.slane %v1763_v56, %v4910_v60  ;;  %v4948_v4 = vpack.c.bf16 %v1243_v57, %v1242_v58  ;;  %1033 = vadd.xlane.f32.xlu0 %v1032_v48  ;;  %v1013_v6 = vpop.xlane.xlu1 %1012  ;;  %v4989_v55 = vsub.s32 %v1915_v36, %v4874_v8  ;;  %v693_v27 = vld [vmem:[#allocation2 + $0x60] sm:$0xff] }
  0xb9   :  { %v1010_v7 = vpop.xlane.xlu0 %1009  ;;  %v1261_v14 = vmul.f32 0.015625, %v1013_v6  ;;  %v4992_v56 = vsub.s32 %v1922_v37, %v4874_v8  ;;  %1625 = vmatpush1.bf16.msra.mxu0 %v3991_v51  ;;  %v1086_v6 = vsel %vm160_vm0, %v773_v53, 0.0  ;;  %v846_v37 = vsel %vm160_vm0, %v693_v27, 0.0 }
  0xba   :  { %v1907_v13 = vsel %vm1906_vm2, %v1905_v2, %v1900_v5  ;;  %v1260_v19 = vmul.f32 0.015625, %v1010_v7  ;;  %v804_v7 = vld [vmem:[#allocation2 + $0x3d8] sm:$0xff]  ;;  %1626 = vmatprep.subr.bf16.mxu0 %v3992_v0  ;;  %v1809_v15 = vunpack.c.h.b16 %v4948_v4  ;;  %vm1983_vm13 = vcmask 917312  }
  0xbb   :  { %v4957_v18 = vsel %vm1913_vm3, %v1912_v3, %v1907_v13  ;;  %1126 = vadd.xlane.f32.xlu1 %v1125_v9  ;;  %v3994_v9 = vld [vmem:[%s6010_s3 + $0x20] ss:$16 sps:$4 sm:$0xff]   ;;  %vm1990_vm14 = vcmask 982912   ;;  %vm1997_vm15 = vcmask 1048512  }
  0xbc   :  { %v1355_v20 = vpack.c.bf16 %v1261_v14, %v1260_v19  ;;  %1123 = vadd.xlane.f32.xlu0 %v1122_v10  ;;  %v1151_v21 = vpop.xlane.xlu1 %1150  ;;  %v1808_v14 = vunpack.c.l.b16 %v4948_v4  ;;  %v1176_v4 = vsel %vm160_vm0, %v803_v11, 0.0 }
  0xbd   :  { %v1148_v22 = vpop.xlane.xlu0 %1147  ;;  %v1307_v28 = vmul.f32 0.015625, %v1151_v21  ;;  %v1179_v21 = vsel %vm160_vm0, %v804_v7, 0.0  ;;  %1627 = vmatpush1.bf16.msra.mxu0 %v3994_v9 }
  0xbe   :  { %v1306_v29 = vmul.f32 0.015625, %v1148_v22  ;;  %v1826_v32 = vunpack.c.l.b16 %v1355_v20  ;;  %v1827_v33 = vunpack.c.h.b16 %v1355_v20  ;;  %v694_v22 = vld [vmem:[#allocation2 + $0x68] sm:$0xff] }
  0xbf   :  { %898 = vadd.xlane.f32.xlu1 %v897_v23  ;;  %v3995_v23 = vld [vmem:[%s6010_s3 + $0x4] ss:$16 sps:$4 sm:$0xff]   ;;  %v849_v31 = vsel %vm160_vm0, %v694_v22, 0.0  ;;  %v4010_v22 = vld [vmem:[%s6010_s3 + $0x2c] ss:$16 sps:$4 sm:$0xff]  }
  0xc0   :  { %v4969_v35 = vpack.c.bf16 %v1307_v28, %v1306_v29  ;;  %v2248_v38 = vrot.slane %v1826_v32, %v4907_v59  ;;  %v2253_v39 = vrot.slane %v1827_v33, %v4910_v60  ;;  %895 = vadd.xlane.f32.xlu0 %v894_v24  ;;  %v875_v40 = vpop.xlane.xlu1 %874  ;;  %v3997_v28 = vld [vmem:[%s6010_s3] ss:$16 sps:$4 sm:$0xff]   ;;  %1628 = vmatprep.subr.bf16.mxu0 %v3995_v23 }
  0xc1   :  { %v872_v41 = vpop.xlane.xlu0 %871  ;;  %v1215_v47 = vmul.f32 0.015625, %v875_v40  ;;  %v2160_v32 = vrot.slane %v1808_v14, %v4895_v44  ;;  %v2164_v33 = vrot.slane %v1809_v15, %v4898_v45  ;;  %1629 = vmatpush1.bf16.msra.mxu0 %v3997_v28  ;;  %v4003_v40 = vld [vmem:[%s6009_s2 + $0xe4] ss:$16 sps:$4 sm:$0xff]   ;;  %v4012_v28 = vld [vmem:[%s6010_s3 + $0x28] ss:$16 sps:$4 sm:$0xff]  }
  0xc2   :  { %v1214_v48 = vmul.f32 0.015625, %v872_v41  ;;  %v2249_v52 = vsel %vm1906_vm2, %v2248_v38, %v2244_v46  ;;  %v724_v38 = vld [vmem:[#allocation2 + $0x158] sm:$0xff]  ;;  %3205 = vmatprep.subr.bf16.mxu0 %v4003_v40  ;;  %v1872_v23 = vunpack.c.l.b16 %v4969_v35 }
  0xc3   :  { %v4986_v54 = vsel %vm1913_vm3, %v2253_v39, %v2249_v52  ;;  %988 = vadd.xlane.f32.xlu1 %v987_v42  ;;  %v4000_v39 = vld [vmem:[%s6010_s3 + $0x68] ss:$16 sps:$4 sm:$0xff]   ;;  %v939_v53 = vsel %vm160_vm0, %v724_v38, 0.0 }
  0xc4   :  { %v1332_v57 = vpack.c.bf16 %v1215_v47, %v1214_v48  ;;  %985 = vadd.xlane.f32.xlu0 %v984_v49  ;;  %v911_v58 = vpop.xlane.xlu1 %910  ;;  %v723_v47 = vld [vmem:[#allocation2 + $0x150] sm:$0xff]  ;;  %v5040_v49 = vld [vmem:[%s6008_s1] sm:$0x1]  ;;  %v2476_v38 = vrot.slane %v1872_v23, %v4895_v44 }
  0xc5   :  { %v908_v62 = vpop.xlane.xlu0 %907  ;;  %v1227_v5 = vmul.f32 0.015625, %v911_v58  ;;  %v4001_v48 = vld [vmem:[%s6009_s2 + $0xe0] ss:$16 sps:$4 sm:$0xff]   ;;  %v4004_v58 = vld [vmem:[%s6010_s3 + $0x4c] ss:$16 sps:$4 sm:$0xff]  }
  0xc6   :  { %v1780_v2 = vunpack.c.l.b16 %v1332_v57  ;;  %v1781_v3 = vunpack.c.h.b16 %v1332_v57  ;;  %v1226_v10 = vmul.f32 0.015625, %v908_v62  ;;  %v4256_v57 = vmov 0  }
  0xc7   :  { %1090 = vadd.xlane.f32.xlu1 %v1089_v63  ;;  %1646 = vmatprep.mubr.bf16.mxu0 %v4256_v57  ;;  %v2165_v62 = vsel %vm1899_vm1, %v2164_v33, %v2160_v32  ;;  %v788_v32 = vld [vmem:[#allocation2 + $0x358] sm:$0xff]  ;;  %v787_v33 = vld [vmem:[#allocation2 + $0x350] sm:$0xff] }
  0xc8   :  { %v2021_v12 = vrot.slane %v1780_v2, %v4989_v55  ;;  %v2026_v13 = vrot.slane %v1781_v3, %v4992_v56  ;;  %v5006_v17 = vpack.c.bf16 %v1227_v5, %v1226_v10  ;;  %1087 = vadd.xlane.f32.xlu0 %v1086_v6  ;;  %v965_v19 = vpop.xlane.xlu1 %964  ;;  %v936_v2 = vsel %vm160_vm0, %v723_v47, 0.0  ;;  %v758_v3 = vld [vmem:[#allocation2 + $0x268] sm:$0xff]  ;;  %3777 = vmatmul.mubr.msk.bf16.vlgmr.msra.gmra.mxu0 %vm160_vm0, %v5040_v49  ;;  %v4009_v6 = vld [vmem:[%s6009_s2 + $0xc4] ss:$16 sps:$4 sm:$0xff]  }
  0xc9   :  { %v962_v20 = vpop.xlane.xlu0 %961  ;;  %v1245_v16 = vmul.f32 0.015625, %v965_v19  ;;  %v4006_v5 = vld [vmem:[%s6010_s3 + $0x48] ss:$16 sps:$4 sm:$0xff]   ;;  %3206 = vmatpush1.bf16.msra.mxu0 %v4001_v48  ;;  %1687 = vmatprep.mubr.bf16.mxu1 %v4256_v57  ;;  %v4021_v47 = vld [vmem:[%s6009_s2 + $0x84] ss:$16 sps:$4 sm:$0xff]  }
  0xca   :  { %v2022_v24 = vsel %vm1920_vm4, %v2021_v12, %v4927_v25  ;;  %v1244_v26 = vmul.f32 0.015625, %v962_v20  ;;  %v3998_v25 = vld [vmem:[%s6010_s3 + $0x6c] ss:$16 sps:$4 sm:$0xff]   ;;  %v757_v12 = vld [vmem:[#allocation2 + $0x260] sm:$0xff]  ;;  %3207 = vmatprep.subr.bf16.mxu0 %v4009_v6  ;;  %v711_v57 = vld [vmem:[#allocation2 + $0xf0] sm:$0xff] }
  0xcb   :  { %v5019_v29 = vsel %vm1927_vm5, %v2026_v13, %v2022_v24  ;;  %1180 = vadd.xlane.f32.xlu1 %v1179_v21  ;;  %1663 = vmatprep.subr.bf16.mxu1 %v3998_v25  ;;  %v4007_v13 = vld [vmem:[%s6009_s2 + $0xc0] ss:$16 sps:$4 sm:$0xff]   ;;  %v1041_v21 = vsel %vm160_vm0, %v758_v3, 0.0  ;;  %v1873_v24 = vunpack.c.h.b16 %v4969_v35  ;;  %v1038_v27 = vsel %vm160_vm0, %v757_v12, 0.0 }
  0xcc   :  { %v1347_v30 = vpack.c.bf16 %v1245_v16, %v1244_v26  ;;  %1177 = vadd.xlane.f32.xlu0 %v1176_v4  ;;  %v1067_v34 = vpop.xlane.xlu1 %1066  ;;  %1664 = vmatpush1.bf16.msra.mxu1 %v4000_v39 }
  0xcd   :  { %v1064_v36 = vpop.xlane.xlu0 %1063  ;;  %v1279_v43 = vmul.f32 0.015625, %v1067_v34  ;;  %1665 = vmatprep.subr.bf16.mxu1 %v4004_v58  ;;  %3208 = vmatpush1.bf16.msra.mxu0 %v4007_v13  ;;  %v4013_v34 = vld [vmem:[%s6009_s2 + $0xa0] ss:$16 sps:$4 sm:$0xff]   ;;  %v2480_v39 = vrot.slane %v1873_v24, %v4898_v45 }
  0xce   :  { %v1810_v41 = vunpack.c.l.b16 %v1347_v30  ;;  %v1811_v42 = vunpack.c.h.b16 %v1347_v30  ;;  %v1278_v46 = vmul.f32 0.015625, %v1064_v36  ;;  %v4015_v30 = vld [vmem:[%s6009_s2 + $0xa4] ss:$16 sps:$4 sm:$0xff]   ;;  %v4019_v58 = vld [vmem:[%s6009_s2 + $0x80] ss:$16 sps:$4 sm:$0xff]  }
  0xcf   :  { %850 = vadd.xlane.f32.xlu1 %v849_v31  ;;  %3209 = vmatprep.subr.bf16.mxu0 %v4015_v30  ;;  %v2481_v6 = vsel %vm1899_vm1, %v2480_v39, %v2476_v38  ;;  %v4025_v39 = vld [vmem:[%s6009_s2 + $0x40] ss:$16 sps:$4 sm:$0xff]  }
  0xd0   :  { %v2169_v50 = vrot.slane %v1810_v41, %v4907_v59  ;;  %v2174_v51 = vrot.slane %v1811_v42, %v4910_v60  ;;  %v1364_v52 = vpack.c.bf16 %v1279_v43, %v1278_v46  ;;  %847 = vadd.xlane.f32.xlu0 %v846_v37  ;;  %v1103_v63 = vpop.xlane.xlu1 %1102  ;;  %1666 = vmatpush1.bf16.msra.mxu1 %v4006_v5  ;;  %v1131_v42 = vsel %vm160_vm0, %v788_v32, 0.0  ;;  %v4018_v46 = vld [vmem:[%s6010_s3 + $0x8] ss:$16 sps:$4 sm:$0xff]   ;;  %v775_v32 = vld [vmem:[#allocation2 + $0x2f0] sm:$0xff] }
  0xd1   :  { %v1100_v0 = vpop.xlane.xlu0 %1099  ;;  %v1291_v11 = vmul.f32 0.015625, %v1103_v63  ;;  %1667 = vmatprep.subr.bf16.mxu1 %v4010_v22  ;;  %v1128_v43 = vsel %vm160_vm0, %v787_v33, 0.0  ;;  %3210 = vmatpush1.bf16.msra.mxu0 %v4013_v34  ;;  %v1793_v63 = vunpack.c.h.b16 %v5006_v17  ;;  %v742_v5 = vld [vmem:[#allocation2 + $0x1e8] sm:$0xff]  ;;  %v4027_v33 = vld [vmem:[%s6009_s2 + $0x44] ss:$16 sps:$4 sm:$0xff]  }
  0xd2   :  { %v2170_v7 = vsel %vm1906_vm2, %v2169_v50, %v2165_v62  ;;  %v1844_v9 = vunpack.c.l.b16 %v1364_v52  ;;  %v1845_v10 = vunpack.c.h.b16 %v1364_v52  ;;  %v1290_v15 = vmul.f32 0.015625, %v1100_v0  ;;  %3211 = vmatprep.subr.bf16.mxu0 %v4021_v47  ;;  %v4030_v34 = vld [vmem:[%s6009_s2 + $0x2e4] ss:$16 sps:$4 sm:$0xff]  }
  0xd3   :  { %v5063_v14 = vsel %vm1913_vm3, %v2174_v51, %v2170_v7  ;;  %940 = vadd.xlane.f32.xlu1 %v939_v53  ;;  %v712_v53 = vld [vmem:[#allocation2 + $0xf8] sm:$0xff]  ;;  %v1792_v62 = vunpack.c.l.b16 %v5006_v17  ;;  %v4024_v17 = vld [vmem:[%s6009_s2 + $0x64] ss:$16 sps:$4 sm:$0xff]   ;;  %v993_v24 = vsel %vm160_vm0, %v742_v5, 0.0 }
  0xd4   :  { %v2337_v19 = vrot.slane %v1844_v9, %v4989_v55  ;;  %v2342_v20 = vrot.slane %v1845_v10, %v4992_v56  ;;  %v5073_v16 = vpack.c.bf16 %v1291_v11, %v1290_v15  ;;  %937 = vadd.xlane.f32.xlu0 %v936_v2  ;;  %v1157_v26 = vpop.xlane.xlu1 %1156  ;;  %1668 = vmatpush1.bf16.msra.mxu1 %v4012_v28  ;;  %v903_v10 = vsel %vm160_vm0, %v712_v53, 0.0 }
  0xd5   :  { %v1154_v4 = vpop.xlane.xlu0 %1153  ;;  %v1309_v25 = vmul.f32 0.015625, %v1157_v26  ;;  %v900_v11 = vsel %vm160_vm0, %v711_v57, 0.0  ;;  %3212 = vmatpush1.bf16.msra.mxu0 %v4019_v58  ;;  %v2081_v26 = vrot.slane %v1792_v62, %v4895_v44 }
  0xd6   :  { %v2338_v31 = vsel %vm1920_vm4, %v2337_v19, %v4944_v1  ;;  %v1308_v35 = vmul.f32 0.015625, %v1154_v4  ;;  %v4016_v1 = vld [vmem:[%s6010_s3 + $0xc] ss:$16 sps:$4 sm:$0xff]   ;;  %3213 = vmatprep.subr.bf16.mxu0 %v4024_v17  ;;  %v2085_v4 = vrot.slane %v1793_v63, %v4898_v45  ;;  %v805_v63 = vld [vmem:[#allocation2 + $0x3e0] sm:$0xff]  ;;  %v1936_v17 = vadd.s32 4294967240, %v4865_v61 }
  0xd7   :  { %v5088_v36 = vsel %vm1927_vm5, %v2342_v20, %v2338_v31  ;;  %1042 = vadd.xlane.f32.xlu1 %v1041_v21  ;;  %1669 = vmatprep.subr.bf16.mxu1 %v4016_v1  ;;  %v741_v20 = vld [vmem:[#allocation2 + $0x1e0] sm:$0xff] }
  0xd8   :  { %v1379_v37 = vpack.c.bf16 %v1309_v25, %v1308_v35  ;;  %1039 = vadd.xlane.f32.xlu0 %v1038_v27  ;;  %v827_v40 = vpop.xlane.xlu1 %826  ;;  %1670 = vmatpush1.bf16.msra.mxu1 %v4018_v46  ;;  %v4022_v21 = vld [vmem:[%s6009_s2 + $0x60] ss:$16 sps:$4 sm:$0xff]   ;;  %v990_v35 = vsel %vm160_vm0, %v741_v20, 0.0 }
  0xd9   :  { %v824_v41 = vpop.xlane.xlu0 %823  ;;  %v1199_v51 = vmul.f32 0.015625, %v827_v40  ;;  %3214 = vmatpush1.bf16.msra.mxu0 %v4022_v21  ;;  %v4028_v40 = vld [vmem:[%s6009_s2 + $0x2e0] ss:$16 sps:$4 sm:$0xff]   ;;  %3246 = vmatprep.subr.bf16.mxu1 %v4030_v34 }
  0xda   :  { %v1874_v48 = vunpack.c.l.b16 %v1379_v37  ;;  %v1875_v50 = vunpack.c.h.b16 %v1379_v37  ;;  %v1198_v52 = vmul.f32 0.015625, %v824_v41  ;;  %3215 = vmatprep.subr.bf16.mxu0 %v4027_v33 }
  0xdb   :  { %1132 = vadd.xlane.f32.xlu1 %v1131_v42  ;;  %3778 = vmatmul.mubr.msk.bf16.vlgmr.msra.gmra.mxu1 %vm160_vm0, %v5040_v49  ;;  %v776_v49 = vld [vmem:[#allocation2 + $0x2f8] sm:$0xff] }
  0xdc   :  { %v2485_v0 = vrot.slane %v1874_v48, %v4907_v59  ;;  %v2490_v2 = vrot.slane %v1875_v50, %v4910_v60  ;;  %v1324_v3 = vpack.c.bf16 %v1199_v51, %v1198_v52  ;;  %1129 = vadd.xlane.f32.xlu0 %v1128_v43  ;;  %v917_v7 = vpop.xlane.xlu1 %916  ;;  %v1095_v47 = vsel %vm160_vm0, %v776_v49, 0.0  ;;  %v806_v50 = vld [vmem:[#allocation2 + $0x3e8] sm:$0xff]  ;;  %3247 = vmatpush1.bf16.msra.mxu1 %v4028_v40  ;;  %v4042_v49 = vld [vmem:[%s6009_s2 + $0x2a4] ss:$16 sps:$4 sm:$0xff]  }
  0xdd   :  { %v914_v9 = vpop.xlane.xlu0 %913  ;;  %v1229_v19 = vmul.f32 0.015625, %v917_v7  ;;  %v1092_v48 = vsel %vm160_vm0, %v775_v32, 0.0  ;;  %v1856_v51 = vunpack.c.l.b16 %v5073_v16  ;;  %v1857_v52 = vunpack.c.h.b16 %v5073_v16  ;;  %3216 = vmatpush1.bf16.msra.mxu0 %v4025_v39  ;;  %v4031_v7 = vld [vmem:[%s6009_s2 + $0x20] ss:$16 sps:$4 sm:$0xff]   ;;  %v726_v39 = vld [vmem:[#allocation2 + $0x168] sm:$0xff] }
  0xde   :  { %v2486_v12 = vsel %vm1906_vm2, %v2485_v0, %v2481_v6  ;;  %v1764_v13 = vunpack.c.l.b16 %v1324_v3  ;;  %v1765_v15 = vunpack.c.h.b16 %v1324_v3  ;;  %v1228_v23 = vmul.f32 0.015625, %v914_v9  ;;  %v4033_v0 = vld [vmem:[%s6009_s2 + $0x24] ss:$16 sps:$4 sm:$0xff]   ;;  %v4034_v9 = vld [vmem:[%s6009_s2 + $0x2c0] ss:$16 sps:$4 sm:$0xff]  }
  0xdf   :  { %v5123_v22 = vsel %vm1913_vm3, %v2490_v2, %v2486_v12  ;;  %904 = vadd.xlane.f32.xlu1 %v903_v10  ;;  %v4036_v2 = vld [vmem:[%s6009_s2 + $0x2c4] ss:$16 sps:$4 sm:$0xff]   ;;  %v1185_v12 = vsel %vm160_vm0, %v806_v50, 0.0  ;;  %3217 = vmatprep.subr.bf16.mxu0 %v4033_v0  ;;  %v2397_v21 = vrot.slane %v1856_v51, %v4895_v44  ;;  %v4040_v32 = vld [vmem:[%s6009_s2 + $0x2a0] ss:$16 sps:$4 sm:$0xff]  }
  0xe0   :  { %v1919_v27 = vrot.slane %v1764_v13, %v4989_v55  ;;  %v1926_v28 = vrot.slane %v1765_v15, %v4992_v56  ;;  %v1339_v30 = vpack.c.bf16 %v1229_v19, %v1228_v23  ;;  %901 = vadd.xlane.f32.xlu0 %v900_v11  ;;  %v1019_v31 = vpop.xlane.xlu1 %1018  ;;  %v1929_v11 = vadd.s32 4294967248, %v4865_v61  ;;  %3248 = vmatprep.subr.bf16.mxu1 %v4036_v2 }
  0xe1   :  { %v1016_v25 = vpop.xlane.xlu0 %1015  ;;  %v1263_v1 = vmul.f32 0.015625, %v1019_v31  ;;  %v2401_v23 = vrot.slane %v1857_v52, %v4898_v45  ;;  %3249 = vmatpush1.bf16.msra.mxu1 %v4034_v9  ;;  %3218 = vmatpush1.bf16.msra.mxu0 %v4031_v7  ;;  %v945_v2 = vsel %vm160_vm0, %v726_v39, 0.0  ;;  %v4058_v39 = vld [vmem:[%s6009_s2 + $0x240] ss:$16 sps:$4 sm:$0xff]  }
  0xe2   :  { %v1921_v37 = vsel %vm1920_vm4, %v1919_v27, %v4957_v18  ;;  %v1262_v38 = vmul.f32 0.015625, %v1016_v25  ;;  %v1794_v42 = vunpack.c.l.b16 %v1339_v30  ;;  %v1795_v43 = vunpack.c.h.b16 %v1339_v30  ;;  %v696_v27 = vld [vmem:[#allocation2 + $0x78] sm:$0xff]  ;;  %v695_v25 = vld [vmem:[#allocation2 + $0x70] sm:$0xff]  ;;  %3250 = vmatprep.subr.bf16.mxu1 %v4042_v49 }
  0xe3   :  { %v5146_v41 = vsel %vm1927_vm5, %v1926_v28, %v1921_v37  ;;  %v2086_v18 = vsel %vm1899_vm1, %v2085_v4, %v2081_v26  ;;  %994 = vadd.xlane.f32.xlu1 %v993_v24  ;;  %v1182_v4 = vsel %vm160_vm0, %v805_v63, 0.0  ;;  %v4039_v28 = vld [vmem:[%s6009_s2 + $0x4] ss:$16 sps:$4 sm:$0xff]   ;;  %v2402_v40 = vsel %vm1899_vm1, %v2401_v23, %v2397_v21  ;;  %v4049_v21 = vld [vmem:[%s6009_s2 + $0x1c0] ss:$16 sps:$4 sm:$0xff]  }
  0xe4   :  { %v1356_v46 = vpack.c.bf16 %v1263_v1, %v1262_v38  ;;  %v2090_v53 = vrot.slane %v1794_v42, %v4907_v59  ;;  %v2095_v57 = vrot.slane %v1795_v43, %v4910_v60  ;;  %991 = vadd.xlane.f32.xlu0 %v990_v35  ;;  %v1109_v58 = vpop.xlane.xlu1 %1108  ;;  %v4037_v35 = vld [vmem:[%s6009_s2] ss:$16 sps:$4 sm:$0xff]   ;;  %3219 = vmatprep.subr.bf16.mxu0 %v4039_v28  ;;  %v855_v38 = vsel %vm160_vm0, %v696_v27, 0.0 }
  0xe5   :  { %v1106_v62 = vpop.xlane.xlu0 %1105  ;;  %v1293_v6 = vmul.f32 0.015625, %v1109_v58  ;;  %v5199_v1 = vsub.s32 %v1929_v11, %v4874_v8  ;;  %v5204_v42 = vsub.s32 %v1936_v17, %v4874_v8  ;;  %3251 = vmatpush1.bf16.msra.mxu1 %v4040_v32  ;;  %3220 = vmatpush1.bf16.msra.mxu0 %v4037_v35  ;;  %v4051_v11 = vld [vmem:[%s6009_s2 + $0x1c4] ss:$16 sps:$4 sm:$0xff]   ;;  %v4052_v23 = vld [vmem:[%s6009_s2 + $0x260] ss:$16 sps:$4 sm:$0xff]  }
  0xe6   :  { %v1828_v3 = vunpack.c.l.b16 %v1356_v46  ;;  %v1829_v5 = vunpack.c.h.b16 %v1356_v46  ;;  %v1292_v16 = vmul.f32 0.015625, %v1106_v62  ;;  %v2091_v10 = vsel %vm1906_vm2, %v2090_v53, %v2086_v18  ;;  %v4043_v53 = vld [vmem:[%s6009_s2 + $0x1e0] ss:$16 sps:$4 sm:$0xff]   ;;  %v4054_v17 = vld [vmem:[%s6009_s2 + $0x264] ss:$16 sps:$4 sm:$0xff]  }
  0xe7   :  { %v5172_v13 = vsel %vm1913_vm3, %v2095_v57, %v2091_v10  ;;  %1096 = vadd.xlane.f32.xlu1 %v1095_v47  ;;  %v725_v47 = vld [vmem:[#allocation2 + $0x160] sm:$0xff]  ;;  %v759_v10 = vld [vmem:[#allocation2 + $0x270] sm:$0xff] }
  0xe8   :  { %v2258_v15 = vrot.slane %v1828_v3, %v4989_v55  ;;  %v2263_v19 = vrot.slane %v1829_v5, %v4992_v56  ;;  %v1371_v20 = vpack.c.bf16 %v1293_v6, %v1292_v16  ;;  %1093 = vadd.xlane.f32.xlu0 %v1092_v48  ;;  %v881_v24 = vpop.xlane.xlu1 %880  ;;  %v4048_v48 = vld [vmem:[%s6009_s2 + $0x284] ss:$16 sps:$4 sm:$0xff]   ;;  %v4046_v57 = vld [vmem:[%s6009_s2 + $0x280] ss:$16 sps:$4 sm:$0xff]   ;;  %v760_v3 = vld [vmem:[#allocation2 + $0x278] sm:$0xff]  ;;  %v942_v9 = vsel %vm160_vm0, %v725_v47, 0.0 }
  0xe9   :  { %v878_v26 = vpop.xlane.xlu0 %877  ;;  %v1217_v31 = vmul.f32 0.015625, %v881_v24  ;;  %3252 = vmatprep.subr.bf16.mxu1 %v4048_v48 }
  0xea   :  { %v2259_v44 = vsel %vm1920_vm4, %v2258_v15, %v4986_v54  ;;  %v1858_v30 = vunpack.c.l.b16 %v1371_v20  ;;  %v1859_v45 = vunpack.c.h.b16 %v1371_v20  ;;  %v1216_v34 = vmul.f32 0.015625, %v878_v26  ;;  %3253 = vmatpush1.bf16.msra.mxu1 %v4046_v57 }
  0xeb   :  { %v5194_v33 = vsel %vm1927_vm5, %v2263_v19, %v2259_v44  ;;  %1186 = vadd.xlane.f32.xlu1 %v1185_v12  ;;  %v1047_v26 = vsel %vm160_vm0, %v760_v3, 0.0  ;;  %3254 = vmatprep.subr.bf16.mxu1 %v4054_v17 }
  0xec   :  { %v2406_v54 = vrot.slane %v1858_v30, %v4907_v59  ;;  %v2411_v37 = vrot.slane %v1859_v45, %v4910_v60  ;;  %v1333_v43 = vpack.c.bf16 %v1217_v31, %v1216_v34  ;;  %1183 = vadd.xlane.f32.xlu0 %v1182_v4  ;;  %v971_v18 = vpop.xlane.xlu1 %970  ;;  %v852_v59 = vsel %vm160_vm0, %v695_v25, 0.0  ;;  %v4045_v60 = vld [vmem:[%s6009_s2 + $0x1e4] ss:$16 sps:$4 sm:$0xff]   ;;  %v790_v31 = vld [vmem:[#allocation2 + $0x368] sm:$0xff] }
  0xed   :  { %v968_v46 = vpop.xlane.xlu0 %967  ;;  %v1247_v51 = vmul.f32 0.015625, %v971_v18  ;;  %3221 = vmatprep.subr.bf16.mxu0 %v4045_v60  ;;  %v1044_v45 = vsel %vm160_vm0, %v759_v10, 0.0  ;;  %v4060_v25 = vld [vmem:[%s6009_s2 + $0x244] ss:$16 sps:$4 sm:$0xff]  }
  0xee   :  { %v2407_v50 = vsel %vm1906_vm2, %v2406_v54, %v2402_v40  ;;  %v1246_v52 = vmul.f32 0.015625, %v968_v46  ;;  %v1782_v62 = vunpack.c.l.b16 %v1333_v43  ;;  %v1783_v63 = vunpack.c.h.b16 %v1333_v43  ;;  %3222 = vmatpush2.bf16.msra.mxu0 %v4043_v53  ;;  %3255 = vmatpush1.bf16.msra.mxu1 %v4052_v23  ;;  %v4066_v53 = vld [vmem:[%s6009_s2 + $0x224] ss:$16 sps:$4 sm:$0xff]  }
  0xef   :  { %v5221_v58 = vsel %vm1913_vm3, %v2411_v37, %v2407_v50  ;;  %856 = vadd.xlane.f32.xlu1 %v855_v38  ;;  %3223 = vmatprep.subr.bf16.mxu0 %v4051_v11  ;;  %v789_v37 = vld [vmem:[#allocation2 + $0x360] sm:$0xff]  ;;  %v1137_v46 = vsel %vm160_vm0, %v790_v31, 0.0 }
  0xf0   :  { %v1348_v0 = vpack.c.bf16 %v1247_v51, %v1246_v52  ;;  %v2031_v5 = vrot.slane %v1782_v62, %v5199_v1  ;;  %v2036_v6 = vrot.slane %v1783_v63, %v5204_v42  ;;  %853 = vadd.xlane.f32.xlu0 %v852_v59  ;;  %v1073_v16 = vpop.xlane.xlu1 %1072  ;;  %v4055_v38 = vld [vmem:[%s6009_s2 + $0x1a0] ss:$16 sps:$4 sm:$0xff]   ;;  %3256 = vmatprep.subr.bf16.mxu1 %v4060_v25  ;;  %v744_v59 = vld [vmem:[#allocation2 + $0x1f8] sm:$0xff]  ;;  %v1134_v50 = vsel %vm160_vm0, %v789_v37, 0.0  ;;  %v4063_v52 = vld [vmem:[%s6009_s2 + $0x184] ss:$16 sps:$4 sm:$0xff]  }
  0xf1   :  { %v1070_v7 = vpop.xlane.xlu0 %1069  ;;  %v1281_v19 = vmul.f32 0.015625, %v1073_v16  ;;  %v743_v51 = vld [vmem:[#allocation2 + $0x1f0] sm:$0xff]  ;;  %v728_v25 = vld [vmem:[#allocation2 + $0x178] sm:$0xff] }
  0xf2   :  { %v1812_v12 = vunpack.c.l.b16 %v1348_v0  ;;  %v1813_v15 = vunpack.c.h.b16 %v1348_v0  ;;  %v1280_v20 = vmul.f32 0.015625, %v1070_v7  ;;  %v2032_v24 = vsel %vm1934_vm6, %v2031_v5, %v5019_v29  ;;  %v4057_v29 = vld [vmem:[%s6009_s2 + $0x1a4] ss:$16 sps:$4 sm:$0xff]   ;;  %3224 = vmatpush2.bf16.msra.mxu0 %v4049_v21  ;;  %3257 = vmatpush1.bf16.msra.mxu1 %v4058_v39  ;;  %v4061_v0 = vld [vmem:[%s6009_s2 + $0x180] ss:$16 sps:$4 sm:$0xff]   ;;  %v808_v7 = vld [vmem:[#allocation2 + $0x3f8] sm:$0xff] }
  0xf3   :  { %v5243_v4 = vsel %vm1941_vm7, %v2036_v6, %v2032_v24  ;;  %946 = vadd.xlane.f32.xlu1 %v945_v2  ;;  %3225 = vmatprep.subr.bf16.mxu0 %v4057_v29  ;;  %v4064_v2 = vld [vmem:[%s6009_s2 + $0x220] ss:$16 sps:$4 sm:$0xff]   ;;  %v4078_v37 = vld [vmem:[%s6009_s2 + $0x3e4] ss:$16 sps:$4 sm:$0xff]  }
  0xf4   :  { %v2179_v27 = vrot.slane %v1812_v12, %v4989_v55  ;;  %v2184_v28 = vrot.slane %v1813_v15, %v4992_v56  ;;  %v1365_v49 = vpack.c.bf16 %v1281_v19, %v1280_v20  ;;  %943 = vadd.xlane.f32.xlu0 %v942_v9  ;;  %v1163_v44 = vpop.xlane.xlu1 %1162  ;;  %3258 = vmatprep.subr.bf16.mxu1 %v4066_v53  ;;  %v996_v12 = vsel %vm160_vm0, %v743_v51, 0.0  ;;  %v807_v15 = vld [vmem:[#allocation2 + $0x3f0] sm:$0xff]  ;;  %v792_v51 = vld [vmem:[#allocation2 + $0x378] sm:$0xff] }
  0xf5   :  { %v1160_v30 = vpop.xlane.xlu0 %1159  ;;  %v1311_v54 = vmul.f32 0.015625, %v1163_v44  ;;  %v4069_v19 = vld [vmem:[%s6009_s2 + $0x164] ss:$16 sps:$4 sm:$0xff]   ;;  %v1191_v44 = vsel %vm160_vm0, %v808_v7, 0.0  ;;  %v4082_v7 = vld [vmem:[%s6009_s2 + $0x3c0] ss:$16 sps:$4 sm:$0xff]  }
  0xf6   :  { %v2180_v35 = vsel %vm1920_vm4, %v2179_v27, %v5063_v14  ;;  %v1846_v32 = vunpack.c.l.b16 %v1365_v49  ;;  %v1847_v34 = vunpack.c.h.b16 %v1365_v49  ;;  %v1310_v43 = vmul.f32 0.015625, %v1160_v30  ;;  %3226 = vmatpush2.bf16.msra.mxu0 %v4055_v38  ;;  %3259 = vmatpush1.bf16.msra.mxu1 %v4064_v2  ;;  %v4072_v20 = vld [vmem:[%s6009_s2 + $0x204] ss:$16 sps:$4 sm:$0xff]   ;;  %v4067_v27 = vld [vmem:[%s6009_s2 + $0x160] ss:$16 sps:$4 sm:$0xff]  }
  0xf7   :  { %v5263_v40 = vsel %vm1927_vm5, %v2184_v28, %v2180_v35  ;;  %1048 = vadd.xlane.f32.xlu1 %v1047_v26  ;;  %3227 = vmatprep.subr.bf16.mxu0 %v4063_v52  ;;  %v4070_v28 = vld [vmem:[%s6009_s2 + $0x200] ss:$16 sps:$4 sm:$0xff]   ;;  %v4084_v2 = vld [vmem:[%s6009_s2 + $0x3c4] ss:$16 sps:$4 sm:$0xff]  }
  0xf8   :  { %v2347_v14 = vrot.slane %v1846_v32, %v5199_v1  ;;  %v2352_v18 = vrot.slane %v1847_v34, %v5204_v42  ;;  %v1380_v47 = vpack.c.bf16 %v1311_v54, %v1310_v43  ;;  %1045 = vadd.xlane.f32.xlu0 %v1044_v45  ;;  %v833_v60 = vpop.xlane.xlu1 %832  ;;  %3260 = vmatprep.subr.bf16.mxu1 %v4072_v20  ;;  %v1188_v34 = vsel %vm160_vm0, %v807_v15, 0.0  ;;  %v4075_v54 = vld [vmem:[%s6009_s2 + $0x144] ss:$16 sps:$4 sm:$0xff]  }
  0xf9   :  { %v830_v48 = vpop.xlane.xlu0 %829  ;;  %v1201_v62 = vmul.f32 0.015625, %v833_v60 }
  0xfa   :  { %v2348_v57 = vsel %vm1934_vm6, %v2347_v14, %v5088_v36  ;;  %v1200_v63 = vmul.f32 0.015625, %v830_v48  ;;  %v1876_v5 = vunpack.c.l.b16 %v1380_v47  ;;  %v1877_v6 = vunpack.c.h.b16 %v1380_v47  ;;  %3228 = vmatpush2.bf16.msra.mxu0 %v4061_v0  ;;  %3261 = vmatpush1.bf16.msra.mxu1 %v4070_v28  ;;  %v4081_v0 = vld [vmem:[%s6009_s2 + $0x124] ss:$16 sps:$4 sm:$0xff]  }
  0xfb   :  { %v5284_v3 = vsel %vm1941_vm7, %v2352_v18, %v2348_v57  ;;  %1138 = vadd.xlane.f32.xlu1 %v1137_v46  ;;  %v999_v36 = vsel %vm160_vm0, %v744_v59, 0.0  ;;  %3229 = vmatprep.subr.bf16.mxu0 %v4069_v19  ;;  %v4073_v18 = vld [vmem:[%s6009_s2 + $0x140] ss:$16 sps:$4 sm:$0xff]   ;;  %v951_v48 = vsel %vm160_vm0, %v728_v25, 0.0 }
  0xfc   :  { %v1325_v16 = vpack.c.bf16 %v1201_v62, %v1200_v63  ;;  %v2495_v9 = vrot.slane %v1876_v5, %v4989_v55  ;;  %v2500_v10 = vrot.slane %v1877_v6, %v4992_v56  ;;  %1135 = vadd.xlane.f32.xlu0 %v1134_v50  ;;  %v923_v11 = vpop.xlane.xlu1 %922  ;;  %v4076_v46 = vld [vmem:[%s6009_s2 + $0x3e0] ss:$16 sps:$4 sm:$0xff]   ;;  %3262 = vmatprep.subr.bf16.mxu1 %v4078_v37  ;;  %v1943_v62 = vadd.s32 4294967232, %v4865_v61 }
  0xfd   :  { %v920_v17 = vpop.xlane.xlu0 %919  ;;  %v1231_v24 = vmul.f32 0.015625, %v923_v11  ;;  %v791_v63 = vld [vmem:[#allocation2 + $0x370] sm:$0xff] }
  0xfe   :  { %v1766_v21 = vunpack.c.l.b16 %v1325_v16  ;;  %v1767_v23 = vunpack.c.h.b16 %v1325_v16  ;;  %v1230_v26 = vmul.f32 0.015625, %v920_v17  ;;  %v2496_v49 = vsel %vm1920_vm4, %v2495_v9, %v5123_v22  ;;  %v727_v22 = vld [vmem:[#allocation2 + $0x170] sm:$0xff]  ;;  %3230 = vmatpush2.bf16.msra.mxu0 %v4067_v27  ;;  %3263 = vmatpush2.bf16.msra.mxu1 %v4076_v46 }
  0xff   :  { %v5306_v30 = vsel %vm1927_vm5, %v2500_v10, %v2496_v49  ;;  %1000 = vadd.xlane.f32.xlu1 %v999_v36  ;;  %3231 = vmatprep.subr.bf16.mxu0 %v4075_v54  ;;  %v948_v50 = vsel %vm160_vm0, %v727_v22, 0.0  ;;  %v4079_v36 = vld [vmem:[%s6009_s2 + $0x120] ss:$16 sps:$4 sm:$0xff]   ;;  %v1950_v17 = vadd.s32 4294967224, %v4865_v61  ;;  %v5370_v25 = vsub.s32 %v1943_v62, %v4874_v8 }
 0x100   :  { %v1933_v45 = vrot.slane %v1766_v21, %v5199_v1  ;;  %v1940_v31 = vrot.slane %v1767_v23, %v5204_v42  ;;  %v1340_v29 = vpack.c.bf16 %v1231_v24, %v1230_v26  ;;  %997 = vadd.xlane.f32.xlu0 %v996_v12  ;;  %v1025_v35 = vpop.xlane.xlu1 %1024  ;;  %3264 = vmatprep.subr.bf16.mxu1 %v4084_v2  ;;  %v1143_v21 = vsel %vm160_vm0, %v792_v51, 0.0  ;;  %v4087_v24 = vld [vmem:[%s6009_s2 + $0x104] ss:$16 sps:$4 sm:$0xff]   ;;  %v4097_v2 = vld [vmem:[%s6009_s2 + $0x360] ss:$16 sps:$4 sm:$0xff]  }
 0x101   :  { %v1022_v32 = vpop.xlane.xlu0 %1021  ;;  %v1265_v14 = vmul.f32 0.015625, %v1025_v35  ;;  %v1140_v23 = vsel %vm160_vm0, %v791_v63, 0.0  ;;  %v4090_v26 = vld [vmem:[%s6009_s2 + $0x3a4] ss:$16 sps:$4 sm:$0xff]   ;;  %v5373_v35 = vsub.s32 %v1950_v17, %v4874_v8  ;;  %vm2552_vm0 = vcmask 1041409  }
 0x102   :  { %v1935_v38 = vsel %vm1934_vm6, %v1933_v45, %v5146_v41  ;;  %v1796_v39 = vunpack.c.l.b16 %v1340_v29  ;;  %v1797_v43 = vunpack.c.h.b16 %v1340_v29  ;;  %v1264_v47 = vmul.f32 0.015625, %v1022_v32  ;;  %3232 = vmatpush2.bf16.msra.mxu0 %v4073_v18  ;;  %3265 = vmatpush2.bf16.msra.mxu1 %v4082_v7  ;;  %v4085_v45 = vld [vmem:[%s6009_s2 + $0x100] ss:$16 sps:$4 sm:$0xff]  }
 0x103   :  { %v5326_v59 = vsel %vm1941_vm7, %v1940_v31, %v1935_v38  ;;  %1192 = vadd.xlane.f32.xlu1 %v1191_v44  ;;  %3233 = vmatprep.subr.bf16.mxu0 %v4081_v0  ;;  %v4088_v31 = vld [vmem:[%s6009_s2 + $0x3a0] ss:$16 sps:$4 sm:$0xff]   ;;  %v4093_v38 = vld [vmem:[%s6009_s2 + $0x384] ss:$16 sps:$4 sm:$0xff]  }
 0x104   :  { %v2100_v41 = vrot.slane %v1796_v39, %v4989_v55  ;;  %v2105_v60 = vrot.slane %v1797_v43, %v4992_v56  ;;  %v1357_v52 = vpack.c.bf16 %v1265_v14, %v1264_v47  ;;  %1189 = vadd.xlane.f32.xlu0 %v1188_v34  ;;  %v1115_v53 = vpop.xlane.xlu1 %1114  ;;  %3266 = vmatprep.subr.bf16.mxu1 %v4090_v26  ;;  %v4096_v39 = vld [vmem:[%s6009_s2 + $0xec] ss:$16 sps:$4 sm:$0xff]   ;;  %v4091_v18 = vld [vmem:[%s6009_s2 + $0x380] ss:$16 sps:$4 sm:$0xff]  }
 0x105   :  { %v1112_v57 = vpop.xlane.xlu0 %1111  ;;  %v1295_v6 = vmul.f32 0.015625, %v1115_v53 }
 0x106   :  { %v2101_v5 = vsel %vm1920_vm4, %v2100_v41, %v5172_v13  ;;  %v1294_v16 = vmul.f32 0.015625, %v1112_v57  ;;  %v1830_v10 = vunpack.c.l.b16 %v1357_v52  ;;  %v1831_v11 = vunpack.c.h.b16 %v1357_v52  ;;  %3234 = vmatpush2.bf16.msra.mxu0 %v4079_v36  ;;  %3267 = vmatpush2.bf16.msra.mxu1 %v4088_v31  ;;  %v4099_v57 = vld [vmem:[%s6009_s2 + $0x364] ss:$16 sps:$4 sm:$0xff]  }
 0x107   :  { %v5348_v9 = vsel %vm1927_vm5, %v2105_v60, %v2101_v5  ;;  %952 = vadd.xlane.f32.xlu1 %v951_v48  ;;  %3235 = vmatprep.subr.bf16.mxu0 %v4087_v24 }
 0x108   :  { %v1372_v13 = vpack.c.bf16 %v1295_v6, %v1294_v16  ;;  %v2268_v12 = vrot.slane %v1830_v10, %v5199_v1  ;;  %v2273_v15 = vrot.slane %v1831_v11, %v5204_v42  ;;  %949 = vadd.xlane.f32.xlu0 %v948_v50  ;;  %v887_v19 = vpop.xlane.xlu1 %886  ;;  %3268 = vmatprep.subr.bf16.mxu1 %v4093_v38 }
 0x109   :  { %v884_v20 = vpop.xlane.xlu0 %883  ;;  %v1219_v49 = vmul.f32 0.015625, %v887_v19 }
 0x10a   :  { %v1860_v27 = vunpack.c.l.b16 %v1372_v13  ;;  %v1861_v28 = vunpack.c.h.b16 %v1372_v13  ;;  %v1218_v44 = vmul.f32 0.015625, %v884_v20  ;;  %v2269_v29 = vsel %vm1934_vm6, %v2268_v12, %v5194_v33  ;;  %3236 = vmatpush2.bf16.msra.mxu0 %v4085_v45  ;;  %3269 = vmatpush2.bf16.msra.mxu1 %v4091_v18  ;;  %v4105_v13 = vld [vmem:[%s6009_s2 + $0x344] ss:$16 sps:$4 sm:$0xff]   ;;  %v4115_v18 = vld [vmem:[%s6009_s2 + $0x300] ss:$16 sps:$4 sm:$0xff]  }
 0x10b   :  { %v5376_v32 = vsel %vm1941_vm7, %v2273_v15, %v2269_v29  ;;  %1144 = vadd.xlane.f32.xlu1 %v1143_v21  ;;  %3287 = vmatprep.subr.bf16.mxu0 %v4096_v39  ;;  %v4103_v15 = vld [vmem:[%s6009_s2 + $0x340] ss:$16 sps:$4 sm:$0xff]  }
 0x10c   :  { %v2416_v34 = vrot.slane %v1860_v27, %v4989_v55  ;;  %v2421_v22 = vrot.slane %v1861_v28, %v4992_v56  ;;  %v1334_v54 = vpack.c.bf16 %v1219_v49, %v1218_v44  ;;  %1141 = vadd.xlane.f32.xlu0 %v1140_v23  ;;  %v977_v37 = vpop.xlane.xlu1 %976  ;;  %3270 = vmatprep.subr.bf16.mxu1 %v4099_v57  ;;  %v4111_v44 = vld [vmem:[%s6009_s2 + $0x324] ss:$16 sps:$4 sm:$0xff]   ;;  %v4109_v29 = vld [vmem:[%s6009_s2 + $0x320] ss:$16 sps:$4 sm:$0xff]  }
 0x10d   :  { %v974_v33 = vpop.xlane.xlu0 %973  ;;  %v1249_v56 = vmul.f32 0.015625, %v977_v37 }
 0x10e   :  { %v2417_v43 = vsel %vm1920_vm4, %v2416_v34, %v5221_v58  ;;  %v1784_v55 = vunpack.c.l.b16 %v1334_v54  ;;  %v1785_v14 = vunpack.c.h.b16 %v1334_v54  ;;  %v1248_v47 = vmul.f32 0.015625, %v974_v33  ;;  %3271 = vmatpush2.bf16.msra.mxu1 %v4097_v2 }
 0x10f   :  { %v5392_v46 = vsel %vm1927_vm5, %v2421_v22, %v2417_v43  ;;  %3272 = vmatprep.subr.bf16.mxu1 %v4105_v13  ;;  %v4117_v43 = vld [vmem:[%s6009_s2 + $0x304] ss:$16 sps:$4 sm:$0xff]  }
 0x110   :  { %v2041_v41 = vrot.slane %v1784_v55, %v5370_v25  ;;  %v2046_v58 = vrot.slane %v1785_v14, %v5373_v35  ;;  %v1349_v60 = vpack.c.bf16 %v1249_v56, %v1248_v47  ;;  %v1079_v48 = vpop.xlane.xlu1 %1078 }
 0x111   :  { %v1076_v50 = vpop.xlane.xlu0 %1075  ;;  %v1283_v52 = vmul.f32 0.015625, %v1079_v48 }
 0x112   :  { %v2042_v51 = vsel %vm1948_vm8, %v2041_v41, %v5243_v4  ;;  %v1282_v53 = vmul.f32 0.015625, %v1076_v50  ;;  %v1814_v63 = vunpack.c.l.b16 %v1349_v60  ;;  %v1815_v0 = vunpack.c.h.b16 %v1349_v60  ;;  %3273 = vmatpush2.bf16.msra.mxu1 %v4103_v15 }
 0x113   :  { %v5402_v62 = vsel %vm1955_vm9, %v2046_v58, %v2042_v51  ;;  %3274 = vmatprep.subr.bf16.mxu1 %v4111_v44  ;;  %v1964_v15 = vadd.s32 4294967208, %v4865_v61 }
 0x114   :  { %v1366_v5 = vpack.c.bf16 %v1283_v52, %v1282_v53  ;;  %v2189_v6 = vrot.slane %v1814_v63, %v5199_v1  ;;  %v2194_v4 = vrot.slane %v1815_v0, %v5204_v42  ;;  %v1169_v16 = vpop.xlane.xlu1 %1168  ;;  %v4126_v53 = vld [vmem:[%s6009_s2 + $0x2ec] ss:$16 sps:$4 sm:$0xff]  }
 0x115   :  { %v1166_v36 = vpop.xlane.xlu0 %1165  ;;  %v1313_v11 = vmul.f32 0.015625, %v1169_v16  ;;  %v5476_v44 = vsub.s32 %v1964_v15, %v4874_v8 }
 0x116   :  { %v1848_v7 = vunpack.c.l.b16 %v1366_v5  ;;  %v1849_v10 = vunpack.c.h.b16 %v1366_v5  ;;  %v1312_v17 = vmul.f32 0.015625, %v1166_v36  ;;  %v2190_v12 = vsel %vm1934_vm6, %v2189_v6, %v5263_v40  ;;  %3275 = vmatpush2.bf16.msra.mxu1 %v4109_v29 }
 0x117   :  { %v5418_v19 = vsel %vm1941_vm7, %v2194_v4, %v2190_v12  ;;  %3276 = vmatprep.subr.bf16.mxu1 %v4117_v43  ;;  %v1957_v12 = vadd.s32 4294967216, %v4865_v61 }
 0x118   :  { %v2357_v20 = vrot.slane %v1848_v7, %v5370_v25  ;;  %v2362_v21 = vrot.slane %v1849_v10, %v5373_v35  ;;  %v1381_v23 = vpack.c.bf16 %v1313_v11, %v1312_v17  ;;  %v839_v24 = vpop.xlane.xlu1 %838 }
 0x119   :  { %v836_v26 = vpop.xlane.xlu0 %835  ;;  %v1203_v49 = vmul.f32 0.015625, %v839_v24 }
 0x11a   :  { %v2358_v27 = vsel %vm1948_vm8, %v2357_v20, %v5284_v3  ;;  %v1878_v40 = vunpack.c.l.b16 %v1381_v23  ;;  %v1879_v28 = vunpack.c.h.b16 %v1381_v23  ;;  %v1202_v31 = vmul.f32 0.015625, %v836_v26  ;;  %3277 = vmatpush2.bf16.msra.mxu1 %v4115_v18 }
 0x11b   :  { %v5428_v45 = vsel %vm1955_vm9, %v2362_v21, %v2358_v27  ;;  %3328 = vmatprep.subr.bf16.mxu1 %v4126_v53 }
 0x11c   :  { %v2505_v34 = vrot.slane %v1878_v40, %v5199_v1  ;;  %v2510_v22 = vrot.slane %v1879_v28, %v5204_v42  ;;  %v1326_v3 = vpack.c.bf16 %v1203_v49, %v1202_v31  ;;  %v929_v54 = vpop.xlane.xlu1 %928  ;;  %v5473_v49 = vsub.s32 %v1957_v12, %v4874_v8 }
 0x11d   :  { %v926_v37 = vpop.xlane.xlu0 %925  ;;  %v1233_v38 = vmul.f32 0.015625, %v929_v54 }
 0x11e   :  { %v2506_v33 = vsel %vm1934_vm6, %v2505_v34, %v5306_v30  ;;  %v1232_v39 = vmul.f32 0.015625, %v926_v37  ;;  %v1768_v14 = vunpack.c.l.b16 %v1326_v3  ;;  %v1769_v56 = vunpack.c.h.b16 %v1326_v3 }
 0x11f   :  { %v5441_v55 = vsel %vm1941_vm7, %v2510_v22, %v2506_v33 }
 0x120   :  { %v1341_v47 = vpack.c.bf16 %v1233_v38, %v1232_v39  ;;  %v1947_v41 = vrot.slane %v1768_v14, %v5370_v25  ;;  %v1954_v30 = vrot.slane %v1769_v56, %v5373_v35  ;;  %v1031_v58 = vpop.xlane.xlu1 %1030 }
 0x121   :  { %v1028_v60 = vpop.xlane.xlu0 %1027  ;;  %v1267_v51 = vmul.f32 0.015625, %v1031_v58 }
 0x122   :  { %v1798_v48 = vunpack.c.l.b16 %v1341_v47  ;;  %v1799_v50 = vunpack.c.h.b16 %v1341_v47  ;;  %v1266_v52 = vmul.f32 0.015625, %v1028_v60  ;;  %v1949_v57 = vsel %vm1948_vm8, %v1947_v41, %v5326_v59 }
 0x123   :  { %v5454_v63 = vsel %vm1955_vm9, %v1954_v30, %v1949_v57 }
 0x124   :  { %v2110_v0 = vrot.slane %v1798_v48, %v5199_v1  ;;  %v2115_v2 = vrot.slane %v1799_v50, %v5204_v42  ;;  %v1358_v5 = vpack.c.bf16 %v1267_v51, %v1266_v52  ;;  %v1121_v6 = vpop.xlane.xlu1 %1120 }
 0x125   :  { %v1118_v4 = vpop.xlane.xlu0 %1117  ;;  %v1297_v10 = vmul.f32 0.015625, %v1121_v6 }
 0x126   :  { %v2111_v16 = vsel %vm1934_vm6, %v2110_v0, %v5348_v9  ;;  %v1832_v36 = vunpack.c.l.b16 %v1358_v5  ;;  %v1833_v7 = vunpack.c.h.b16 %v1358_v5  ;;  %v1296_v59 = vmul.f32 0.015625, %v1118_v4 }
 0x127   :  { %v5461_v11 = vsel %vm1941_vm7, %v2115_v2, %v2111_v16 }
 0x128   :  { %v2278_v17 = vrot.slane %v1832_v36, %v5370_v25  ;;  %v2283_v13 = vrot.slane %v1833_v7, %v5373_v35  ;;  %v1373_v20 = vpack.c.bf16 %v1297_v10, %v1296_v59  ;;  %v893_v21 = vpop.xlane.xlu1 %892 }
 0x129   :  { %v890_v23 = vpop.xlane.xlu0 %889  ;;  %v1221_v24 = vmul.f32 0.015625, %v893_v21 }
 0x12a   :  { %v2279_v9 = vsel %vm1948_vm8, %v2278_v17, %v5376_v32  ;;  %v1220_v26 = vmul.f32 0.015625, %v890_v23  ;;  %v1862_v40 = vunpack.c.l.b16 %v1373_v20  ;;  %v1863_v28 = vunpack.c.h.b16 %v1373_v20 }
 0x12b   :  { %v5470_v27 = vsel %vm1955_vm9, %v2283_v13, %v2279_v9 }
 0x12c   :  { %v1335_v31 = vpack.c.bf16 %v1221_v24, %v1220_v26  ;;  %v2426_v29 = vrot.slane %v1862_v40, %v5199_v1  ;;  %v2431_v34 = vrot.slane %v1863_v28, %v5204_v42  ;;  %v983_v22 = vpop.xlane.xlu1 %982 }
 0x12d   :  { %v1251_v54 = vmul.f32 0.015625, %v983_v22  ;;  %v980_v37 = vpop.xlane.xlu0 %979 }
 0x12e   :  { %v1786_v32 = vunpack.c.l.b16 %v1335_v31  ;;  %v1787_v3 = vunpack.c.h.b16 %v1335_v31  ;;  %v2427_v33 = vsel %vm1934_vm6, %v2426_v29, %v5392_v46  ;;  %v1250_v38 = vmul.f32 0.015625, %v980_v37 }
 0x12f   :  { %v5483_v39 = vsel %vm1941_vm7, %v2431_v34, %v2427_v33 }
 0x130   :  { %v2051_v43 = vrot.slane %v1786_v32, %v5473_v49  ;;  %v2056_v1 = vrot.slane %v1787_v3, %v5476_v44  ;;  %v1350_v14 = vpack.c.bf16 %v1251_v54, %v1250_v38  ;;  %v5487_v42 = vpop.xlane.xlu1 %1084 }
 0x131   :  { %v5491_v18 = vpop.xlane.xlu0 %1081 }
 0x132   :  { %v2052_v56 = vsel %vm1962_vm10, %v2051_v43, %v5402_v62  ;;  %v1816_v47 = vunpack.c.l.b16 %v1350_v14  ;;  %v1817_v41 = vunpack.c.h.b16 %v1350_v14 }
 0x133   :  { %v5494_v46 = vsel %vm1969_vm11, %v2056_v1, %v2052_v56 }
 0x134   :  { %v2199_v30 = vrot.slane %v1816_v47, %v5370_v25  ;;  %v2204_v58 = vrot.slane %v1817_v41, %v5373_v35  ;;  %v1175_v60 = vpop.xlane.xlu1 %1174 }
 0x135   :  { %v1315_v48 = vmul.f32 0.015625, %v1175_v60  ;;  %v1172_v50 = vpop.xlane.xlu0 %1171 }
 0x136   :  { %v2200_v51 = vsel %vm1948_vm8, %v2199_v30, %v5418_v19  ;;  %v1314_v52 = vmul.f32 0.015625, %v1172_v50 }
 0x137   :  { %v5501_v62 = vsel %vm1955_vm9, %v2204_v58, %v2200_v51 }
 0x138   :  { %v1382_v53 = vpack.c.bf16 %v1315_v48, %v1314_v52  ;;  %v845_v57 = vpop.xlane.xlu1 %844 }
 0x139   :  { %v1205_v0 = vmul.f32 0.015625, %v845_v57  ;;  %v842_v2 = vpop.xlane.xlu0 %841 }
 0x13a   :  { %v1880_v5 = vunpack.c.l.b16 %v1382_v53  ;;  %v1881_v6 = vunpack.c.h.b16 %v1382_v53  ;;  %v1204_v4 = vmul.f32 0.015625, %v842_v2 }
 0x13c   :  { %v2515_v16 = vrot.slane %v1880_v5, %v5370_v25  ;;  %v2520_v36 = vrot.slane %v1881_v6, %v5373_v35  ;;  %v1327_v7 = vpack.c.bf16 %v1205_v0, %v1204_v4  ;;  %v935_v10 = vpop.xlane.xlu1 %934 }
 0x13d   :  { %v1235_v59 = vmul.f32 0.015625, %v935_v10  ;;  %v932_v17 = vpop.xlane.xlu0 %931  ;;  %v1971_v10 = vadd.s32 4294967200, %v4865_v61 }
 0x13e   :  { %v2516_v19 = vsel %vm1948_vm8, %v2515_v16, %v5441_v55  ;;  %v1770_v13 = vunpack.c.l.b16 %v1327_v7  ;;  %v1771_v12 = vunpack.c.h.b16 %v1327_v7  ;;  %v1234_v15 = vmul.f32 0.015625, %v932_v17 }
 0x13f   :  { %v5508_v20 = vsel %vm1955_vm9, %v2520_v36, %v2516_v19  ;;  %v1978_v17 = vadd.s32 4294967192, %v4865_v61 }
 0x140   :  { %v1961_v21 = vrot.slane %v1770_v13, %v5473_v49  ;;  %v1968_v23 = vrot.slane %v1771_v12, %v5476_v44  ;;  %v1342_v9 = vpack.c.bf16 %v1235_v59, %v1234_v15  ;;  %v1037_v24 = vpop.xlane.xlu1 %1036 }
 0x141   :  { %v1034_v26 = vpop.xlane.xlu0 %1033  ;;  %v1269_v19 = vmul.f32 0.015625, %v1037_v24  ;;  %v5556_v24 = vsub.s32 %v1978_v17, %v4874_v8 }
 0x142   :  { %v1963_v40 = vsel %vm1962_vm10, %v1961_v21, %v5454_v63  ;;  %v1800_v28 = vunpack.c.l.b16 %v1342_v9  ;;  %v1801_v31 = vunpack.c.h.b16 %v1342_v9  ;;  %v5548_v21 = vsub.s32 %v1971_v10, %v4874_v8 }
 0x143   :  { %v5515_v55 = vsel %vm1969_vm11, %v1968_v23, %v1963_v40 }
 0x144   :  { %v2120_v29 = vrot.slane %v1800_v28, %v5370_v25  ;;  %v2125_v34 = vrot.slane %v1801_v31, %v5373_v35  ;;  %v1127_v22 = vpop.xlane.xlu1 %1126  ;;  %v1985_v28 = vadd.s32 4294967184, %v4865_v61  ;;  %v1992_v31 = vadd.s32 4294967176, %v4865_v61 }
 0x145   :  { %v1299_v32 = vmul.f32 0.015625, %v1127_v22  ;;  %v1124_v3 = vpop.xlane.xlu0 %1123 }
 0x146   :  { %v2121_v54 = vsel %vm1948_vm8, %v2120_v29, %v5461_v11  ;;  %v1298_v37 = vmul.f32 0.015625, %v1124_v3 }
 0x147   :  { %v5522_v33 = vsel %vm1955_vm9, %v2125_v34, %v2121_v54 }
 0x148   :  { %v1374_v63 = vpack.c.bf16 %v1299_v32, %v1298_v37  ;;  %v899_v38 = vpop.xlane.xlu1 %898 }
 0x149   :  { %v896_v43 = vpop.xlane.xlu0 %895  ;;  %v1223_v6 = vmul.f32 0.015625, %v899_v38 }
 0x14a   :  { %v1864_v1 = vunpack.c.l.b16 %v1374_v63  ;;  %v1865_v14 = vunpack.c.h.b16 %v1374_v63  ;;  %v1222_v4 = vmul.f32 0.015625, %v896_v43 }
 0x14c   :  { %v2436_v56 = vrot.slane %v1864_v1, %v5370_v25  ;;  %v2441_v47 = vrot.slane %v1865_v14, %v5373_v35  ;;  %v989_v41 = vpop.xlane.xlu1 %988  ;;  %v1285_v25 = vmul.f32 0.015625, %v5487_v42  ;;  %v1284_v35 = vmul.f32 0.015625, %v5491_v18 }
 0x14d   :  { %v986_v30 = vpop.xlane.xlu0 %985  ;;  %v1268_v18 = vmul.f32 0.015625, %v1034_v26  ;;  %v1336_v13 = vpack.c.bf16 %v1223_v6, %v1222_v4  ;;  %v1253_v32 = vmul.f32 0.015625, %v989_v41  ;;  %v5564_v14 = vsub.s32 %v1985_v28, %v4874_v8 }
 0x14e   :  { %v2437_v58 = vsel %vm1948_vm8, %v2436_v56, %v5483_v39  ;;  %v1367_v5 = vpack.c.bf16 %v1285_v25, %v1284_v35  ;;  %v1252_v3 = vmul.f32 0.015625, %v986_v30  ;;  %v5567_v56 = vsub.s32 %v1992_v31, %v4874_v8 }
 0x14f   :  { %v5529_v11 = vsel %vm1955_vm9, %v2441_v47, %v2437_v58  ;;  %v5553_v22 = vpack.c.bf16 %v1269_v19, %v1268_v18  ;;  %v1788_v26 = vunpack.c.l.b16 %v1336_v13  ;;  %v1789_v30 = vunpack.c.h.b16 %v1336_v13 }
 0x150   :  { %v1091_v60 = vpop.xlane.xlu1 %1090  ;;  %v1850_v42 = vunpack.c.l.b16 %v1367_v5  ;;  %v1851_v40 = vunpack.c.h.b16 %v1367_v5 }
 0x151   :  { %v1088_v48 = vpop.xlane.xlu0 %1087  ;;  %v1287_v16 = vmul.f32 0.015625, %v1091_v60  ;;  %v1834_v41 = vunpack.c.l.b16 %v5553_v22  ;;  %v2061_v58 = vrot.slane %v1788_v26, %v5548_v21  ;;  %v1351_v60 = vpack.c.bf16 %v1253_v32, %v1252_v3 }
 0x152   :  { %v1286_v36 = vmul.f32 0.015625, %v1088_v48  ;;  %v2367_v34 = vrot.slane %v1850_v42, %v5473_v49  ;;  %v2372_v1 = vrot.slane %v1851_v40, %v5476_v44  ;;  %v2066_v19 = vrot.slane %v1789_v30, %v5556_v24 }
 0x153   :  { %v2288_v17 = vrot.slane %v1834_v41, %v5473_v49  ;;  %v2062_v42 = vsel %vm1976_vm12, %v2061_v58, %v5494_v46  ;;  %v1818_v13 = vunpack.c.l.b16 %v1351_v60 }
 0x154   :  { %v1181_v50 = vpop.xlane.xlu1 %1180  ;;  %v1368_v12 = vpack.c.bf16 %v1287_v16, %v1286_v36  ;;  %v2368_v47 = vsel %vm1962_vm10, %v2367_v34, %v5428_v45  ;;  %v1835_v45 = vunpack.c.h.b16 %v5553_v22 }
 0x155   :  { %v1178_v51 = vpop.xlane.xlu0 %1177  ;;  %v1317_v38 = vmul.f32 0.015625, %v1181_v50  ;;  %v2373_v36 = vsel %vm1969_vm11, %v2372_v1, %v2368_v47 }
 0x156   :  { %v1852_v54 = vunpack.c.l.b16 %v1368_v12  ;;  %v1316_v43 = vmul.f32 0.015625, %v1178_v51  ;;  %v1853_v48 = vunpack.c.h.b16 %v1368_v12  ;;  %v1819_v12 = vunpack.c.h.b16 %v1351_v60 }
 0x158   :  { %v851_v52 = vpop.xlane.xlu1 %850  ;;  %v2377_v50 = vrot.slane %v1852_v54, %v5548_v21  ;;  %v1383_v35 = vpack.c.bf16 %v1317_v38, %v1316_v43  ;;  %v2067_v54 = vsel %vm1983_vm13, %v2066_v19, %v2062_v42 }
 0x159   :  { %v848_v53 = vpop.xlane.xlu0 %847  ;;  %v1207_v5 = vmul.f32 0.015625, %v851_v52 }
 0x15a   :  { %v1206_v6 = vmul.f32 0.015625, %v848_v53  ;;  %v1882_v40 = vunpack.c.l.b16 %v1383_v35 }
 0x15c   :  { %v5531_v57 = vpop.xlane.xlu1 %940  ;;  %v1328_v28 = vpack.c.bf16 %v1207_v5, %v1206_v6  ;;  %v2525_v47 = vrot.slane %v1882_v40, %v5473_v49 }
 0x15d   :  { %v5533_v0 = vpop.xlane.xlu0 %937  ;;  %v1237_v26 = vmul.f32 0.015625, %v5531_v57 }
 0x15e   :  { %v1236_v32 = vmul.f32 0.015625, %v5533_v0  ;;  %v1772_v30 = vunpack.c.l.b16 %v1328_v28 }
 0x160   :  { %v5537_v2 = vpop.xlane.xlu1 %1042 }
 0x161   :  { %v5539_v39 = vpop.xlane.xlu0 %1039 }
 0x162   :  { %v1270_v46 = vmul.f32 0.015625, %v5539_v39  ;;  %v1883_v39 = vunpack.c.h.b16 %v1383_v35 }
 0x164   :  { %v5541_v7 = vpop.xlane.xlu1 %1132 }
 0x165   :  { %v5544_v59 = vpop.xlane.xlu0 %1129 }
 0x168   :  { %v905_v15 = vpop.xlane.xlu1 %904 }
 0x169   :  { %v1225_v23 = vmul.f32 0.015625, %v905_v15  ;;  %v902_v9 = vpop.xlane.xlu0 %901 }
 0x16a   :  { %v1224_v29 = vmul.f32 0.015625, %v902_v9  ;;  %v2382_v9 = vrot.slane %v1853_v48, %v5556_v24 }
 0x16c   :  { %v1337_v37 = vpack.c.bf16 %v1225_v23, %v1224_v29  ;;  %v5558_v63 = vpop.xlane.xlu1 %994  ;;  %v2378_v23 = vsel %vm1976_vm12, %v2377_v50, %v2373_v36  ;;  %v1271_v29 = vmul.f32 0.015625, %v5537_v2  ;;  %v1773_v50 = vunpack.c.h.b16 %v1328_v28 }
 0x16d   :  { %v5560_v61 = vpop.xlane.xlu0 %991  ;;  %v2383_v0 = vsel %vm1983_vm13, %v2382_v9, %v2378_v23  ;;  %v2293_v36 = vrot.slane %v1835_v45, %v5476_v44  ;;  %v2526_v23 = vsel %vm1962_vm10, %v2525_v47, %v5508_v20  ;;  %v1301_v45 = vmul.f32 0.015625, %v5541_v7 }
 0x16e   :  { %v1790_v51 = vunpack.c.l.b16 %v1337_v37  ;;  %v1791_v18 = vunpack.c.h.b16 %v1337_v37  ;;  %v2209_v37 = vrot.slane %v1818_v13, %v5473_v49  ;;  %v1360_v58 = vpack.c.bf16 %v1271_v29, %v1270_v46 }
 0x16f   :  { %v2530_v13 = vrot.slane %v1883_v39, %v5476_v44  ;;  %v1255_v9 = vmul.f32 0.015625, %v5558_v63  ;;  %v1300_v29 = vmul.f32 0.015625, %v5544_v59 }
 0x170   :  { %v1097_v25 = vpop.xlane.xlu1 %1096  ;;  %v2071_v52 = vrot.slane %v1790_v51, %v5564_v14  ;;  %v2076_v3 = vrot.slane %v1791_v18, %v5567_v56  ;;  %v1343_v51 = vpack.c.bf16 %v1237_v26, %v1236_v32  ;;  %v2210_v18 = vsel %vm1962_vm10, %v2209_v37, %v5501_v62 }
 0x171   :  { %v1289_v4 = vmul.f32 0.015625, %v1097_v25  ;;  %v1094_v16 = vpop.xlane.xlu0 %1093  ;;  %v1254_v62 = vmul.f32 0.015625, %v5560_v61  ;;  %v5624_v59 = vsel %vm1969_vm11, %v2530_v13, %v2526_v23 }
 0x172   :  { %v1288_v10 = vmul.f32 0.015625, %v1094_v16  ;;  %v2072_v2 = vsel %vm1990_vm14, %v2071_v52, %v2067_v54  ;;  %v2289_v16 = vsel %vm1962_vm10, %v2288_v17, %v5470_v27  ;;  %v1975_v52 = vrot.slane %v1772_v30, %v5548_v21 }
 0x173   :  { %v2077_v25 = vsel %vm1997_vm15, %v2076_v3, %v2072_v2  ;;  %v1982_v27 = vrot.slane %v1773_v50, %v5556_v24  ;;  %v1802_v17 = vunpack.c.l.b16 %v1343_v51  ;;  %v1803_v32 = vunpack.c.h.b16 %v1343_v51 }
 0x174   :  { %v1369_v53 = vpack.c.bf16 %v1289_v4, %v1288_v10  ;;  %v1187_v15 = vpop.xlane.xlu1 %1186  ;;  %v2214_v10 = vrot.slane %v1819_v12, %v5476_v44  ;;  %v1837_v12 = vunpack.c.h.b16 %v1360_v58  ;;  %v1977_v26 = vsel %vm1976_vm12, %v1975_v52, %v5515_v55 }
 0x175   :  { %v1184_v31 = vpop.xlane.xlu0 %1183  ;;  %v1319_v46 = vmul.f32 0.015625, %v1187_v15  ;;  %v2294_v54 = vsel %vm1969_vm11, %v2293_v36, %v2289_v16  ;;  %v2130_v61 = vrot.slane %v1802_v17, %v5473_v49  ;;  %v1352_v15 = vpack.c.bf16 %v1255_v9, %v1254_v62 }
 0x176   :  { %v1854_v34 = vunpack.c.l.b16 %v1369_v53  ;;  %v1855_v22 = vunpack.c.h.b16 %v1369_v53  ;;  %v1836_v53 = vunpack.c.l.b16 %v1360_v58  ;;  %v2215_v63 = vsel %vm1969_vm11, %v2214_v10, %v2210_v18 }
 0x177   :  { %v1984_v55 = vsel %vm1983_vm13, %v1982_v27, %v1977_v26  ;;  %v1375_v2 = vpack.c.bf16 %v1301_v45, %v1300_v29  ;;  %v2131_v58 = vsel %vm1962_vm10, %v2130_v61, %v5522_v33  ;;  %v1820_v51 = vunpack.c.l.b16 %v1352_v15  ;;  %v4102_v26 = vld [vmem:[%s6009_s2 + $0xcc] ss:$16 sps:$4 sm:$0xff]  }
 0x178   :  { %v2387_v38 = vrot.slane %v1854_v34, %v5564_v14  ;;  %v2392_v43 = vrot.slane %v1855_v22, %v5567_v56  ;;  %v857_v1 = vpop.xlane.xlu1 %856  ;;  %v1318_v34 = vmul.f32 0.015625, %v1184_v31  ;;  %v2298_v7 = vrot.slane %v1836_v53, %v5548_v21 }
 0x179   :  { %v1209_v41 = vmul.f32 0.015625, %v857_v1  ;;  %v854_v57 = vpop.xlane.xlu0 %853  ;;  %v2303_v1 = vrot.slane %v1837_v12, %v5556_v24  ;;  %v1866_v36 = vunpack.c.l.b16 %v1375_v2  ;;  %v1867_v45 = vunpack.c.h.b16 %v1375_v2 }
 0x17a   :  { %v1208_v60 = vmul.f32 0.015625, %v854_v57  ;;  %v2388_v48 = vsel %vm1990_vm14, %v2387_v38, %v2383_v0  ;;  %v1384_v39 = vpack.c.bf16 %v1319_v46, %v1318_v34  ;;  %v2299_v57 = vsel %vm1976_vm12, %v2298_v7, %v2294_v54 }
 0x17b   :  { %v2393_v5 = vsel %vm1997_vm15, %v2392_v43, %v2388_v48  ;;  %v2304_v16 = vsel %vm1983_vm13, %v2303_v1, %v2299_v57  ;;  %v2219_v12 = vrot.slane %v1820_v51, %v5548_v21  ;;  %v2446_v61 = vrot.slane %v1866_v36, %v5473_v49  ;;  %v4100_v49 = vld [vmem:[%s6009_s2 + $0xc8] ss:$16 sps:$4 sm:$0xff]  }
 0x17c   :  { %v1329_v6 = vpack.c.bf16 %v1209_v41, %v1208_v60  ;;  %v947_v4 = vpop.xlane.xlu1 %946  ;;  %v2554_v35 = vsel %vm2552_vm0, %v2393_v5, %v2077_v25  ;;  %v2135_v41 = vrot.slane %v1803_v32, %v5476_v44  ;;  %v1884_v10 = vunpack.c.l.b16 %v1384_v39 }
 0x17d   :  { %v944_v42 = vpop.xlane.xlu0 %943  ;;  %v5603_v19 = vpack.c.b16 %v2554_v35, %v2554_v35  ;;  %v1239_v48 = vmul.f32 0.015625, %v947_v4  ;;  %v1885_v29 = vunpack.c.h.b16 %v1384_v39  ;;  %v2451_v39 = vrot.slane %v1867_v45, %v5476_v44 }
 0x17e   :  { %v1774_v40 = vunpack.c.l.b16 %v1329_v6  ;;  %v1775_v37 = vunpack.c.h.b16 %v1329_v6  ;;  %v1238_v50 = vmul.f32 0.015625, %v944_v42  ;;  %v1821_v42 = vunpack.c.h.b16 %v1352_v15 }
 0x17f   :  { %3237 = vmatprep.mubr.bf16.mxu0 %v5603_v19  ;;  %v2535_v46 = vrot.slane %v1884_v10, %v5548_v21  ;;  %v2136_v32 = vsel %vm1969_vm11, %v2135_v41, %v2131_v58 }
 0x180   :  { %v1049_v28 = vpop.xlane.xlu1 %1048  ;;  %v1989_v31 = vrot.slane %v1774_v40, %v5564_v14  ;;  %v1996_v60 = vrot.slane %v1775_v37, %v5567_v56  ;;  %v5639_v23 = vpack.c.bf16 %v1239_v48, %v1238_v50  ;;  %v4094_v40 = vld [vmem:[%s6009_s2 + $0xe8] ss:$16 sps:$4 sm:$0xff]   ;;  %v2224_v37 = vrot.slane %v1821_v42, %v5556_v24 }
 0x181   :  { %v1273_v22 = vmul.f32 0.015625, %v1049_v28  ;;  %v1046_v20 = vpop.xlane.xlu0 %1045 }
 0x182   :  { %v1272_v3 = vmul.f32 0.015625, %v1046_v20  ;;  %v1991_v25 = vsel %vm1990_vm14, %v1989_v31, %v1984_v55  ;;  %v1804_v15 = vunpack.c.l.b16 %v5639_v23  ;;  %v1805_v44 = vunpack.c.h.b16 %v5639_v23 }
 0x183   :  { %v1998_v27 = vsel %vm1997_vm15, %v1996_v60, %v1991_v25 }
 0x184   :  { %v1361_v38 = vpack.c.bf16 %v1273_v22, %v1272_v3  ;;  %v1139_v43 = vpop.xlane.xlu1 %1138 }
 0x185   :  { %v1136_v47 = vpop.xlane.xlu0 %1135  ;;  %v1303_v52 = vmul.f32 0.015625, %v1139_v43 }
 0x186   :  { %v1838_v0 = vunpack.c.l.b16 %v1361_v38  ;;  %v1839_v30 = vunpack.c.h.b16 %v1361_v38  ;;  %v1302_v53 = vmul.f32 0.015625, %v1136_v47  ;;  %v2220_v38 = vsel %vm1976_vm12, %v2219_v12, %v2215_v63 }
 0x187   :  { %v2536_v47 = vsel %vm1976_vm12, %v2535_v46, %v5624_v59  ;;  %v2540_v63 = vrot.slane %v1885_v29, %v5556_v24  ;;  %v2140_v59 = vrot.slane %v1804_v15, %v5548_v21  ;;  %v2225_v51 = vsel %vm1983_vm13, %v2224_v37, %v2220_v38  ;;  %v4118_v38 = vld [vmem:[%s6009_s2 + $0x68] ss:$16 sps:$4 sm:$0xff]  }
 0x188   :  { %v2308_v5 = vrot.slane %v1838_v0, %v5564_v14  ;;  %v2313_v6 = vrot.slane %v1839_v30, %v5567_v56  ;;  %v1001_v35 = vpop.xlane.xlu1 %1000  ;;  %v5655_v7 = vpack.c.bf16 %v1303_v52, %v1302_v53  ;;  %v5667_v2 = vpop.f32.mrf.mxu0  ;;  %v4114_v53 = vld [vmem:[%s6009_s2 + $0x8c] ss:$16 sps:$4 sm:$0xff]  }
 0x189   :  { %v1257_v18 = vmul.f32 0.015625, %v1001_v35  ;;  %v998_v13 = vpop.xlane.xlu0 %997 }
 0x18a   :  { %v2309_v33 = vsel %vm1990_vm14, %v2308_v5, %v2304_v16  ;;  %v1256_v4 = vmul.f32 0.015625, %v998_v13  ;;  %v1868_v0 = vunpack.c.l.b16 %v5655_v7  ;;  %v5677_v48 = vpop.f32.mrf.mxu0  ;;  %v4106_v16 = vld [vmem:[%s6009_s2 + $0xa8] ss:$16 sps:$4 sm:$0xff]   ;;  %v1869_v13 = vunpack.c.h.b16 %v5655_v7 }
 0x18b   :  { %v2314_v17 = vsel %vm1997_vm15, %v2313_v6, %v2309_v33 }
 0x18c   :  { %v1353_v9 = vpack.c.bf16 %v1257_v18, %v1256_v4  ;;  %v1193_v62 = vpop.xlane.xlu1 %1192  ;;  %v2553_v28 = vsel %vm2552_vm0, %v2314_v17, %v1998_v27  ;;  %v1652_v10 = vpop.f32.mrf.mxu0  ;;  %v2447_v18 = vsel %vm1962_vm10, %v2446_v61, %v5529_v11  ;;  %v2541_v4 = vsel %vm1983_vm13, %v2540_v63, %v2536_v47  ;;  %v4121_v47 = vld [vmem:[%s6009_s2 + $0x48] ss:$16 sps:$4 sm:$0xff]  }
 0x18d   :  { %v1321_v34 = vmul.f32 0.015625, %v1193_v62  ;;  %v1190_v22 = vpop.xlane.xlu0 %1189  ;;  %v5649_v20 = vpack.c.b16 %v2553_v28, %v2553_v28  ;;  %v2456_v42 = vrot.slane %v1868_v0, %v5548_v21  ;;  %v2145_v11 = vrot.slane %v1805_v44, %v5556_v24  ;;  %v4112_v21 = vld [vmem:[%s6009_s2 + $0x88] ss:$16 sps:$4 sm:$0xff]   ;;  %v4150_v10 = vld [vmem:[%s6009_s2 + $0x26c] ss:$16 sps:$4 sm:$0xff]  }
 0x18e   :  { %v1822_v3 = vunpack.c.l.b16 %v1353_v9  ;;  %v1320_v54 = vmul.f32 0.015625, %v1190_v22  ;;  %v1823_v31 = vunpack.c.h.b16 %v1353_v9  ;;  %v1653_v45 = vpop.f32.mrf.mxu0  ;;  %v2461_v22 = vrot.slane %v1869_v13, %v5556_v24  ;;  %v4124_v63 = vld [vmem:[%s6009_s2 + $0x2e8] ss:$16 sps:$4 sm:$0xff]  }
 0x18f   :  { %3238 = vmatmul.mubr.bf16.vlgmr.msra.gmra.mxu0 %v5649_v20  ;;  %v4130_v44 = vld [vmem:[%s6009_s2 + $0x2c8] ss:$16 sps:$4 sm:$0xff]   ;;  %v4165_v45 = vld [vmem:[%s6009_s2 + $0x16c] ss:$16 sps:$4 sm:$0xff]  }
 0x190   :  { %v2229_v43 = vrot.slane %v1822_v3, %v5564_v14  ;;  %v1385_v55 = vpack.c.bf16 %v1321_v34, %v1320_v54  ;;  %3288 = vmatpush1.bf16.msra.mxu0 %v4094_v40  ;;  %3319 = vmatprep.mubr.bf16.mxu0 %v5603_v19  ;;  %v953_v1 = vpop.xlane.xlu1 %952  ;;  %v4108_v19 = vld [vmem:[%s6009_s2 + $0xac] ss:$16 sps:$4 sm:$0xff]   ;;  %v2234_v50 = vrot.slane %v1823_v31, %v5567_v56  ;;  %v4148_v13 = vld [vmem:[%s6009_s2 + $0x268] ss:$16 sps:$4 sm:$0xff]  }
 0x191   :  { %v1241_v41 = vmul.f32 0.015625, %v953_v1  ;;  %v950_v57 = vpop.xlane.xlu0 %949  ;;  %3289 = vmatprep.subr.bf16.mxu0 %v4102_v26  ;;  %v2141_v40 = vsel %vm1976_vm12, %v2140_v59, %v2136_v32  ;;  %v2452_v34 = vsel %vm1969_vm11, %v2451_v39, %v2447_v18  ;;  %v4120_v32 = vld [vmem:[%s6009_s2 + $0x6c] ss:$16 sps:$4 sm:$0xff]   ;;  %v4145_v18 = vld [vmem:[%s6009_s2 + $0x1c8] ss:$16 sps:$4 sm:$0xff]  }
 0x192   :  { %v1886_v30 = vunpack.c.l.b16 %v1385_v55  ;;  %v1887_v58 = vunpack.c.h.b16 %v1385_v55  ;;  %v1240_v60 = vmul.f32 0.015625, %v950_v57  ;;  %v2230_v36 = vsel %vm1990_vm14, %v2229_v43, %v2225_v51  ;;  %v4123_v55 = vld [vmem:[%s6009_s2 + $0x4c] ss:$16 sps:$4 sm:$0xff]   ;;  %v4133_v51 = vld [vmem:[%s6009_s2 + $0x8] ss:$16 sps:$4 sm:$0xff]  }
 0x193   :  { %v2235_v9 = vsel %vm1997_vm15, %v2234_v50, %v2230_v36  ;;  %v2457_v7 = vsel %vm1976_vm12, %v2456_v42, %v2452_v34  ;;  %v2146_v61 = vsel %vm1983_vm13, %v2145_v11, %v2141_v40  ;;  %v4135_v59 = vld [vmem:[%s6009_s2 + $0xc] ss:$16 sps:$4 sm:$0xff]   ;;  %v4175_v34 = vld [vmem:[%s6009_s2 + $0x128] ss:$16 sps:$4 sm:$0xff]  }
 0x194   :  { %v2545_v25 = vrot.slane %v1886_v30, %v5564_v14  ;;  %v2550_v5 = vrot.slane %v1887_v58, %v5567_v56  ;;  %v1345_v6 = vpack.c.bf16 %v1241_v41, %v1240_v60  ;;  %3290 = vmatpush1.bf16.msra.mxu0 %v4100_v49  ;;  %v1145_v35 = vpop.xlane.xlu1 %1144  ;;  %v2462_v43 = vsel %vm1983_vm13, %v2461_v22, %v2457_v7  ;;  %v4132_v30 = vld [vmem:[%s6009_s2 + $0x2cc] ss:$16 sps:$4 sm:$0xff]   ;;  %v4127_v60 = vld [vmem:[%s6009_s2 + $0x28] ss:$16 sps:$4 sm:$0xff]  }
 0x195   :  { %v1305_v33 = vmul.f32 0.015625, %v1145_v35  ;;  %v1142_v52 = vpop.xlane.xlu0 %1141  ;;  %3291 = vmatprep.subr.bf16.mxu0 %v4108_v19  ;;  %v4129_v19 = vld [vmem:[%s6009_s2 + $0x2c] ss:$16 sps:$4 sm:$0xff]   ;;  %v4139_v35 = vld [vmem:[%s6009_s2 + $0x1e8] ss:$16 sps:$4 sm:$0xff]  }
 0x196   :  { %v1806_v23 = vunpack.c.l.b16 %v1345_v6  ;;  %v1304_v27 = vmul.f32 0.015625, %v1142_v52  ;;  %v2546_v17 = vsel %vm1990_vm14, %v2545_v25, %v2541_v4  ;;  %v1807_v12 = vunpack.c.h.b16 %v1345_v6  ;;  %v4138_v50 = vld [vmem:[%s6009_s2 + $0x2ac] ss:$16 sps:$4 sm:$0xff]   ;;  %v4136_v25 = vld [vmem:[%s6009_s2 + $0x2a8] ss:$16 sps:$4 sm:$0xff]  }
 0x197   :  { %v2551_v62 = vsel %vm1997_vm15, %v2550_v5, %v2546_v17  ;;  %v4141_v5 = vld [vmem:[%s6009_s2 + $0x1ec] ss:$16 sps:$4 sm:$0xff]   ;;  %v4154_v4 = vld [vmem:[%s6009_s2 + $0x248] ss:$16 sps:$4 sm:$0xff]  }
 0x198   :  { %v2150_v28 = vrot.slane %v1806_v23, %v5564_v14  ;;  %v1377_v29 = vpack.c.bf16 %v1305_v33, %v1304_v27  ;;  %3292 = vmatpush1.bf16.msra.mxu0 %v4106_v16  ;;  %v2556_v46 = vsel %vm2552_vm0, %v2551_v62, %v2235_v9  ;;  %v2155_v37 = vrot.slane %v1807_v12, %v5567_v56  ;;  %v4144_v6 = vld [vmem:[%s6009_s2 + $0x28c] ss:$16 sps:$4 sm:$0xff]   ;;  %v4142_v16 = vld [vmem:[%s6009_s2 + $0x288] ss:$16 sps:$4 sm:$0xff]  }
 0x199   :  { %3293 = vmatprep.subr.bf16.mxu0 %v4114_v53  ;;  %v2560_v26 = vpack.c.b16 %v2556_v46, %v2556_v46  ;;  %v4147_v36 = vld [vmem:[%s6009_s2 + $0x1cc] ss:$16 sps:$4 sm:$0xff]   ;;  %v4151_v53 = vld [vmem:[%s6009_s2 + $0x1a8] ss:$16 sps:$4 sm:$0xff]  }
 0x19a   :  { %v1870_v3 = vunpack.c.l.b16 %v1377_v29  ;;  %v1871_v54 = vunpack.c.h.b16 %v1377_v29  ;;  %v2151_v15 = vsel %vm1990_vm14, %v2150_v28, %v2146_v61  ;;  %v4153_v33 = vld [vmem:[%s6009_s2 + $0x1ac] ss:$16 sps:$4 sm:$0xff]   ;;  %v4157_v27 = vld [vmem:[%s6009_s2 + $0x188] ss:$16 sps:$4 sm:$0xff]  }
 0x19b   :  { %3278 = vmatprep.mubr.bf16.mxu1 %v2560_v26  ;;  %v5725_v1 = vpop.f32.mrf.mxu1  ;;  %v4156_v52 = vld [vmem:[%s6009_s2 + $0x24c] ss:$16 sps:$4 sm:$0xff]   ;;  %v4160_v17 = vld [vmem:[%s6009_s2 + $0x228] ss:$16 sps:$4 sm:$0xff]  }
 0x19c   :  { %v2466_v31 = vrot.slane %v1870_v3, %v5564_v14  ;;  %v2471_v24 = vrot.slane %v1871_v54, %v5567_v56  ;;  %3294 = vmatpush1.bf16.msra.mxu0 %v4112_v21  ;;  %v2156_v14 = vsel %vm1997_vm15, %v2155_v37, %v2151_v15  ;;  %v4159_v42 = vld [vmem:[%s6009_s2 + $0x18c] ss:$16 sps:$4 sm:$0xff]   ;;  %v4163_v12 = vld [vmem:[%s6009_s2 + $0x168] ss:$16 sps:$4 sm:$0xff]  }
 0x19d   :  { %3295 = vmatprep.subr.bf16.mxu0 %v4120_v32  ;;  %v5730_v39 = vpop.f32.mrf.mxu1  ;;  %v4162_v23 = vld [vmem:[%s6009_s2 + $0x22c] ss:$16 sps:$4 sm:$0xff]   ;;  %v4166_v9 = vld [vmem:[%s6009_s2 + $0x208] ss:$16 sps:$4 sm:$0xff]  }
 0x19e   :  { %v2467_v49 = vsel %vm1990_vm14, %v2466_v31, %v2462_v43  ;;  %v4168_v11 = vld [vmem:[%s6009_s2 + $0x20c] ss:$16 sps:$4 sm:$0xff]   ;;  %v4169_v28 = vld [vmem:[%s6009_s2 + $0x148] ss:$16 sps:$4 sm:$0xff]   ;;  %v4205_v43 = vld [vmem:[%s6012_s5 + $0x30] sm:$0xff]  }
 0x19f   :  { %v2472_v56 = vsel %vm1997_vm15, %v2471_v24, %v2467_v49  ;;  %v1693_v0 = vpop.f32.mrf.mxu1  ;;  %v4171_v62 = vld [vmem:[%s6009_s2 + $0x14c] ss:$16 sps:$4 sm:$0xff]   ;;  %v4172_v29 = vld [vmem:[%s6009_s2 + $0x3e8] ss:$16 sps:$4 sm:$0xff]  }
 0x1a0   :  { %3296 = vmatpush1.bf16.msra.mxu0 %v4118_v38  ;;  %v2555_v41 = vsel %vm2552_vm0, %v2472_v56, %v2156_v14  ;;  %v4174_v40 = vld [vmem:[%s6009_s2 + $0x3ec] ss:$16 sps:$4 sm:$0xff]   ;;  %v4178_v22 = vld [vmem:[%s6009_s2 + $0x3c8] ss:$16 sps:$4 sm:$0xff]  }
 0x1a1   :  { %3297 = vmatprep.subr.bf16.mxu0 %v4123_v55  ;;  %v5739_v57 = vpack.c.b16 %v2555_v41, %v2555_v41  ;;  %v1694_v58 = vpop.f32.mrf.mxu1  ;;  %v4177_v21 = vld [vmem:[%s6009_s2 + $0x12c] ss:$16 sps:$4 sm:$0xff]   ;;  %v4181_v7 = vld [vmem:[%s6009_s2 + $0x108] ss:$16 sps:$4 sm:$0xff]  }
 0x1a2   :  { %v4180_v46 = vld [vmem:[%s6009_s2 + $0x3cc] ss:$16 sps:$4 sm:$0xff]   ;;  %v4184_v3 = vld [vmem:[%s6009_s2 + $0x3a8] ss:$16 sps:$4 sm:$0xff]  }
 0x1a3   :  { %3279 = vmatmul.mubr.bf16.vlgmr.msra.gmra.mxu1 %v5739_v57  ;;  %v4186_v32 = vld [vmem:[%s6009_s2 + $0x3ac] ss:$16 sps:$4 sm:$0xff]   ;;  %v4187_v61 = vld [vmem:[%s6009_s2 + $0x388] ss:$16 sps:$4 sm:$0xff]  }
 0x1a4   :  { %3298 = vmatpush1.bf16.msra.mxu0 %v4121_v47  ;;  %3329 = vmatpush1.bf16.msra.mxu1 %v4124_v63  ;;  %v4189_v54 = vld [vmem:[%s6009_s2 + $0x38c] ss:$16 sps:$4 sm:$0xff]   ;;  %v4190_v24 = vld [vmem:[%s6009_s2 + $0x368] ss:$16 sps:$4 sm:$0xff]   ;;  %v4208_v47 = vld [vmem:[%s6012_s5 + $0x60] sm:$0xff]  }
 0x1a5   :  { %3360 = vmatprep.mubr.bf16.mxu1 %v2560_v26  ;;  %3299 = vmatprep.subr.bf16.mxu0 %v4129_v19  ;;  %v4183_v26 = vld [vmem:[%s6009_s2 + $0x10c] ss:$16 sps:$4 sm:$0xff]   ;;  %v4193_v55 = vld [vmem:[%s6009_s2 + $0x348] ss:$16 sps:$4 sm:$0xff]   ;;  %v4209_v19 = vld [vmem:[%s6012_s5 + $0x20] sm:$0xff]  }
 0x1a6   :  { %3330 = vmatprep.subr.bf16.mxu1 %v4132_v30  ;;  %v4192_v37 = vld [vmem:[%s6009_s2 + $0x36c] ss:$16 sps:$4 sm:$0xff]   ;;  %v4196_v63 = vld [vmem:[%s6009_s2 + $0x328] ss:$16 sps:$4 sm:$0xff]  }
 0x1a7   :  { %v4202_v15 = vld [vmem:[%s6012_s5 + $0x78] sm:$0xff]   ;;  %v4206_v14 = vld [vmem:[%s6012_s5 + $0x68] sm:$0xff]  }
 0x1a8   :  { %3300 = vmatpush1.bf16.msra.mxu0 %v4127_v60  ;;  %3331 = vmatpush1.bf16.msra.mxu1 %v4130_v44  ;;  %v4203_v31 = vld [vmem:[%s6012_s5 + $0x38] sm:$0xff]   ;;  %v4207_v56 = vld [vmem:[%s6012_s5 + $0x28] sm:$0xff]   ;;  %v4212_v60 = vld [vmem:[%s6012_s5 + $0x50] sm:$0xff]  }
 0x1a9   :  { %3301 = vmatprep.subr.bf16.mxu0 %v4135_v59  ;;  %3332 = vmatprep.subr.bf16.mxu1 %v4138_v50  ;;  %v4195_v38 = vld [vmem:[%s6009_s2 + $0x34c] ss:$16 sps:$4 sm:$0xff]   ;;  %v4199_v30 = vld [vmem:[%s6009_s2 + $0x308] ss:$16 sps:$4 sm:$0xff]   ;;  %v4213_v44 = vld [vmem:[%s6012_s5 + $0x10] sm:$0xff]  }
 0x1aa   :  { %v4198_v49 = vld [vmem:[%s6009_s2 + $0x32c] ss:$16 sps:$4 sm:$0xff]  }
 0x1ab   :  { %v4201_v41 = vld [vmem:[%s6009_s2 + $0x30c] ss:$16 sps:$4 sm:$0xff]  }
 0x1ac   :  { %3302 = vmatpush1.bf16.msra.mxu0 %v4133_v51  ;;  %3333 = vmatpush1.bf16.msra.mxu1 %v4136_v25  ;;  %v4210_v0 = vld [vmem:[%s6012_s5 + $0x58] sm:$0xff]   ;;  %v4214_v59 = vld [vmem:[%s6012_s5 + $0x48] sm:$0xff]   ;;  %v4217_v51 = vld [vmem:[%s6012_s5] sm:$0xff]  }
 0x1ad   :  { %3303 = vmatprep.subr.bf16.mxu0 %v4141_v5  ;;  %3334 = vmatprep.subr.bf16.mxu1 %v4144_v6  ;;  %v4211_v58 = vld [vmem:[%s6012_s5 + $0x18] sm:$0xff]   ;;  %v4215_v50 = vld [vmem:[%s6012_s5 + $0x8] sm:$0xff]   ;;  %v4220_v6 = vld [vmem:[%s6012_s5 + $0xf0] sm:$0xff]  }
 0x1ae   :  { %v4218_v25 = vld [vmem:[%s6012_s5 + $0xf8] sm:$0xff]  }
 0x1af   :  { %v4219_v5 = vld [vmem:[%s6012_s5 + $0xb8] sm:$0xff]  }
 0x1b0   :  { %3304 = vmatpush2.bf16.msra.mxu0 %v4139_v35  ;;  %3335 = vmatpush1.bf16.msra.mxu1 %v4142_v16  ;;  %v4221_v35 = vld [vmem:[%s6012_s5 + $0xb0] sm:$0xff]   ;;  %v4222_v16 = vld [vmem:[%s6012_s5 + $0xe8] sm:$0xff]  }
 0x1b1   :  { %3305 = vmatprep.subr.bf16.mxu0 %v4147_v36  ;;  %3336 = vmatprep.subr.bf16.mxu1 %v4150_v10  ;;  %v4223_v36 = vld [vmem:[%s6012_s5 + $0xa8] sm:$0xff]   ;;  %v4224_v10 = vld [vmem:[%s6012_s5 + $0xe0] sm:$0xff]  }
 0x1b4   :  { %3306 = vmatpush2.bf16.msra.mxu0 %v4145_v18  ;;  %3337 = vmatpush1.bf16.msra.mxu1 %v4148_v13  ;;  %v4225_v18 = vld [vmem:[%s6012_s5 + $0xa0] sm:$0xff]   ;;  %v4226_v13 = vld [vmem:[%s6012_s5 + $0xd8] sm:$0xff]  }
 0x1b5   :  { %3307 = vmatprep.subr.bf16.mxu0 %v4153_v33  ;;  %3338 = vmatprep.subr.bf16.mxu1 %v4156_v52  ;;  %v4227_v33 = vld [vmem:[%s6012_s5 + $0x98] sm:$0xff]   ;;  %v4228_v52 = vld [vmem:[%s6012_s5 + $0xd0] sm:$0xff]  }
 0x1b8   :  { %3308 = vmatpush2.bf16.msra.mxu0 %v4151_v53  ;;  %3339 = vmatpush1.bf16.msra.mxu1 %v4154_v4  ;;  %v4229_v53 = vld [vmem:[%s6012_s5 + $0x90] sm:$0xff]   ;;  %v4230_v4 = vld [vmem:[%s6012_s5 + $0xc8] sm:$0xff]  }
 0x1b9   :  { %3309 = vmatprep.subr.bf16.mxu0 %v4159_v42  ;;  %3340 = vmatprep.subr.bf16.mxu1 %v4162_v23  ;;  %v4231_v42 = vld [vmem:[%s6012_s5 + $0x88] sm:$0xff]   ;;  %v4232_v23 = vld [vmem:[%s6012_s5 + $0xc0] sm:$0xff]  }
 0x1bc   :  { %3310 = vmatpush2.bf16.msra.mxu0 %v4157_v27  ;;  %3341 = vmatpush1.bf16.msra.mxu1 %v4160_v17  ;;  %v4233_v27 = vld [vmem:[%s6012_s5 + $0x80] sm:$0xff]  }
 0x1bd   :  { %3311 = vmatprep.subr.bf16.mxu0 %v4165_v45  ;;  %3342 = vmatprep.subr.bf16.mxu1 %v4168_v11 }
 0x1c0   :  { %3312 = vmatpush2.bf16.msra.mxu0 %v4163_v12  ;;  %3343 = vmatpush1.bf16.msra.mxu1 %v4166_v9  ;;  %v3373_v9 = vsub.s32 0, %v4874_v8 }
 0x1c1   :  { %3313 = vmatprep.subr.bf16.mxu0 %v4171_v62  ;;  %3344 = vmatprep.subr.bf16.mxu1 %v4174_v40  ;;  %v3369_v62 = vld [vmem:[%s6011_s4] sm:$0xf]  ;;  %v3377_v40 = vsub.s32 1, %v4874_v8 }
 0x1c4   :  { %3314 = vmatpush2.bf16.msra.mxu0 %v4169_v28  ;;  %3345 = vmatpush2.bf16.msra.mxu1 %v4172_v29  ;;  %v3374_v29 = vrot.slane %v3369_v62, %v3373_v9 }
 0x1c5   :  { %3315 = vmatprep.subr.bf16.mxu0 %v4177_v21  ;;  %3346 = vmatprep.subr.bf16.mxu1 %v4180_v46 }
 0x1c8   :  { %3316 = vmatpush2.bf16.msra.mxu0 %v4175_v34  ;;  %3347 = vmatpush2.bf16.msra.mxu1 %v4178_v22  ;;  %v3378_v22 = vrot.slane %v3369_v62, %v3377_v40 }
 0x1c9   :  { %3317 = vmatprep.subr.bf16.mxu0 %v4183_v26  ;;  %3348 = vmatprep.subr.bf16.mxu1 %v4186_v32 }
 0x1cc   :  { %3318 = vmatpush2.bf16.msra.mxu0 %v4181_v7  ;;  %3349 = vmatpush2.bf16.msra.mxu1 %v4184_v3 }
 0x1cd   :  { %3350 = vmatprep.subr.bf16.mxu1 %v4189_v54  ;;  %3940 = vmatprep.subr.bf16.mxu0 %v4202_v15 }
 0x1cf   :  { %3320 = vmatmul.mubr.bf16.vlgmr.msra.gmra.mxu0 %v5649_v20  ;;  %v4204_v20 = vld [vmem:[%s6012_s5 + $0x70] sm:$0xff]  }
 0x1d0   :  { %3351 = vmatpush2.bf16.msra.mxu1 %v4187_v61  ;;  %3941 = vmatpush3.bf16.msra.mxu0 %v4203_v31 }
 0x1d1   :  { %3352 = vmatprep.subr.bf16.mxu1 %v4192_v37  ;;  %3942 = vmatprep.subr.bf16.mxu0 %v4204_v20 }
 0x1d4   :  { %3353 = vmatpush2.bf16.msra.mxu1 %v4190_v24  ;;  %3943 = vmatpush3.bf16.msra.mxu0 %v4205_v43 }
 0x1d5   :  { %3354 = vmatprep.subr.bf16.mxu1 %v4195_v38  ;;  %3944 = vmatprep.subr.bf16.mxu0 %v4206_v14 }
 0x1d8   :  { %3355 = vmatpush2.bf16.msra.mxu1 %v4193_v55  ;;  %3945 = vmatpush3.bf16.msra.mxu0 %v4207_v56  ;;  %v3385_v55 = vsub.s32 3, %v4874_v8 }
 0x1d9   :  { %3356 = vmatprep.subr.bf16.mxu1 %v4198_v49  ;;  %3946 = vmatprep.subr.bf16.mxu0 %v4208_v47 }
 0x1dc   :  { %3357 = vmatpush2.bf16.msra.mxu1 %v4196_v63  ;;  %3947 = vmatpush3.bf16.msra.mxu0 %v4209_v19 }
 0x1dd   :  { %3358 = vmatprep.subr.bf16.mxu1 %v4201_v41  ;;  %3948 = vmatprep.subr.bf16.mxu0 %v4210_v0  ;;  %v3386_v41 = vrot.slane %v3369_v62, %v3385_v55 }
 0x1e0   :  { %3359 = vmatpush2.bf16.msra.mxu1 %v4199_v30  ;;  %3949 = vmatpush3.bf16.msra.mxu0 %v4211_v58 }
 0x1e1   :  { %3950 = vmatprep.subr.bf16.mxu0 %v4212_v60  ;;  %3962 = vmatprep.subr.bf16.mxu1 %v4218_v25 }
 0x1e3   :  { %3361 = vmatmul.mubr.bf16.vlgmr.msra.gmra.mxu1 %v5739_v57  ;;  %v4216_v57 = vld [vmem:[%s6012_s5 + $0x40] sm:$0xff]  }
 0x1e4   :  { %3951 = vmatpush3.bf16.msra.mxu0 %v4213_v44  ;;  %3963 = vmatpush3.bf16.msra.mxu1 %v4219_v5 }
 0x1e5   :  { %3952 = vmatprep.subr.bf16.mxu0 %v4214_v59  ;;  %3964 = vmatprep.subr.bf16.mxu1 %v4220_v6 }
 0x1e8   :  { %3953 = vmatpush3.bf16.msra.mxu0 %v4215_v50  ;;  %3965 = vmatpush3.bf16.msra.mxu1 %v4221_v35 }
 0x1e9   :  { %3954 = vmatprep.subr.bf16.mxu0 %v4216_v57  ;;  %3966 = vmatprep.subr.bf16.mxu1 %v4222_v16 }
 0x1ec   :  { %3955 = vmatpush3.bf16.msra.mxu0 %v4217_v51  ;;  %3967 = vmatpush3.bf16.msra.mxu1 %v4223_v36 }
 0x1ed   :  { %3968 = vmatprep.subr.bf16.mxu1 %v4224_v10 }
 0x1f0   :  { %3969 = vmatpush3.bf16.msra.mxu1 %v4225_v18 }
 0x1f1   :  { %3970 = vmatprep.subr.bf16.mxu1 %v4226_v13 }
 0x1f4   :  { %3971 = vmatpush3.bf16.msra.mxu1 %v4227_v33 }
 0x1f5   :  { %3972 = vmatprep.subr.bf16.mxu1 %v4228_v52 }
 0x1f8   :  { %3973 = vmatpush3.bf16.msra.mxu1 %v4229_v53 }
 0x1f9   :  { %3974 = vmatprep.subr.bf16.mxu1 %v4230_v4 }
 0x1fc   :  { %3975 = vmatpush3.bf16.msra.mxu1 %v4231_v42 }
 0x1fd   :  { %3976 = vmatprep.subr.bf16.mxu1 %v4232_v23 }
 0x200   :  { %3977 = vmatpush3.bf16.msra.mxu1 %v4233_v27 }
 0x24f   :  { %v3239_v17 = vpop.f32.mrf.mxu0 }
 0x250   :  { %v3240_v28 = vadd.f32 %v3239_v17, %v5667_v2 }
 0x251   :  { %v3241_v45 = vpop.f32.mrf.mxu0 }
 0x252   :  { %v3242_v46 = vadd.f32 %v3241_v45, %v5677_v48  ;;  %v3381_v48 = vsub.s32 2, %v4874_v8 }
 0x253   :  { %v3243_v11 = vpop.f32.mrf.mxu0 }
 0x254   :  { %v3382_v14 = vrot.slane %v3369_v62, %v3381_v48 }
 0x255   :  { %v3244_v12 = vpop.f32.mrf.mxu0 }
 0x263   :  { %v3280_v21 = vpop.f32.mrf.mxu1 }
 0x264   :  { %v3281_v34 = vadd.f32 %v3280_v21, %v3240_v28 }
 0x265   :  { %v3282_v26 = vpop.f32.mrf.mxu1 }
 0x266   :  { %v3391_v32 = vadd.f32 %v3374_v29, %v3281_v34  ;;  %v3283_v7 = vadd.f32 %v3282_v26, %v3242_v46 }
 0x267   :  { %v3284_v3 = vpop.f32.mrf.mxu1 }
 0x268   :  { %v3392_v54 = vadd.f32 %v3378_v22, %v3283_v7  ;;  %v3395_v61 = vmax.f32 %v3391_v32, 0.0 }
 0x269   :  { %v3285_v37 = vpop.f32.mrf.mxu1 }
 0x26a   :  { %v3396_v15 = vmax.f32 %v3392_v54, 0.0  ;;  %v3399_v24 = vpack.c.bf16 %v3395_v61, %v3395_v61 }
 0x26c   :  { %v3400_v31 = vpack.c.bf16 %v3396_v15, %v3396_v15 }
 0x26e   :  { %3698 = vmatprep.mubr.bf16.mxu0 %v3400_v31 }
 0x26f   :  { %3699 = vmatmul.mubr.bf16.vlgmr.msra.gmra.mxu0 %v3399_v24 }
 0x28f   :  { %v3321_v38 = vpop.f32.mrf.mxu0 }
 0x290   :  { %v3322_v49 = vadd.f32 %v3321_v38, %v5725_v1 }
 0x291   :  { %v3323_v2 = vpop.f32.mrf.mxu0 }
 0x292   :  { %v3324_v47 = vadd.f32 %v3323_v2, %v5730_v39  ;;  %v3907_v39 = vld [vmem:[%s6013_s6] ss:$0 sm:$0xff] }
 0x293   :  { %v3325_v20 = vpop.f32.mrf.mxu0 }
 0x295   :  { %v3326_v43 = vpop.f32.mrf.mxu0 }
 0x2a3   :  { %v3362_v56 = vpop.f32.mrf.mxu1 }
 0x2a4   :  { %v3363_v63 = vadd.f32 %v3362_v56, %v3322_v49 }
 0x2a5   :  { %v3364_v19 = vpop.f32.mrf.mxu1 }
 0x2a6   :  { %v3393_v0 = vadd.f32 %v3382_v14, %v3363_v63  ;;  %v3365_v30 = vadd.f32 %v3364_v19, %v3324_v47 }
 0x2a7   :  { %v3366_v58 = vpop.f32.mrf.mxu1 }
 0x2a8   :  { %v3394_v60 = vadd.f32 %v3386_v41, %v3365_v30  ;;  %v3397_v44 = vmax.f32 %v3393_v0, 0.0 }
 0x2a9   :  { %v3367_v59 = vpop.f32.mrf.mxu1 }
 0x2aa   :  { %v3398_v50 = vmax.f32 %v3394_v60, 0.0  ;;  %v3401_v51 = vpack.c.bf16 %v3397_v44, %v3397_v44 }
 0x2ac   :  { %v3402_v57 = vpack.c.bf16 %v3398_v50, %v3398_v50 }
 0x2ae   :  { %3738 = vmatprep.mubr.bf16.mxu1 %v3402_v57 }
 0x2af   :  { %3739 = vmatmul.mubr.bf16.vlgmr.msra.gmra.mxu1 %v3401_v51 }
 0x32f   :  { %v3956_v8 = vpop.f32.mrf.mxu0 }
 0x331   :  { %v3957_v1 = vpop.f32.mrf.mxu0 }
 0x332   :  { %v3958_v6 = vadd.f32 %v3957_v1, %v3956_v8 }
 0x333   :  { %v3959_v25 = vpop.f32.mrf.mxu0 }
 0x334   :  { %v3701_v36 = vadd.f32 %v3958_v6, %v3907_v39 }
 0x335   :  { %v3960_v5 = vpop.f32.mrf.mxu0 }
 0x36f   :  { %v3978_v35 = vpop.f32.mrf.mxu1 }
 0x371   :  { %v3979_v16 = vpop.f32.mrf.mxu1 }
 0x372   :  { %v3980_v10 = vadd.f32 %v3979_v16, %v3978_v35 }
 0x373   :  { %v3981_v18 = vpop.f32.mrf.mxu1 }
 0x374   :  { %v3741_v13 = vadd.f32 %v3980_v10, %v3701_v36 }
 0x375   :  { %v3982_v33 = vpop.f32.mrf.mxu1 }
 0x376   :  { %3746 = vst [vmem:[#allocation3] sm:$0x3] %v3741_v13 }
 0x377   :  { %4245 = shalt.err (!%p4242_p4)
}
 0x378   :  { %3756 = dma.vmem_to_hbm [thread:$0]  %s3754_s21, 32, %s6014_s7, [#allocation4]  }
 0x379   :  { %4254 = dma.done.wait [#allocation4], 32  }
 0x37a   :  { %4255 = vsyncadd [#allocation4], 4294967264 }
 0x37b   :  { %3760 = vsyncpa [#allocation4], 1 }

</bundles_post_ra>
